<compile_context>
chip_gen: v7x
topology: tpu7x:2x2x1
jax: 0.10.0
libtpu: 0.0.40
codegen_flags: <defaults>
</compile_context>

<pallas_src>
import functools

import jax
import jax.numpy as jnp
from jax.experimental import pallas as pl
from jax.experimental.pallas import tpu as pltpu

KSIZE = 7
PAD = KSIZE // 2


def _spatial_attention_kernel(w_ref, x_ref, o_ref, *, H, W):
    # w_ref: SMEM (2*K*K,) flattened conv weights (out=1, in=2, K, K)
    #        channel 0 convolves the MAX map, channel 1 the MEAN map
    #        (this module does torch.cat([max, mean]); canonical CBAM repos that
    #        cat([avg, max]) would need the two weight planes swapped).
    # x_ref/o_ref: VMEM (1, C, H*W) lane-dense image blocks
    C = x_ref.shape[1]
    HW = H * W
    base = PAD * W + PAD        # zero pad on each side of the flat map
    E = HW + 2 * PAD * W        # extended window covering all row offsets

    # ---- hoist all conv-weight scalar (SMEM) reads ahead of vector work ----
    w_max = [w_ref[i] for i in range(KSIZE * KSIZE)]
    w_mean = [w_ref[KSIZE * KSIZE + i] for i in range(KSIZE * KSIZE)]

    # ---- channel pooling: the dominant O(C*HW) elementwise work, lane-dense --
    xs = x_ref[0]                                             # (C, HW), native dtype
    max_map = jnp.max(xs, axis=0, keepdims=True).astype(jnp.float32)     # (1, HW)
    mean_map = jnp.sum(xs, axis=0, keepdims=True, dtype=jnp.float32) * (1.0 / C)

    # Zero-pad the flattened maps on both ends so out-of-range ROW taps read
    # zeros (any flat read that lands back in real data necessarily has an
    # out-of-range COLUMN and is masked below).
    zpad = jnp.zeros((1, base), jnp.float32)
    pmax = jnp.concatenate([zpad, max_map, zpad], axis=1)     # (1, HW + 2*base)
    pmean = jnp.concatenate([zpad, mean_map, zpad], axis=1)

    # Column index of every position in the extended window (row-wrap mask).
    col = jax.lax.broadcasted_iota(jnp.int32, (1, E), 1) % W

    # Pre-shift per column offset dj: 7 small lane shifts per map (14 total),
    # masked once, reused across all 7 row offsets di.
    s_max = []
    s_mean = []
    for dj in range(KSIZE):
        jj = dj - PAD
        valid = jnp.logical_and(col + jj >= 0, col + jj < W)
        s_max.append(jnp.where(valid, pmax[:, dj:dj + E], 0.0))
        s_mean.append(jnp.where(valid, pmean[:, dj:dj + E], 0.0))

    # For each row offset di: VALU-only weighted combine over dj (two
    # accumulators break the serial add chain -- no f32 FMA on the VPU), then
    # ONE lane shift by di*W lines the combined row up with the output.
    conv = jnp.zeros((1, HW), jnp.float32)
    for di in range(KSIZE):
        acc0 = w_max[di * KSIZE + 0] * s_max[0] + w_mean[di * KSIZE + 0] * s_mean[0]
        acc1 = w_max[di * KSIZE + 1] * s_max[1] + w_mean[di * KSIZE + 1] * s_mean[1]
        for dj in range(2, KSIZE):
            t = (w_max[di * KSIZE + dj] * s_max[dj]
                 + w_mean[di * KSIZE + dj] * s_mean[dj])
            if dj % 2 == 0:
                acc0 = acc0 + t
            else:
                acc1 = acc1 + t
        b = acc0 + acc1                                       # (1, E)
        conv = conv + b[:, di * W: di * W + HW]               # single shift per di

    att = jax.nn.sigmoid(conv)                                # (1, HW)

    # Re-read the input block for the final scale (no full-size f32 temp is
    # held live across the conv phase) and store lane-dense.
    o_ref[0] = (att * x_ref[0].astype(jnp.float32)).astype(o_ref.dtype)


def spatial_attention(x, conv_weight):
    """x: (N, C, H, W); conv_weight: (1, 2, K, K), no bias, K == 7."""
    N, C, H, W = x.shape
    HW = H * W

    x_flat = x.reshape(N, C, HW)                              # metadata-only reshape
    w_flat = conv_weight.reshape(-1).astype(jnp.float32)      # (2*K*K,)

    kernel = functools.partial(_spatial_attention_kernel, H=H, W=W)

    # Explicit scoped-VMEM budget: in + out blocks are double-buffered, plus the
    # small f32 conv temporaries (padded maps, 14 shifted copies, accumulators).
    itemsize = jnp.dtype(x.dtype).itemsize
    block_bytes = C * HW * itemsize
    conv_bytes = 40 * (HW + 6 * W + 8) * 4
    vmem_limit = int(min(max(4 * block_bytes + conv_bytes + (2 << 20), 8 << 20),
                         64 << 20))

    out_flat = pl.pallas_call(
        kernel,
        out_shape=jax.ShapeDtypeStruct((N, C, HW), x.dtype),
        grid_spec=pltpu.PrefetchScalarGridSpec(
            num_scalar_prefetch=0,
            grid=(N,),
            in_specs=[
                pl.BlockSpec(memory_space=pltpu.SMEM),              # conv weights
                pl.BlockSpec((1, C, HW), lambda n: (n, 0, 0)),      # one image
            ],
            out_specs=pl.BlockSpec((1, C, HW), lambda n: (n, 0, 0)),
        ),
        compiler_params=pltpu.CompilerParams(
            dimension_semantics=("parallel",),   # independent images -> megacore
            vmem_limit_bytes=vmem_limit,
        ),
    )(w_flat, x_flat)

    return out_flat.reshape(N, C, H, W)


def _reference(x, conv_weight):
    max_p = jnp.max(x, axis=1, keepdims=True)
    mean_p = jnp.mean(x, axis=1, keepdims=True)
    pool = jnp.concatenate([max_p, mean_p], axis=1)
    conv = jax.lax.conv_general_dilated(
        pool, conv_weight, window_strides=(1, 1),
        padding=[(PAD, PAD), (PAD, PAD)],
        dimension_numbers=("NCHW", "OIHW", "NCHW"))
    return jax.nn.sigmoid(conv) * x


if __name__ == "__main__":
    key = jax.random.PRNGKey(0)
    kx, kw = jax.random.split(key)

    N, C, H, W = 2, 4, 16, 16
    x = jax.random.normal(kx, (N, C, H, W), dtype=jnp.float32)
    # Deterministic synthetic conv weight (PyTorch shape: out=1, in=2, K, K).
    conv_weight = 0.1 * jax.random.normal(kw, (1, 2, KSIZE, KSIZE), dtype=jnp.float32)

    out = jax.block_until_ready(spatial_attention(x, conv_weight))
    ref = jax.block_until_ready(_reference(x, conv_weight))

    assert out.shape == (N, C, H, W)
    err = jnp.max(jnp.abs(out - ref))
    assert jnp.allclose(out, ref, atol=1e-4, rtol=1e-4), f"max abs err = {err}"

    print("KERNEL_OK")
</pallas_src>

<mosaic_0001>
module attributes {stable_mosaic.version = 11 : i64} {
  func.func @_spatial_attention_kernel(%arg0: i32, %arg1: memref<98xf32, #tpu.memory_space<smem>>, %arg2: memref<1x4x256xf32, #tpu.memory_space<vmem>>, %arg3: memref<1x4x256xf32, #tpu.memory_space<vmem>>) attributes {dimension_semantics = [#tpu.dimension_semantics<parallel>], iteration_bounds = array<i64: 2>, scalar_prefetch = 0 : i64, scratch_operands = 0 : i64, tpu.core_type = #tpu.core_type<tc>, window_params = [{transform_indices = @transform_0, window_bounds = array<i64: 98>}, {transform_indices = @transform_1, window_bounds = array<i64: 1, 4, 256>}, {transform_indices = @transform_2, window_bounds = array<i64: 1, 4, 256>}]} {
    %c0 = arith.constant 0 : index
    %0 = memref.load %arg1[%c0] : memref<98xf32, #tpu.memory_space<smem>>
    %c1 = arith.constant 1 : index
    %1 = memref.load %arg1[%c1] : memref<98xf32, #tpu.memory_space<smem>>
    %c2 = arith.constant 2 : index
    %2 = memref.load %arg1[%c2] : memref<98xf32, #tpu.memory_space<smem>>
    %c3 = arith.constant 3 : index
    %3 = memref.load %arg1[%c3] : memref<98xf32, #tpu.memory_space<smem>>
    %c4 = arith.constant 4 : index
    %4 = memref.load %arg1[%c4] : memref<98xf32, #tpu.memory_space<smem>>
    %c5 = arith.constant 5 : index
    %5 = memref.load %arg1[%c5] : memref<98xf32, #tpu.memory_space<smem>>
    %c6 = arith.constant 6 : index
    %6 = memref.load %arg1[%c6] : memref<98xf32, #tpu.memory_space<smem>>
    %c7 = arith.constant 7 : index
    %7 = memref.load %arg1[%c7] : memref<98xf32, #tpu.memory_space<smem>>
    %c8 = arith.constant 8 : index
    %8 = memref.load %arg1[%c8] : memref<98xf32, #tpu.memory_space<smem>>
    %c9 = arith.constant 9 : index
    %9 = memref.load %arg1[%c9] : memref<98xf32, #tpu.memory_space<smem>>
    %c10 = arith.constant 10 : index
    %10 = memref.load %arg1[%c10] : memref<98xf32, #tpu.memory_space<smem>>
    %c11 = arith.constant 11 : index
    %11 = memref.load %arg1[%c11] : memref<98xf32, #tpu.memory_space<smem>>
    %c12 = arith.constant 12 : index
    %12 = memref.load %arg1[%c12] : memref<98xf32, #tpu.memory_space<smem>>
    %c13 = arith.constant 13 : index
    %13 = memref.load %arg1[%c13] : memref<98xf32, #tpu.memory_space<smem>>
    %c14 = arith.constant 14 : index
    %14 = memref.load %arg1[%c14] : memref<98xf32, #tpu.memory_space<smem>>
    %c15 = arith.constant 15 : index
    %15 = memref.load %arg1[%c15] : memref<98xf32, #tpu.memory_space<smem>>
    %c16 = arith.constant 16 : index
    %16 = memref.load %arg1[%c16] : memref<98xf32, #tpu.memory_space<smem>>
    %c17 = arith.constant 17 : index
    %17 = memref.load %arg1[%c17] : memref<98xf32, #tpu.memory_space<smem>>
    %c18 = arith.constant 18 : index
    %18 = memref.load %arg1[%c18] : memref<98xf32, #tpu.memory_space<smem>>
    %c19 = arith.constant 19 : index
    %19 = memref.load %arg1[%c19] : memref<98xf32, #tpu.memory_space<smem>>
    %c20 = arith.constant 20 : index
    %20 = memref.load %arg1[%c20] : memref<98xf32, #tpu.memory_space<smem>>
    %c21 = arith.constant 21 : index
    %21 = memref.load %arg1[%c21] : memref<98xf32, #tpu.memory_space<smem>>
    %c22 = arith.constant 22 : index
    %22 = memref.load %arg1[%c22] : memref<98xf32, #tpu.memory_space<smem>>
    %c23 = arith.constant 23 : index
    %23 = memref.load %arg1[%c23] : memref<98xf32, #tpu.memory_space<smem>>
    %c24 = arith.constant 24 : index
    %24 = memref.load %arg1[%c24] : memref<98xf32, #tpu.memory_space<smem>>
    %c25 = arith.constant 25 : index
    %25 = memref.load %arg1[%c25] : memref<98xf32, #tpu.memory_space<smem>>
    %c26 = arith.constant 26 : index
    %26 = memref.load %arg1[%c26] : memref<98xf32, #tpu.memory_space<smem>>
    %c27 = arith.constant 27 : index
    %27 = memref.load %arg1[%c27] : memref<98xf32, #tpu.memory_space<smem>>
    %c28 = arith.constant 28 : index
    %28 = memref.load %arg1[%c28] : memref<98xf32, #tpu.memory_space<smem>>
    %c29 = arith.constant 29 : index
    %29 = memref.load %arg1[%c29] : memref<98xf32, #tpu.memory_space<smem>>
    %c30 = arith.constant 30 : index
    %30 = memref.load %arg1[%c30] : memref<98xf32, #tpu.memory_space<smem>>
    %c31 = arith.constant 31 : index
    %31 = memref.load %arg1[%c31] : memref<98xf32, #tpu.memory_space<smem>>
    %c32 = arith.constant 32 : index
    %32 = memref.load %arg1[%c32] : memref<98xf32, #tpu.memory_space<smem>>
    %c33 = arith.constant 33 : index
    %33 = memref.load %arg1[%c33] : memref<98xf32, #tpu.memory_space<smem>>
    %c34 = arith.constant 34 : index
    %34 = memref.load %arg1[%c34] : memref<98xf32, #tpu.memory_space<smem>>
    %c35 = arith.constant 35 : index
    %35 = memref.load %arg1[%c35] : memref<98xf32, #tpu.memory_space<smem>>
    %c36 = arith.constant 36 : index
    %36 = memref.load %arg1[%c36] : memref<98xf32, #tpu.memory_space<smem>>
    %c37 = arith.constant 37 : index
    %37 = memref.load %arg1[%c37] : memref<98xf32, #tpu.memory_space<smem>>
    %c38 = arith.constant 38 : index
    %38 = memref.load %arg1[%c38] : memref<98xf32, #tpu.memory_space<smem>>
    %c39 = arith.constant 39 : index
    %39 = memref.load %arg1[%c39] : memref<98xf32, #tpu.memory_space<smem>>
    %c40 = arith.constant 40 : index
    %40 = memref.load %arg1[%c40] : memref<98xf32, #tpu.memory_space<smem>>
    %c41 = arith.constant 41 : index
    %41 = memref.load %arg1[%c41] : memref<98xf32, #tpu.memory_space<smem>>
    %c42 = arith.constant 42 : index
    %42 = memref.load %arg1[%c42] : memref<98xf32, #tpu.memory_space<smem>>
    %c43 = arith.constant 43 : index
    %43 = memref.load %arg1[%c43] : memref<98xf32, #tpu.memory_space<smem>>
    %c44 = arith.constant 44 : index
    %44 = memref.load %arg1[%c44] : memref<98xf32, #tpu.memory_space<smem>>
    %c45 = arith.constant 45 : index
    %45 = memref.load %arg1[%c45] : memref<98xf32, #tpu.memory_space<smem>>
    %c46 = arith.constant 46 : index
    %46 = memref.load %arg1[%c46] : memref<98xf32, #tpu.memory_space<smem>>
    %c47 = arith.constant 47 : index
    %47 = memref.load %arg1[%c47] : memref<98xf32, #tpu.memory_space<smem>>
    %c48 = arith.constant 48 : index
    %48 = memref.load %arg1[%c48] : memref<98xf32, #tpu.memory_space<smem>>
    %c49 = arith.constant 49 : index
    %49 = memref.load %arg1[%c49] : memref<98xf32, #tpu.memory_space<smem>>
    %c50 = arith.constant 50 : index
    %50 = memref.load %arg1[%c50] : memref<98xf32, #tpu.memory_space<smem>>
    %c51 = arith.constant 51 : index
    %51 = memref.load %arg1[%c51] : memref<98xf32, #tpu.memory_space<smem>>
    %c52 = arith.constant 52 : index
    %52 = memref.load %arg1[%c52] : memref<98xf32, #tpu.memory_space<smem>>
    %c53 = arith.constant 53 : index
    %53 = memref.load %arg1[%c53] : memref<98xf32, #tpu.memory_space<smem>>
    %c54 = arith.constant 54 : index
    %54 = memref.load %arg1[%c54] : memref<98xf32, #tpu.memory_space<smem>>
    %c55 = arith.constant 55 : index
    %55 = memref.load %arg1[%c55] : memref<98xf32, #tpu.memory_space<smem>>
    %c56 = arith.constant 56 : index
    %56 = memref.load %arg1[%c56] : memref<98xf32, #tpu.memory_space<smem>>
    %c57 = arith.constant 57 : index
    %57 = memref.load %arg1[%c57] : memref<98xf32, #tpu.memory_space<smem>>
    %c58 = arith.constant 58 : index
    %58 = memref.load %arg1[%c58] : memref<98xf32, #tpu.memory_space<smem>>
    %c59 = arith.constant 59 : index
    %59 = memref.load %arg1[%c59] : memref<98xf32, #tpu.memory_space<smem>>
    %c60 = arith.constant 60 : index
    %60 = memref.load %arg1[%c60] : memref<98xf32, #tpu.memory_space<smem>>
    %c61 = arith.constant 61 : index
    %61 = memref.load %arg1[%c61] : memref<98xf32, #tpu.memory_space<smem>>
    %c62 = arith.constant 62 : index
    %62 = memref.load %arg1[%c62] : memref<98xf32, #tpu.memory_space<smem>>
    %c63 = arith.constant 63 : index
    %63 = memref.load %arg1[%c63] : memref<98xf32, #tpu.memory_space<smem>>
    %c64 = arith.constant 64 : index
    %64 = memref.load %arg1[%c64] : memref<98xf32, #tpu.memory_space<smem>>
    %c65 = arith.constant 65 : index
    %65 = memref.load %arg1[%c65] : memref<98xf32, #tpu.memory_space<smem>>
    %c66 = arith.constant 66 : index
    %66 = memref.load %arg1[%c66] : memref<98xf32, #tpu.memory_space<smem>>
    %c67 = arith.constant 67 : index
    %67 = memref.load %arg1[%c67] : memref<98xf32, #tpu.memory_space<smem>>
    %c68 = arith.constant 68 : index
    %68 = memref.load %arg1[%c68] : memref<98xf32, #tpu.memory_space<smem>>
    %c69 = arith.constant 69 : index
    %69 = memref.load %arg1[%c69] : memref<98xf32, #tpu.memory_space<smem>>
    %c70 = arith.constant 70 : index
    %70 = memref.load %arg1[%c70] : memref<98xf32, #tpu.memory_space<smem>>
    %c71 = arith.constant 71 : index
    %71 = memref.load %arg1[%c71] : memref<98xf32, #tpu.memory_space<smem>>
    %c72 = arith.constant 72 : index
    %72 = memref.load %arg1[%c72] : memref<98xf32, #tpu.memory_space<smem>>
    %c73 = arith.constant 73 : index
    %73 = memref.load %arg1[%c73] : memref<98xf32, #tpu.memory_space<smem>>
    %c74 = arith.constant 74 : index
    %74 = memref.load %arg1[%c74] : memref<98xf32, #tpu.memory_space<smem>>
    %c75 = arith.constant 75 : index
    %75 = memref.load %arg1[%c75] : memref<98xf32, #tpu.memory_space<smem>>
    %c76 = arith.constant 76 : index
    %76 = memref.load %arg1[%c76] : memref<98xf32, #tpu.memory_space<smem>>
    %c77 = arith.constant 77 : index
    %77 = memref.load %arg1[%c77] : memref<98xf32, #tpu.memory_space<smem>>
    %c78 = arith.constant 78 : index
    %78 = memref.load %arg1[%c78] : memref<98xf32, #tpu.memory_space<smem>>
    %c79 = arith.constant 79 : index
    %79 = memref.load %arg1[%c79] : memref<98xf32, #tpu.memory_space<smem>>
    %c80 = arith.constant 80 : index
    %80 = memref.load %arg1[%c80] : memref<98xf32, #tpu.memory_space<smem>>
    %c81 = arith.constant 81 : index
    %81 = memref.load %arg1[%c81] : memref<98xf32, #tpu.memory_space<smem>>
    %c82 = arith.constant 82 : index
    %82 = memref.load %arg1[%c82] : memref<98xf32, #tpu.memory_space<smem>>
    %c83 = arith.constant 83 : index
    %83 = memref.load %arg1[%c83] : memref<98xf32, #tpu.memory_space<smem>>
    %c84 = arith.constant 84 : index
    %84 = memref.load %arg1[%c84] : memref<98xf32, #tpu.memory_space<smem>>
    %c85 = arith.constant 85 : index
    %85 = memref.load %arg1[%c85] : memref<98xf32, #tpu.memory_space<smem>>
    %c86 = arith.constant 86 : index
    %86 = memref.load %arg1[%c86] : memref<98xf32, #tpu.memory_space<smem>>
    %c87 = arith.constant 87 : index
    %87 = memref.load %arg1[%c87] : memref<98xf32, #tpu.memory_space<smem>>
    %c88 = arith.constant 88 : index
    %88 = memref.load %arg1[%c88] : memref<98xf32, #tpu.memory_space<smem>>
    %c89 = arith.constant 89 : index
    %89 = memref.load %arg1[%c89] : memref<98xf32, #tpu.memory_space<smem>>
    %c90 = arith.constant 90 : index
    %90 = memref.load %arg1[%c90] : memref<98xf32, #tpu.memory_space<smem>>
    %c91 = arith.constant 91 : index
    %91 = memref.load %arg1[%c91] : memref<98xf32, #tpu.memory_space<smem>>
    %c92 = arith.constant 92 : index
    %92 = memref.load %arg1[%c92] : memref<98xf32, #tpu.memory_space<smem>>
    %c93 = arith.constant 93 : index
    %93 = memref.load %arg1[%c93] : memref<98xf32, #tpu.memory_space<smem>>
    %c94 = arith.constant 94 : index
    %94 = memref.load %arg1[%c94] : memref<98xf32, #tpu.memory_space<smem>>
    %c95 = arith.constant 95 : index
    %95 = memref.load %arg1[%c95] : memref<98xf32, #tpu.memory_space<smem>>
    %c96 = arith.constant 96 : index
    %96 = memref.load %arg1[%c96] : memref<98xf32, #tpu.memory_space<smem>>
    %c97 = arith.constant 97 : index
    %97 = memref.load %arg1[%c97] : memref<98xf32, #tpu.memory_space<smem>>
    %c0_0 = arith.constant 0 : index
    %c0_1 = arith.constant 0 : index
    %c0_2 = arith.constant 0 : index
    %98 = vector.load %arg2[%c0_0, %c0_1, %c0_2] : memref<1x4x256xf32, #tpu.memory_space<vmem>>, vector<1x4x256xf32>
    %99 = vector.shape_cast %98 : vector<1x4x256xf32> to vector<4x256xf32>
    %cst = arith.constant dense<0xFF800000> : vector<256xf32>
    %100 = vector.multi_reduction <maximumf>, %99, %cst [0] : vector<4x256xf32> to vector<256xf32>
    %101 = vector.shape_cast %100 : vector<256xf32> to vector<1x256xf32>
    %cst_3 = arith.constant dense<0.000000e+00> : vector<256xf32>
    %102 = vector.multi_reduction <add>, %99, %cst_3 [0] : vector<4x256xf32> to vector<256xf32>
    %103 = vector.shape_cast %102 : vector<256xf32> to vector<1x256xf32>
    %cst_4 = arith.constant 2.500000e-01 : f32
    %104 = vector.broadcast %cst_4 : f32 to vector<1x256xf32>
    %105 = arith.mulf %103, %104 : vector<1x256xf32>
    %cst_5 = arith.constant 0.000000e+00 : f32
    %106 = vector.broadcast %cst_5 : f32 to vector<1x51xf32>
    %107 = tpu.concatenate %106, %101, %106 in 1 : vector<1x51xf32>, vector<1x256xf32>, vector<1x51xf32> -> vector<1x358xf32>
    %108 = tpu.concatenate %106, %105, %106 in 1 : vector<1x51xf32>, vector<1x256xf32>, vector<1x51xf32> -> vector<1x358xf32>
    %109 = tpu.iota {dimensions = array<i32: 1>} : vector<1x352xi32>
    %c16_i32 = arith.constant 16 : i32
    %c0_i32 = arith.constant 0 : i32
    %110 = arith.cmpi eq, %c16_i32, %c0_i32 : i32
    %c1_i32 = arith.constant 1 : i32
    %111 = arith.select %110, %c1_i32, %c16_i32 : i32
    %112 = vector.broadcast %111 : i32 to vector<1x352xi32>
    %113 = arith.remsi %109, %112 : vector<1x352xi32>
    %c0_i32_6 = arith.constant 0 : i32
    %114 = vector.broadcast %c0_i32_6 : i32 to vector<1x352xi32>
    %115 = arith.cmpi ne, %113, %114 : vector<1x352xi32>
    %c0_i32_7 = arith.constant 0 : i32
    %116 = vector.broadcast %c0_i32_7 : i32 to vector<1x352xi32>
    %117 = arith.cmpi slt, %113, %116 : vector<1x352xi32>
    %c0_i32_8 = arith.constant 0 : i32
    %118 = arith.cmpi slt, %111, %c0_i32_8 : i32
    %119 = vector.broadcast %118 : i1 to vector<1x352xi1>
    %120 = vector.broadcast %119 : vector<1x352xi1> to vector<1x352xi1>
    %121 = arith.xori %117, %120 : vector<1x352xi1>
    %122 = arith.andi %121, %115 : vector<1x352xi1>
    %123 = vector.broadcast %111 : i32 to vector<1x352xi32>
    %124 = arith.addi %113, %123 : vector<1x352xi32>
    %125 = arith.select %122, %124, %113 : vector<1x352xi1>, vector<1x352xi32>
    %c-3_i32 = arith.constant -3 : i32
    %126 = vector.broadcast %c-3_i32 : i32 to vector<1x352xi32>
    %127 = arith.addi %125, %126 : vector<1x352xi32>
    %c0_i32_9 = arith.constant 0 : i32
    %128 = vector.broadcast %c0_i32_9 : i32 to vector<1x352xi32>
    %129 = arith.cmpi sge, %127, %128 : vector<1x352xi32>
    %c-3_i32_10 = arith.constant -3 : i32
    %130 = vector.broadcast %c-3_i32_10 : i32 to vector<1x352xi32>
    %131 = arith.addi %125, %130 : vector<1x352xi32>
    %c16_i32_11 = arith.constant 16 : i32
    %132 = vector.broadcast %c16_i32_11 : i32 to vector<1x352xi32>
    %133 = arith.cmpi slt, %131, %132 : vector<1x352xi32>
    %134 = arith.andi %129, %133 : vector<1x352xi1>
    %135 = vector.extract_strided_slice %107 {offsets = [0, 0], sizes = [1, 352], strides = [1, 1]} : vector<1x358xf32> to vector<1x352xf32>
    %cst_12 = arith.constant 0.000000e+00 : f32
    %136 = vector.broadcast %cst_12 : f32 to vector<1x352xf32>
    %137 = arith.select %134, %135, %136 : vector<1x352xi1>, vector<1x352xf32>
    %138 = vector.extract_strided_slice %108 {offsets = [0, 0], sizes = [1, 352], strides = [1, 1]} : vector<1x358xf32> to vector<1x352xf32>
    %cst_13 = arith.constant 0.000000e+00 : f32
    %139 = vector.broadcast %cst_13 : f32 to vector<1x352xf32>
    %140 = arith.select %134, %138, %139 : vector<1x352xi1>, vector<1x352xf32>
    %c-2_i32 = arith.constant -2 : i32
    %141 = vector.broadcast %c-2_i32 : i32 to vector<1x352xi32>
    %142 = arith.addi %125, %141 : vector<1x352xi32>
    %c0_i32_14 = arith.constant 0 : i32
    %143 = vector.broadcast %c0_i32_14 : i32 to vector<1x352xi32>
    %144 = arith.cmpi sge, %142, %143 : vector<1x352xi32>
    %c-2_i32_15 = arith.constant -2 : i32
    %145 = vector.broadcast %c-2_i32_15 : i32 to vector<1x352xi32>
    %146 = arith.addi %125, %145 : vector<1x352xi32>
    %c16_i32_16 = arith.constant 16 : i32
    %147 = vector.broadcast %c16_i32_16 : i32 to vector<1x352xi32>
    %148 = arith.cmpi slt, %146, %147 : vector<1x352xi32>
    %149 = arith.andi %144, %148 : vector<1x352xi1>
    %150 = vector.extract_strided_slice %107 {offsets = [0, 1], sizes = [1, 352], strides = [1, 1]} : vector<1x358xf32> to vector<1x352xf32>
    %cst_17 = arith.constant 0.000000e+00 : f32
    %151 = vector.broadcast %cst_17 : f32 to vector<1x352xf32>
    %152 = arith.select %149, %150, %151 : vector<1x352xi1>, vector<1x352xf32>
    %153 = vector.extract_strided_slice %108 {offsets = [0, 1], sizes = [1, 352], strides = [1, 1]} : vector<1x358xf32> to vector<1x352xf32>
    %cst_18 = arith.constant 0.000000e+00 : f32
    %154 = vector.broadcast %cst_18 : f32 to vector<1x352xf32>
    %155 = arith.select %149, %153, %154 : vector<1x352xi1>, vector<1x352xf32>
    %c-1_i32 = arith.constant -1 : i32
    %156 = vector.broadcast %c-1_i32 : i32 to vector<1x352xi32>
    %157 = arith.addi %125, %156 : vector<1x352xi32>
    %c0_i32_19 = arith.constant 0 : i32
    %158 = vector.broadcast %c0_i32_19 : i32 to vector<1x352xi32>
    %159 = arith.cmpi sge, %157, %158 : vector<1x352xi32>
    %c-1_i32_20 = arith.constant -1 : i32
    %160 = vector.broadcast %c-1_i32_20 : i32 to vector<1x352xi32>
    %161 = arith.addi %125, %160 : vector<1x352xi32>
    %c16_i32_21 = arith.constant 16 : i32
    %162 = vector.broadcast %c16_i32_21 : i32 to vector<1x352xi32>
    %163 = arith.cmpi slt, %161, %162 : vector<1x352xi32>
    %164 = arith.andi %159, %163 : vector<1x352xi1>
    %165 = vector.extract_strided_slice %107 {offsets = [0, 2], sizes = [1, 352], strides = [1, 1]} : vector<1x358xf32> to vector<1x352xf32>
    %cst_22 = arith.constant 0.000000e+00 : f32
    %166 = vector.broadcast %cst_22 : f32 to vector<1x352xf32>
    %167 = arith.select %164, %165, %166 : vector<1x352xi1>, vector<1x352xf32>
    %168 = vector.extract_strided_slice %108 {offsets = [0, 2], sizes = [1, 352], strides = [1, 1]} : vector<1x358xf32> to vector<1x352xf32>
    %cst_23 = arith.constant 0.000000e+00 : f32
    %169 = vector.broadcast %cst_23 : f32 to vector<1x352xf32>
    %170 = arith.select %164, %168, %169 : vector<1x352xi1>, vector<1x352xf32>
    %c0_i32_24 = arith.constant 0 : i32
    %171 = vector.broadcast %c0_i32_24 : i32 to vector<1x352xi32>
    %172 = arith.addi %125, %171 : vector<1x352xi32>
    %c0_i32_25 = arith.constant 0 : i32
    %173 = vector.broadcast %c0_i32_25 : i32 to vector<1x352xi32>
    %174 = arith.cmpi sge, %172, %173 : vector<1x352xi32>
    %c0_i32_26 = arith.constant 0 : i32
    %175 = vector.broadcast %c0_i32_26 : i32 to vector<1x352xi32>
    %176 = arith.addi %125, %175 : vector<1x352xi32>
    %c16_i32_27 = arith.constant 16 : i32
    %177 = vector.broadcast %c16_i32_27 : i32 to vector<1x352xi32>
    %178 = arith.cmpi slt, %176, %177 : vector<1x352xi32>
    %179 = arith.andi %174, %178 : vector<1x352xi1>
    %180 = vector.extract_strided_slice %107 {offsets = [0, 3], sizes = [1, 352], strides = [1, 1]} : vector<1x358xf32> to vector<1x352xf32>
    %cst_28 = arith.constant 0.000000e+00 : f32
    %181 = vector.broadcast %cst_28 : f32 to vector<1x352xf32>
    %182 = arith.select %179, %180, %181 : vector<1x352xi1>, vector<1x352xf32>
    %183 = vector.extract_strided_slice %108 {offsets = [0, 3], sizes = [1, 352], strides = [1, 1]} : vector<1x358xf32> to vector<1x352xf32>
    %cst_29 = arith.constant 0.000000e+00 : f32
    %184 = vector.broadcast %cst_29 : f32 to vector<1x352xf32>
    %185 = arith.select %179, %183, %184 : vector<1x352xi1>, vector<1x352xf32>
    %c1_i32_30 = arith.constant 1 : i32
    %186 = vector.broadcast %c1_i32_30 : i32 to vector<1x352xi32>
    %187 = arith.addi %125, %186 : vector<1x352xi32>
    %c0_i32_31 = arith.constant 0 : i32
    %188 = vector.broadcast %c0_i32_31 : i32 to vector<1x352xi32>
    %189 = arith.cmpi sge, %187, %188 : vector<1x352xi32>
    %c1_i32_32 = arith.constant 1 : i32
    %190 = vector.broadcast %c1_i32_32 : i32 to vector<1x352xi32>
    %191 = arith.addi %125, %190 : vector<1x352xi32>
    %c16_i32_33 = arith.constant 16 : i32
    %192 = vector.broadcast %c16_i32_33 : i32 to vector<1x352xi32>
    %193 = arith.cmpi slt, %191, %192 : vector<1x352xi32>
    %194 = arith.andi %189, %193 : vector<1x352xi1>
    %195 = vector.extract_strided_slice %107 {offsets = [0, 4], sizes = [1, 352], strides = [1, 1]} : vector<1x358xf32> to vector<1x352xf32>
    %cst_34 = arith.constant 0.000000e+00 : f32
    %196 = vector.broadcast %cst_34 : f32 to vector<1x352xf32>
    %197 = arith.select %194, %195, %196 : vector<1x352xi1>, vector<1x352xf32>
    %198 = vector.extract_strided_slice %108 {offsets = [0, 4], sizes = [1, 352], strides = [1, 1]} : vector<1x358xf32> to vector<1x352xf32>
    %cst_35 = arith.constant 0.000000e+00 : f32
    %199 = vector.broadcast %cst_35 : f32 to vector<1x352xf32>
    %200 = arith.select %194, %198, %199 : vector<1x352xi1>, vector<1x352xf32>
    %c2_i32 = arith.constant 2 : i32
    %201 = vector.broadcast %c2_i32 : i32 to vector<1x352xi32>
    %202 = arith.addi %125, %201 : vector<1x352xi32>
    %c0_i32_36 = arith.constant 0 : i32
    %203 = vector.broadcast %c0_i32_36 : i32 to vector<1x352xi32>
    %204 = arith.cmpi sge, %202, %203 : vector<1x352xi32>
    %c2_i32_37 = arith.constant 2 : i32
    %205 = vector.broadcast %c2_i32_37 : i32 to vector<1x352xi32>
    %206 = arith.addi %125, %205 : vector<1x352xi32>
    %c16_i32_38 = arith.constant 16 : i32
    %207 = vector.broadcast %c16_i32_38 : i32 to vector<1x352xi32>
    %208 = arith.cmpi slt, %206, %207 : vector<1x352xi32>
    %209 = arith.andi %204, %208 : vector<1x352xi1>
    %210 = vector.extract_strided_slice %107 {offsets = [0, 5], sizes = [1, 352], strides = [1, 1]} : vector<1x358xf32> to vector<1x352xf32>
    %cst_39 = arith.constant 0.000000e+00 : f32
    %211 = vector.broadcast %cst_39 : f32 to vector<1x352xf32>
    %212 = arith.select %209, %210, %211 : vector<1x352xi1>, vector<1x352xf32>
    %213 = vector.extract_strided_slice %108 {offsets = [0, 5], sizes = [1, 352], strides = [1, 1]} : vector<1x358xf32> to vector<1x352xf32>
    %cst_40 = arith.constant 0.000000e+00 : f32
    %214 = vector.broadcast %cst_40 : f32 to vector<1x352xf32>
    %215 = arith.select %209, %213, %214 : vector<1x352xi1>, vector<1x352xf32>
    %c3_i32 = arith.constant 3 : i32
    %216 = vector.broadcast %c3_i32 : i32 to vector<1x352xi32>
    %217 = arith.addi %125, %216 : vector<1x352xi32>
    %c0_i32_41 = arith.constant 0 : i32
    %218 = vector.broadcast %c0_i32_41 : i32 to vector<1x352xi32>
    %219 = arith.cmpi sge, %217, %218 : vector<1x352xi32>
    %c3_i32_42 = arith.constant 3 : i32
    %220 = vector.broadcast %c3_i32_42 : i32 to vector<1x352xi32>
    %221 = arith.addi %125, %220 : vector<1x352xi32>
    %c16_i32_43 = arith.constant 16 : i32
    %222 = vector.broadcast %c16_i32_43 : i32 to vector<1x352xi32>
    %223 = arith.cmpi slt, %221, %222 : vector<1x352xi32>
    %224 = arith.andi %219, %223 : vector<1x352xi1>
    %225 = vector.extract_strided_slice %107 {offsets = [0, 6], sizes = [1, 352], strides = [1, 1]} : vector<1x358xf32> to vector<1x352xf32>
    %cst_44 = arith.constant 0.000000e+00 : f32
    %226 = vector.broadcast %cst_44 : f32 to vector<1x352xf32>
    %227 = arith.select %224, %225, %226 : vector<1x352xi1>, vector<1x352xf32>
    %228 = vector.extract_strided_slice %108 {offsets = [0, 6], sizes = [1, 352], strides = [1, 1]} : vector<1x358xf32> to vector<1x352xf32>
    %cst_45 = arith.constant 0.000000e+00 : f32
    %229 = vector.broadcast %cst_45 : f32 to vector<1x352xf32>
    %230 = arith.select %224, %228, %229 : vector<1x352xi1>, vector<1x352xf32>
    %cst_46 = arith.constant 0.000000e+00 : f32
    %231 = vector.broadcast %cst_46 : f32 to vector<1x256xf32>
    %232 = vector.broadcast %0 : f32 to vector<1x352xf32>
    %233 = arith.mulf %232, %137 : vector<1x352xf32>
    %234 = vector.broadcast %49 : f32 to vector<1x352xf32>
    %235 = arith.mulf %234, %140 : vector<1x352xf32>
    %236 = arith.addf %233, %235 : vector<1x352xf32>
    %237 = vector.broadcast %1 : f32 to vector<1x352xf32>
    %238 = arith.mulf %237, %152 : vector<1x352xf32>
    %239 = vector.broadcast %50 : f32 to vector<1x352xf32>
    %240 = arith.mulf %239, %155 : vector<1x352xf32>
    %241 = arith.addf %238, %240 : vector<1x352xf32>
    %242 = vector.broadcast %2 : f32 to vector<1x352xf32>
    %243 = arith.mulf %242, %167 : vector<1x352xf32>
    %244 = vector.broadcast %51 : f32 to vector<1x352xf32>
    %245 = arith.mulf %244, %170 : vector<1x352xf32>
    %246 = arith.addf %243, %245 : vector<1x352xf32>
    %247 = arith.addf %236, %246 : vector<1x352xf32>
    %248 = vector.broadcast %3 : f32 to vector<1x352xf32>
    %249 = arith.mulf %248, %182 : vector<1x352xf32>
    %250 = vector.broadcast %52 : f32 to vector<1x352xf32>
    %251 = arith.mulf %250, %185 : vector<1x352xf32>
    %252 = arith.addf %249, %251 : vector<1x352xf32>
    %253 = arith.addf %241, %252 : vector<1x352xf32>
    %254 = vector.broadcast %4 : f32 to vector<1x352xf32>
    %255 = arith.mulf %254, %197 : vector<1x352xf32>
    %256 = vector.broadcast %53 : f32 to vector<1x352xf32>
    %257 = arith.mulf %256, %200 : vector<1x352xf32>
    %258 = arith.addf %255, %257 : vector<1x352xf32>
    %259 = arith.addf %247, %258 : vector<1x352xf32>
    %260 = vector.broadcast %5 : f32 to vector<1x352xf32>
    %261 = arith.mulf %260, %212 : vector<1x352xf32>
    %262 = vector.broadcast %54 : f32 to vector<1x352xf32>
    %263 = arith.mulf %262, %215 : vector<1x352xf32>
    %264 = arith.addf %261, %263 : vector<1x352xf32>
    %265 = arith.addf %253, %264 : vector<1x352xf32>
    %266 = vector.broadcast %6 : f32 to vector<1x352xf32>
    %267 = arith.mulf %266, %227 : vector<1x352xf32>
    %268 = vector.broadcast %55 : f32 to vector<1x352xf32>
    %269 = arith.mulf %268, %230 : vector<1x352xf32>
    %270 = arith.addf %267, %269 : vector<1x352xf32>
    %271 = arith.addf %259, %270 : vector<1x352xf32>
    %272 = arith.addf %271, %265 : vector<1x352xf32>
    %273 = vector.extract_strided_slice %272 {offsets = [0, 0], sizes = [1, 256], strides = [1, 1]} : vector<1x352xf32> to vector<1x256xf32>
    %274 = arith.addf %231, %273 : vector<1x256xf32>
    %275 = vector.broadcast %7 : f32 to vector<1x352xf32>
    %276 = arith.mulf %275, %137 : vector<1x352xf32>
    %277 = vector.broadcast %56 : f32 to vector<1x352xf32>
    %278 = arith.mulf %277, %140 : vector<1x352xf32>
    %279 = arith.addf %276, %278 : vector<1x352xf32>
    %280 = vector.broadcast %8 : f32 to vector<1x352xf32>
    %281 = arith.mulf %280, %152 : vector<1x352xf32>
    %282 = vector.broadcast %57 : f32 to vector<1x352xf32>
    %283 = arith.mulf %282, %155 : vector<1x352xf32>
    %284 = arith.addf %281, %283 : vector<1x352xf32>
    %285 = vector.broadcast %9 : f32 to vector<1x352xf32>
    %286 = arith.mulf %285, %167 : vector<1x352xf32>
    %287 = vector.broadcast %58 : f32 to vector<1x352xf32>
    %288 = arith.mulf %287, %170 : vector<1x352xf32>
    %289 = arith.addf %286, %288 : vector<1x352xf32>
    %290 = arith.addf %279, %289 : vector<1x352xf32>
    %291 = vector.broadcast %10 : f32 to vector<1x352xf32>
    %292 = arith.mulf %291, %182 : vector<1x352xf32>
    %293 = vector.broadcast %59 : f32 to vector<1x352xf32>
    %294 = arith.mulf %293, %185 : vector<1x352xf32>
    %295 = arith.addf %292, %294 : vector<1x352xf32>
    %296 = arith.addf %284, %295 : vector<1x352xf32>
    %297 = vector.broadcast %11 : f32 to vector<1x352xf32>
    %298 = arith.mulf %297, %197 : vector<1x352xf32>
    %299 = vector.broadcast %60 : f32 to vector<1x352xf32>
    %300 = arith.mulf %299, %200 : vector<1x352xf32>
    %301 = arith.addf %298, %300 : vector<1x352xf32>
    %302 = arith.addf %290, %301 : vector<1x352xf32>
    %303 = vector.broadcast %12 : f32 to vector<1x352xf32>
    %304 = arith.mulf %303, %212 : vector<1x352xf32>
    %305 = vector.broadcast %61 : f32 to vector<1x352xf32>
    %306 = arith.mulf %305, %215 : vector<1x352xf32>
    %307 = arith.addf %304, %306 : vector<1x352xf32>
    %308 = arith.addf %296, %307 : vector<1x352xf32>
    %309 = vector.broadcast %13 : f32 to vector<1x352xf32>
    %310 = arith.mulf %309, %227 : vector<1x352xf32>
    %311 = vector.broadcast %62 : f32 to vector<1x352xf32>
    %312 = arith.mulf %311, %230 : vector<1x352xf32>
    %313 = arith.addf %310, %312 : vector<1x352xf32>
    %314 = arith.addf %302, %313 : vector<1x352xf32>
    %315 = arith.addf %314, %308 : vector<1x352xf32>
    %316 = vector.extract_strided_slice %315 {offsets = [0, 16], sizes = [1, 256], strides = [1, 1]} : vector<1x352xf32> to vector<1x256xf32>
    %317 = arith.addf %274, %316 : vector<1x256xf32>
    %318 = vector.broadcast %14 : f32 to vector<1x352xf32>
    %319 = arith.mulf %318, %137 : vector<1x352xf32>
    %320 = vector.broadcast %63 : f32 to vector<1x352xf32>
    %321 = arith.mulf %320, %140 : vector<1x352xf32>
    %322 = arith.addf %319, %321 : vector<1x352xf32>
    %323 = vector.broadcast %15 : f32 to vector<1x352xf32>
    %324 = arith.mulf %323, %152 : vector<1x352xf32>
    %325 = vector.broadcast %64 : f32 to vector<1x352xf32>
    %326 = arith.mulf %325, %155 : vector<1x352xf32>
    %327 = arith.addf %324, %326 : vector<1x352xf32>
    %328 = vector.broadcast %16 : f32 to vector<1x352xf32>
    %329 = arith.mulf %328, %167 : vector<1x352xf32>
    %330 = vector.broadcast %65 : f32 to vector<1x352xf32>
    %331 = arith.mulf %330, %170 : vector<1x352xf32>
    %332 = arith.addf %329, %331 : vector<1x352xf32>
    %333 = arith.addf %322, %332 : vector<1x352xf32>
    %334 = vector.broadcast %17 : f32 to vector<1x352xf32>
    %335 = arith.mulf %334, %182 : vector<1x352xf32>
    %336 = vector.broadcast %66 : f32 to vector<1x352xf32>
    %337 = arith.mulf %336, %185 : vector<1x352xf32>
    %338 = arith.addf %335, %337 : vector<1x352xf32>
    %339 = arith.addf %327, %338 : vector<1x352xf32>
    %340 = vector.broadcast %18 : f32 to vector<1x352xf32>
    %341 = arith.mulf %340, %197 : vector<1x352xf32>
    %342 = vector.broadcast %67 : f32 to vector<1x352xf32>
    %343 = arith.mulf %342, %200 : vector<1x352xf32>
    %344 = arith.addf %341, %343 : vector<1x352xf32>
    %345 = arith.addf %333, %344 : vector<1x352xf32>
    %346 = vector.broadcast %19 : f32 to vector<1x352xf32>
    %347 = arith.mulf %346, %212 : vector<1x352xf32>
    %348 = vector.broadcast %68 : f32 to vector<1x352xf32>
    %349 = arith.mulf %348, %215 : vector<1x352xf32>
    %350 = arith.addf %347, %349 : vector<1x352xf32>
    %351 = arith.addf %339, %350 : vector<1x352xf32>
    %352 = vector.broadcast %20 : f32 to vector<1x352xf32>
    %353 = arith.mulf %352, %227 : vector<1x352xf32>
    %354 = vector.broadcast %69 : f32 to vector<1x352xf32>
    %355 = arith.mulf %354, %230 : vector<1x352xf32>
    %356 = arith.addf %353, %355 : vector<1x352xf32>
    %357 = arith.addf %345, %356 : vector<1x352xf32>
    %358 = arith.addf %357, %351 : vector<1x352xf32>
    %359 = vector.extract_strided_slice %358 {offsets = [0, 32], sizes = [1, 256], strides = [1, 1]} : vector<1x352xf32> to vector<1x256xf32>
    %360 = arith.addf %317, %359 : vector<1x256xf32>
    %361 = vector.broadcast %21 : f32 to vector<1x352xf32>
    %362 = arith.mulf %361, %137 : vector<1x352xf32>
    %363 = vector.broadcast %70 : f32 to vector<1x352xf32>
    %364 = arith.mulf %363, %140 : vector<1x352xf32>
    %365 = arith.addf %362, %364 : vector<1x352xf32>
    %366 = vector.broadcast %22 : f32 to vector<1x352xf32>
    %367 = arith.mulf %366, %152 : vector<1x352xf32>
    %368 = vector.broadcast %71 : f32 to vector<1x352xf32>
    %369 = arith.mulf %368, %155 : vector<1x352xf32>
    %370 = arith.addf %367, %369 : vector<1x352xf32>
    %371 = vector.broadcast %23 : f32 to vector<1x352xf32>
    %372 = arith.mulf %371, %167 : vector<1x352xf32>
    %373 = vector.broadcast %72 : f32 to vector<1x352xf32>
    %374 = arith.mulf %373, %170 : vector<1x352xf32>
    %375 = arith.addf %372, %374 : vector<1x352xf32>
    %376 = arith.addf %365, %375 : vector<1x352xf32>
    %377 = vector.broadcast %24 : f32 to vector<1x352xf32>
    %378 = arith.mulf %377, %182 : vector<1x352xf32>
    %379 = vector.broadcast %73 : f32 to vector<1x352xf32>
    %380 = arith.mulf %379, %185 : vector<1x352xf32>
    %381 = arith.addf %378, %380 : vector<1x352xf32>
    %382 = arith.addf %370, %381 : vector<1x352xf32>
    %383 = vector.broadcast %25 : f32 to vector<1x352xf32>
    %384 = arith.mulf %383, %197 : vector<1x352xf32>
    %385 = vector.broadcast %74 : f32 to vector<1x352xf32>
    %386 = arith.mulf %385, %200 : vector<1x352xf32>
    %387 = arith.addf %384, %386 : vector<1x352xf32>
    %388 = arith.addf %376, %387 : vector<1x352xf32>
    %389 = vector.broadcast %26 : f32 to vector<1x352xf32>
    %390 = arith.mulf %389, %212 : vector<1x352xf32>
    %391 = vector.broadcast %75 : f32 to vector<1x352xf32>
    %392 = arith.mulf %391, %215 : vector<1x352xf32>
    %393 = arith.addf %390, %392 : vector<1x352xf32>
    %394 = arith.addf %382, %393 : vector<1x352xf32>
    %395 = vector.broadcast %27 : f32 to vector<1x352xf32>
    %396 = arith.mulf %395, %227 : vector<1x352xf32>
    %397 = vector.broadcast %76 : f32 to vector<1x352xf32>
    %398 = arith.mulf %397, %230 : vector<1x352xf32>
    %399 = arith.addf %396, %398 : vector<1x352xf32>
    %400 = arith.addf %388, %399 : vector<1x352xf32>
    %401 = arith.addf %400, %394 : vector<1x352xf32>
    %402 = vector.extract_strided_slice %401 {offsets = [0, 48], sizes = [1, 256], strides = [1, 1]} : vector<1x352xf32> to vector<1x256xf32>
    %403 = arith.addf %360, %402 : vector<1x256xf32>
    %404 = vector.broadcast %28 : f32 to vector<1x352xf32>
    %405 = arith.mulf %404, %137 : vector<1x352xf32>
    %406 = vector.broadcast %77 : f32 to vector<1x352xf32>
    %407 = arith.mulf %406, %140 : vector<1x352xf32>
    %408 = arith.addf %405, %407 : vector<1x352xf32>
    %409 = vector.broadcast %29 : f32 to vector<1x352xf32>
    %410 = arith.mulf %409, %152 : vector<1x352xf32>
    %411 = vector.broadcast %78 : f32 to vector<1x352xf32>
    %412 = arith.mulf %411, %155 : vector<1x352xf32>
    %413 = arith.addf %410, %412 : vector<1x352xf32>
    %414 = vector.broadcast %30 : f32 to vector<1x352xf32>
    %415 = arith.mulf %414, %167 : vector<1x352xf32>
    %416 = vector.broadcast %79 : f32 to vector<1x352xf32>
    %417 = arith.mulf %416, %170 : vector<1x352xf32>
    %418 = arith.addf %415, %417 : vector<1x352xf32>
    %419 = arith.addf %408, %418 : vector<1x352xf32>
    %420 = vector.broadcast %31 : f32 to vector<1x352xf32>
    %421 = arith.mulf %420, %182 : vector<1x352xf32>
    %422 = vector.broadcast %80 : f32 to vector<1x352xf32>
    %423 = arith.mulf %422, %185 : vector<1x352xf32>
    %424 = arith.addf %421, %423 : vector<1x352xf32>
    %425 = arith.addf %413, %424 : vector<1x352xf32>
    %426 = vector.broadcast %32 : f32 to vector<1x352xf32>
    %427 = arith.mulf %426, %197 : vector<1x352xf32>
    %428 = vector.broadcast %81 : f32 to vector<1x352xf32>
    %429 = arith.mulf %428, %200 : vector<1x352xf32>
    %430 = arith.addf %427, %429 : vector<1x352xf32>
    %431 = arith.addf %419, %430 : vector<1x352xf32>
    %432 = vector.broadcast %33 : f32 to vector<1x352xf32>
    %433 = arith.mulf %432, %212 : vector<1x352xf32>
    %434 = vector.broadcast %82 : f32 to vector<1x352xf32>
    %435 = arith.mulf %434, %215 : vector<1x352xf32>
    %436 = arith.addf %433, %435 : vector<1x352xf32>
    %437 = arith.addf %425, %436 : vector<1x352xf32>
    %438 = vector.broadcast %34 : f32 to vector<1x352xf32>
    %439 = arith.mulf %438, %227 : vector<1x352xf32>
    %440 = vector.broadcast %83 : f32 to vector<1x352xf32>
    %441 = arith.mulf %440, %230 : vector<1x352xf32>
    %442 = arith.addf %439, %441 : vector<1x352xf32>
    %443 = arith.addf %431, %442 : vector<1x352xf32>
    %444 = arith.addf %443, %437 : vector<1x352xf32>
    %445 = vector.extract_strided_slice %444 {offsets = [0, 64], sizes = [1, 256], strides = [1, 1]} : vector<1x352xf32> to vector<1x256xf32>
    %446 = arith.addf %403, %445 : vector<1x256xf32>
    %447 = vector.broadcast %35 : f32 to vector<1x352xf32>
    %448 = arith.mulf %447, %137 : vector<1x352xf32>
    %449 = vector.broadcast %84 : f32 to vector<1x352xf32>
    %450 = arith.mulf %449, %140 : vector<1x352xf32>
    %451 = arith.addf %448, %450 : vector<1x352xf32>
    %452 = vector.broadcast %36 : f32 to vector<1x352xf32>
    %453 = arith.mulf %452, %152 : vector<1x352xf32>
    %454 = vector.broadcast %85 : f32 to vector<1x352xf32>
    %455 = arith.mulf %454, %155 : vector<1x352xf32>
    %456 = arith.addf %453, %455 : vector<1x352xf32>
    %457 = vector.broadcast %37 : f32 to vector<1x352xf32>
    %458 = arith.mulf %457, %167 : vector<1x352xf32>
    %459 = vector.broadcast %86 : f32 to vector<1x352xf32>
    %460 = arith.mulf %459, %170 : vector<1x352xf32>
    %461 = arith.addf %458, %460 : vector<1x352xf32>
    %462 = arith.addf %451, %461 : vector<1x352xf32>
    %463 = vector.broadcast %38 : f32 to vector<1x352xf32>
    %464 = arith.mulf %463, %182 : vector<1x352xf32>
    %465 = vector.broadcast %87 : f32 to vector<1x352xf32>
    %466 = arith.mulf %465, %185 : vector<1x352xf32>
    %467 = arith.addf %464, %466 : vector<1x352xf32>
    %468 = arith.addf %456, %467 : vector<1x352xf32>
    %469 = vector.broadcast %39 : f32 to vector<1x352xf32>
    %470 = arith.mulf %469, %197 : vector<1x352xf32>
    %471 = vector.broadcast %88 : f32 to vector<1x352xf32>
    %472 = arith.mulf %471, %200 : vector<1x352xf32>
    %473 = arith.addf %470, %472 : vector<1x352xf32>
    %474 = arith.addf %462, %473 : vector<1x352xf32>
    %475 = vector.broadcast %40 : f32 to vector<1x352xf32>
    %476 = arith.mulf %475, %212 : vector<1x352xf32>
    %477 = vector.broadcast %89 : f32 to vector<1x352xf32>
    %478 = arith.mulf %477, %215 : vector<1x352xf32>
    %479 = arith.addf %476, %478 : vector<1x352xf32>
    %480 = arith.addf %468, %479 : vector<1x352xf32>
    %481 = vector.broadcast %41 : f32 to vector<1x352xf32>
    %482 = arith.mulf %481, %227 : vector<1x352xf32>
    %483 = vector.broadcast %90 : f32 to vector<1x352xf32>
    %484 = arith.mulf %483, %230 : vector<1x352xf32>
    %485 = arith.addf %482, %484 : vector<1x352xf32>
    %486 = arith.addf %474, %485 : vector<1x352xf32>
    %487 = arith.addf %486, %480 : vector<1x352xf32>
    %488 = vector.extract_strided_slice %487 {offsets = [0, 80], sizes = [1, 256], strides = [1, 1]} : vector<1x352xf32> to vector<1x256xf32>
    %489 = arith.addf %446, %488 : vector<1x256xf32>
    %490 = vector.broadcast %42 : f32 to vector<1x352xf32>
    %491 = arith.mulf %490, %137 : vector<1x352xf32>
    %492 = vector.broadcast %91 : f32 to vector<1x352xf32>
    %493 = arith.mulf %492, %140 : vector<1x352xf32>
    %494 = arith.addf %491, %493 : vector<1x352xf32>
    %495 = vector.broadcast %43 : f32 to vector<1x352xf32>
    %496 = arith.mulf %495, %152 : vector<1x352xf32>
    %497 = vector.broadcast %92 : f32 to vector<1x352xf32>
    %498 = arith.mulf %497, %155 : vector<1x352xf32>
    %499 = arith.addf %496, %498 : vector<1x352xf32>
    %500 = vector.broadcast %44 : f32 to vector<1x352xf32>
    %501 = arith.mulf %500, %167 : vector<1x352xf32>
    %502 = vector.broadcast %93 : f32 to vector<1x352xf32>
    %503 = arith.mulf %502, %170 : vector<1x352xf32>
    %504 = arith.addf %501, %503 : vector<1x352xf32>
    %505 = arith.addf %494, %504 : vector<1x352xf32>
    %506 = vector.broadcast %45 : f32 to vector<1x352xf32>
    %507 = arith.mulf %506, %182 : vector<1x352xf32>
    %508 = vector.broadcast %94 : f32 to vector<1x352xf32>
    %509 = arith.mulf %508, %185 : vector<1x352xf32>
    %510 = arith.addf %507, %509 : vector<1x352xf32>
    %511 = arith.addf %499, %510 : vector<1x352xf32>
    %512 = vector.broadcast %46 : f32 to vector<1x352xf32>
    %513 = arith.mulf %512, %197 : vector<1x352xf32>
    %514 = vector.broadcast %95 : f32 to vector<1x352xf32>
    %515 = arith.mulf %514, %200 : vector<1x352xf32>
    %516 = arith.addf %513, %515 : vector<1x352xf32>
    %517 = arith.addf %505, %516 : vector<1x352xf32>
    %518 = vector.broadcast %47 : f32 to vector<1x352xf32>
    %519 = arith.mulf %518, %212 : vector<1x352xf32>
    %520 = vector.broadcast %96 : f32 to vector<1x352xf32>
    %521 = arith.mulf %520, %215 : vector<1x352xf32>
    %522 = arith.addf %519, %521 : vector<1x352xf32>
    %523 = arith.addf %511, %522 : vector<1x352xf32>
    %524 = vector.broadcast %48 : f32 to vector<1x352xf32>
    %525 = arith.mulf %524, %227 : vector<1x352xf32>
    %526 = vector.broadcast %97 : f32 to vector<1x352xf32>
    %527 = arith.mulf %526, %230 : vector<1x352xf32>
    %528 = arith.addf %525, %527 : vector<1x352xf32>
    %529 = arith.addf %517, %528 : vector<1x352xf32>
    %530 = arith.addf %529, %523 : vector<1x352xf32>
    %531 = vector.extract_strided_slice %530 {offsets = [0, 96], sizes = [1, 256], strides = [1, 1]} : vector<1x352xf32> to vector<1x256xf32>
    %532 = arith.addf %489, %531 : vector<1x256xf32>
    %533 = arith.negf %532 : vector<1x256xf32>
    %534 = math.exp %533 : vector<1x256xf32>
    %cst_47 = arith.constant 1.000000e+00 : f32
    %535 = vector.broadcast %cst_47 : f32 to vector<1x256xf32>
    %536 = arith.addf %535, %534 : vector<1x256xf32>
    %537 = arith.divf %535, %536 : vector<1x256xf32>
    %c0_48 = arith.constant 0 : index
    %c0_49 = arith.constant 0 : index
    %c0_50 = arith.constant 0 : index
    %538 = vector.load %arg2[%c0_48, %c0_49, %c0_50] : memref<1x4x256xf32, #tpu.memory_space<vmem>>, vector<1x4x256xf32>
    %539 = vector.shape_cast %538 : vector<1x4x256xf32> to vector<4x256xf32>
    %540 = vector.broadcast %537 : vector<1x256xf32> to vector<4x256xf32>
    %541 = arith.mulf %540, %539 : vector<4x256xf32>
    %c0_51 = arith.constant 0 : index
    %c0_52 = arith.constant 0 : index
    %c0_53 = arith.constant 0 : index
    %542 = vector.load %arg3[%c0_51, %c0_52, %c0_53] : memref<1x4x256xf32, #tpu.memory_space<vmem>>, vector<1x4x256xf32>
    %543 = vector.shape_cast %542 : vector<1x4x256xf32> to vector<4x256xf32>
    %544 = vector.shape_cast %541 : vector<4x256xf32> to vector<1x4x256xf32>
    tpu.vector_store %arg3[%c0_51, %c0_52, %c0_53], %544 {strides = array<i32>} : memref<1x4x256xf32, #tpu.memory_space<vmem>>, vector<1x4x256xf32>,
    return
  }
  func.func @transform_0(%arg0: i32) -> i32 {
    %c0_i32 = arith.constant 0 : i32
    %c0_i32_0 = arith.constant 0 : i32
    return %c0_i32 : i32
  }
  func.func @transform_1(%arg0: i32) -> (i32, i32, i32) {
    %c0_i32 = arith.constant 0 : i32
    %c0_i32_0 = arith.constant 0 : i32
    %c0_i32_1 = arith.constant 0 : i32
    return %arg0, %c0_i32, %c0_i32_0 : i32, i32, i32
  }
  func.func @transform_2(%arg0: i32) -> (i32, i32, i32) {
    %c0_i32 = arith.constant 0 : i32
    %c0_i32_0 = arith.constant 0 : i32
    %c0_i32_1 = arith.constant 0 : i32
    return %arg0, %c0_i32, %c0_i32_0 : i32, i32, i32
  }
}

</mosaic_0001>

<bundles_post_ra>
// kernel: tpu_custom_call.1
= control target key start
LH: loop header
LB: loop body
LE: loop exit
PB: predicated region body
PF: predicated region fallthrough
CT: control target
= control target key end

     0   :  { %s3762_s0 = inlined_call_operand.hbm [shape: f32[98], index: 0, kind: input, shape index: {}]   ;;  %s3763_s1 = inlined_call_operand.hbm [shape: f32[2,4,256], index: 1, kind: input, shape index: {}]   ;;  %s3764_s2 = inlined_call_operand.hbm [shape: f32[2,4,256], index: 2, kind: output, shape index: {}]  }
   0x1   :  { %3864 = sst [smem:[#allocation195_spill]] %s3762_s0 }
   0x2   :  { %3865 = sst [smem:[#allocation196_spill]] %s3763_s1 }
   0x3   :  { %3866 = sst [smem:[#allocation197_spill]] %s3764_s2 }
   0x4   :  { %7 = vsyncpa [#allocation5], 0 }
   0x5   :  { %8 = vsyncpa [#allocation3], 0 }
   0x6   :  { %10 = vsyncpa [#allocation3 + $0x1], 0 }
   0x7   :  { %11 = vsyncpa [#allocation4], 0 }
   0x8   :  { %13 = vsyncpa [#allocation4 + $0x1], 0  ;;  %s1838_s9 = smov 0   ;;  %s1840_s10 = smov 0  }
   0x9   :  { %s1842_s11 = smov 0   ;;  %s1844_s12 = smov 0  }
   0xa LB: > { %3867 = sst [smem:[#allocation11_spill]] %s1793_s9  ;;  %s1859_s13 = sadd.s32 4294967295, %s1805_s12   ;;  %s1805_s12 = sphi %s1844_s12, %s4302_s12   ;;  %s1801_s11 = sphi %s1842_s11, %s4305_s11   ;;  %s1797_s10 = sphi %s1840_s10, %s4304_s10   ;;  %s1793_s9 = sphi %s1838_s9, %s4303_s9  }
   0xb   : > { %3868 = sst [smem:[#allocation12_spill]] %s1797_s10  ;;  %s1495_s14 = sadd.s32 4294967294, %s1805_s12  }
   0xc   : > { %3869 = sst [smem:[#allocation13_spill]] %s1801_s11  ;;  %p60_p0 = scmp.ne.s32.totalorder %s1797_s10, %s1793_s9 }
   0xd   : > { %3870 = sst [smem:[#allocation14_spill]] %s1805_s12  ;;  %p3765_p1 = scmp.eq.s32.totalorder %s1859_s13, 0 }
   0xe   : > { %3871 = sst [smem:[#allocation15_spill]] %s1859_s13  ;;  %p90_p3 = scmp.eq.s32.totalorder %s1495_s14, 1 }
   0xf   : > { %p1868_p4 = por %p3765_p1, %p60_p0  ;;  %p1496_p5 = scmp.ge.s32.totalorder %s1805_s12, 1 }
  0x10   : > { %p1873_p6 = por %p90_p3, %p60_p0  ;;  %p97_p7 = scmp.lt.s32.totalorder %s1805_s12, 3 }
  0x11   : > { %s3872_s15 = scalar_select %p1868_p4, 1, 0 }
  0x12   : > { %s3873_s16 = scalar_select %p1873_p6, 1, 0 }
  0x13   : > { %p1878_p8 = pnand %p1496_p5, %p97_p7  ;;  %s1884_s18 = sadd.s32 1, %s1805_s12  }
  0x14   : > { %3874 = sst [smem:[#allocation16_spill]] %s3873_s16  ;;  %s44_s19 = ssub.s32 %s1805_s12, %s1884_s18 }
  0x15   : > { %3876 = sst [smem:[#allocation17_spill]] %s1884_s18  ;;  %p1620_p10 = pneg %p1878_p8 }
  0x16   : > { %s47_s20 = sadd.s32 1, %s1801_s11  ;;  %p1897_p12 = scmp.eq.s32.totalorder %s44_s19, 0 }
  0x17   : > { %p1893_p11 = pnand %p1620_p10, %p3765_p1  ;;  %p54_p13 = scmp.ne.s32.totalorder %s1801_s11, %s1797_s10 }
  0x18   : > { %p55_p0 = scmp.eq.s32.totalorder %s1805_s12, 0  ;;  %p1633_p3 = scmp.lt.s32.totalorder %s1805_s12, 2 }
  0x19   : > { %s3879_s0 = sld [smem:[#allocation195_spill]]  ;;  %p1694_p7 = pneg %p1893_p11 }
  0x1f   : > { %s1692_s25 = scalar_lea.hbm %s3879_s0, 16 }
  0x20   : > { %p1693_p5 = scmp.ne.s32.totalorder %s3879_s0, %s1692_s25  ;;  %p1699_p1 = scmp.lt.u32.totalorder %s1692_s25, %s3879_s0 }
  0x22   : > { %p1695_p10 = pnand %p1694_p7, %p1693_p5 }
  0x24   : > { %p1696_p9 = pneg %p1695_p10 }
  0x26   : > { %p1701_p2 = pnand %p1699_p1, %p1696_p9 }
  0x28   : > { %1704 = shalt.err (!%p1701_p2)
}
  0x29   : > { %s1807_s30 = smov [#allocation2]   ;;  %p56_p1 = por %p55_p0, %p54_p13 }
  0x2a   : > { %1623 = dma.hbm_to_smem (!%p1893_p11), %s3879_s0, 16, %s1807_s30, [#allocation5]  }
  0x2b   : > { %s1924_s5 = scalar_select %p1897_p12, %s1801_s11, %s47_s20  }
  0x2c   : > { %p3881_p2 = scmp.eq.s32.totalorder %s1859_s13, 1  ;;  %s119_s7 = sand.u32 1, %s1801_s11  }
  0x2d   : > { %3880 = sst [smem:[#allocation18_spill]] %s1924_s5  ;;  %s1610_s8 = sshll.u32 %s1805_s12, 7 }
  0x2e   : > { %p1936_p9 = por %p3881_p2, %p54_p13  ;;  %s1499_s14 = sshll.u32 %s119_s7, 3 }
  0x2f   : > { %s3884_s1 = sld [smem:[#allocation196_spill]]  ;;  %s123_s20 = scalar_lea.vmem [#allocation6], %s1499_s14 }
  0x30   : > { %s3882_s6 = scalar_select %p1936_p9, 1, 0 }
  0x31   : > { %s131_s22 = sshll.u32 %s123_s20, 4  ;;  %p1949_p11 = pnand %p1633_p3, %p56_p1  ;;  %s1953_s22 = int_to_ptr.vmem [resolvable:$true] %s131_s22 }
  0x32   : > { %3883 = sst [smem:[#allocation19_spill]] %s3882_s6  ;;  %s120_s25 = scalar_lea.sflag [#allocation3], %s119_s7 }
  0x33   : > { %p1707_p13 = pneg %p1949_p11 }
  0x35   : > { %s1945_s23 = scalar_lea.hbm %s3884_s1, %s1610_s8  ;;  %s1710_s29 = scalar_lea.hbm %s3884_s1, 256 }
  0x36   : > { %s1705_s26 = scalar_lea.hbm %s1945_s23, 128  ;;  %p1711_p3 = scmp.lt.u32.totalorder %s1945_s23, %s3884_s1 }
  0x37   : > { %p1706_p12 = scmp.ne.s32.totalorder %s1945_s23, %s1705_s26  ;;  %p1712_p7 = scmp.lt.u32.totalorder %s1710_s29, %s1705_s26 }
  0x38   : > { %p1714_p1 = scmp.lt.u32.totalorder %s1705_s26, %s1945_s23 }
  0x39   : > { %p1708_p0 = pnand %p1707_p13, %p1706_p12  ;;  %p1713_p10 = por %p1712_p7, %p1711_p3 }
  0x3b   : > { %p1709_p5 = pneg %p1708_p0  ;;  %p1715_p2 = por %p1714_p1, %p1713_p10 }
  0x3d   : > { %p1716_p6 = pnand %p1715_p2, %p1709_p5 }
  0x3f   : > { %1719 = shalt.err (!%p1716_p6)
}
  0x40   : > { %s1720_s4 = scalar_lea.vmem %s1953_s22, 128  ;;  %s1808_s7 = smov [#allocation6]  }
  0x41   : > { %p1721_p12 = scmp.ne.s32.totalorder %s1953_s22, %s1720_s4  ;;  %s1725_s8 = sshll.u32 %s1808_s7, 4  ;;  %s1726_s8 = int_to_ptr.vmem [resolvable:$false] %s1725_s8 }
  0x42   : > { %s1727_s14 = scalar_lea.vmem %s1726_s8, 256  ;;  %p1728_p4 = scmp.lt.s32.totalorder %s1953_s22, %s1726_s8 }
  0x43   : > { %p1723_p0 = pnand %p1721_p12, %p1707_p13  ;;  %p1729_p3 = scmp.lt.s32.totalorder %s1727_s14, %s1720_s4 }
  0x45   : > { %p1724_p9 = pneg %p1723_p0  ;;  %p1730_p7 = por %p1729_p3, %p1728_p4 }
  0x47   : > { %p1731_p10 = pnand %p1730_p7, %p1724_p9 }
  0x49   : > { %1734 = shalt.err (!%p1731_p10)
}
  0x4a   : > { %1627 = dma.hbm_to_vmem [thread:$0]  (!%p1949_p11), %s1945_s23, 128, %s1953_s22, %s120_s25  }
  0x4b   : > { %140 = sbr.rel (%p1878_p8) target bundleno = 658 (0x292), region = 28 }
  0x52   : > { %p3886_p6 = scmp.eq.s32.totalorder %s1859_s13, 0 }
  0x54   : > { %1780 = dma.done.wait (%p3886_p6), [#allocation5], 16   ;;  %p3887_p13 = pmov %p3886_p6 }
  0x55   : > { %s1987_s19 = sand.u32 1, %s1797_s10   ;;  %p3890_p4 = scmp.ne.s32.totalorder %s3872_s15, 0 }
  0x56   : > { %1782 = vsyncadd (%p3887_p13), [#allocation5], 4294967280  ;;  %3888 = sst [smem:[#allocation20_spill]] %s1987_s19  ;;  %s3768_s21 = sshll.u32 %s1987_s19, 3 }
  0x57   : > { %s147_s20 = scalar_lea.sflag [#allocation3], %s1987_s19  ;;  %s1993_s23 = scalar_lea.vmem [#allocation6], %s3768_s21 }
  0x58   : > { %3889 = sst [smem:[#allocation21_spill]] %s1993_s23 }
  0x59   : > { %1784 = dma.done.wait (%p3890_p4), %s147_s20, 128  }
  0x5a   : > { %1786 = vsyncadd (%p3890_p4), %s147_s20, 4294967168 }
  0x5b   : > { %155 = sfence }
  0x5c   : > { %v270_v0 = vld [vmem:[%s1993_s23] sm:$0xff]  ;;  %vm274_vm0 = vcmask 1043456   ;;  %s1809_s15 = smov 51   ;;  %v3783_v32 = vlaneseq  ;;  %vm311_vm1 = vcmask 416768   ;;  %s1810_s17 = smov 126   ;;  %vm451_vm5 = vcmask 1031168  }
  0x5d   : > { %v275_v1 = vsel %vm274_vm0, %v270_v0, -inf  ;;  %v289_v2 = vsel %vm274_vm0, %v270_v0, 0.0  ;;  %v2000_v3 = vcombine.high %v270_v0, %v270_v0  ;;  %s1519_s22 = sld [smem:[#allocation2 + $0xe]]  ;;  %s1568_s24 = sld [smem:[#allocation2 + $0x3f]]  ;;  %vm408_vm6 = vcmask 1039360  }
  0x5e   : > { %v276_v4 = vrot.slane %v275_v1, 4  ;;  %v290_v5 = vrot.slane %v289_v2, 4  ;;  %v2005_v33 = vand.u32 127, %v3783_v32  ;;  %s1512_s25 = sld [smem:[#allocation2 + $0x7]]  ;;  %s1561_s26 = sld [smem:[#allocation2 + $0x38]]  ;;  %vm3832_vm9 = vcmask 1014784  }
  0x5f   : > { %3891 = vst [vmem:[#allocation22_spill] sm:$0xff] %v2000_v3  ;;  %v282_v6 = vsel %vm274_vm0, %v2000_v3, -inf  ;;  %v296_v7 = vsel %vm274_vm0, %v2000_v3, 0.0  ;;  %s1811_s27 = smov 127   ;;  %s1533_s28 = sld [smem:[#allocation2 + $0x1c]]  ;;  %vm489_vm13 = vcmask 1022976  }
  0x60   : > { %v277_v8 = vmax.f32 %v275_v1, %v276_v4  ;;  %v291_v9 = vadd.f32 %v290_v5, %v289_v2  ;;  %v283_v10 = vrot.slane %v282_v6, 4  ;;  %v297_v11 = vrot.slane %v296_v7, 4  ;;  %s1582_s29 = sld [smem:[#allocation2 + $0x4d]]  ;;  %s1575_s3 = sld [smem:[#allocation2 + $0x46]] }
  0x61   : > { %v332_v34 = vadd.s32 128, %v2005_v33  ;;  %v2009_v35 = vand.u32 15, %v2005_v33  ;;  %s1526_s30 = sld [smem:[#allocation2 + $0x15]]  ;;  %s1812_s4 = smov 124  }
  0x62   : > { %v278_v12 = vrot.slane %v277_v8, 2  ;;  %v292_v13 = vrot.slane %v291_v9, 2  ;;  %v284_v14 = vmax.f32 %v282_v6, %v283_v10  ;;  %v298_v15 = vadd.f32 %v297_v11, %v296_v7  ;;  %s2059_s7 = sld [smem:[#allocation2 + $0x23]]  ;;  %s2065_s8 = sld [smem:[#allocation2 + $0x54]] }
  0x63   : > { %v2011_v37 = vand.u32 15, %v332_v34  ;;  %v370_v40 = vadd.s32 4294967293, %v2009_v35  ;;  %v2046_v48 = vstv %s1519_s22  ;;  %v2057_v52 = vstv %s1568_s24  ;;  %s2067_s14 = sld [smem:[#allocation2 + $0x2a]]  ;;  %s2071_s20 = sld [smem:[#allocation2 + $0x5b]] }
  0x64   : > { %v279_v16 = vmax.f32 %v277_v8, %v278_v12  ;;  %v293_v17 = vadd.f32 %v292_v13, %v291_v9  ;;  %v285_v18 = vrot.slane %v284_v14, 2  ;;  %v299_v19 = vrot.slane %v298_v15, 2  ;;  %s1814_s22 = smov 123   ;;  %s2117_s24 = sld [smem:[#allocation2 + $0x31]] }
  0x65   : > { %v371_v41 = vadd.s32 4294967293, %v2011_v37  ;;  %vm373_vm2 = vcmp.ge.s32.totalorder %v370_v40, 0  ;;  %v2061_v53 = vstv %s1512_s25  ;;  %v2063_v54 = vstv %s1561_s26  ;;  %s2119_s25 = sld [smem:[#allocation2]]  ;;  %s1815_s26 = smov 122  }
  0x66   : > { %v280_v20 = vrot.slane %v279_v16, 1  ;;  %v294_v21 = vrot.slane %v293_v17, 1  ;;  %v286_v22 = vmax.f32 %v284_v14, %v285_v18  ;;  %v300_v23 = vadd.f32 %v299_v19, %v298_v15  ;;  %s2274_s21 = sld [smem:[#allocation2 + $0x27]]  ;;  %s2276_s0 = sld [smem:[#allocation2 + $0x2e]] }
  0x67   : > { %vm374_vm3 = vcmp.ge.s32.totalorder %v371_v41, 0  ;;  %v2083_v59 = vstv %s1533_s28  ;;  %v2085_v60 = vstv %s1582_s29  ;;  %v2091_v63 = vstv %s1526_s30  ;;  %s2243_s28 = sld [smem:[#allocation2 + $0x17]]  ;;  %s2245_s29 = sld [smem:[#allocation2 + $0x1e]] }
  0x68   : > { %v281_v24 = vmax.f32 %v279_v16, %v280_v20  ;;  %v295_v25 = vadd.f32 %v294_v21, %v293_v17  ;;  %v287_v26 = vrot.slane %v286_v22, 1  ;;  %v301_v27 = vrot.slane %v300_v23, 1  ;;  %s2247_s30 = sld [smem:[#allocation2 + $0x25]]  ;;  %s2278_s1 = sld [smem:[#allocation2 + $0x11]] }
  0x69   : > { %v2093_v0 = vstv %s1575_s3  ;;  %v2122_v11 = vstv %s2059_s7  ;;  %v2127_v13 = vstv %s2065_s8  ;;  %v2134_v16 = vstv %s2067_s14  ;;  %s2249_s3 = sld [smem:[#allocation2 + $0x2c]]  ;;  %s2254_s7 = sld [smem:[#allocation2 + $0xf]] }
  0x6a   : > { %307 = vrot.lane.b32.xlu0 %v281_v24, %s1809_s15  ;;  %v303_v28 = vmul.f32 0.25, %v295_v25  ;;  %v288_v29 = vmax.f32 %v286_v22, %v287_v26  ;;  %v302_v30 = vadd.f32 %v301_v27, %v300_v23  ;;  %v2143_v20 = vstv %s2071_s20  ;;  %s2256_s8 = sld [smem:[#allocation2 + $0x16]]  ;;  %s2258_s14 = sld [smem:[#allocation2 + $0x1d]] }
  0x6b   : > { %s2260_s20 = sld [smem:[#allocation2 + $0x24]]  ;;  %s2280_s5 = sld [smem:[#allocation2 + $0xa]] }
  0x6c   : > { %320 = vrot.lane.b32.xlu1 %v303_v28, %s1809_s15  ;;  %v304_v31 = vmul.f32 0.25, %v302_v30  ;;  %s2282_s11 = sld [smem:[#allocation2 + $0x1f]]  ;;  %s2284_s10 = sld [smem:[#allocation2 + $0x18]] }
  0x6d   : > { %s2286_s18 = sld [smem:[#allocation2 + $0x26]]  ;;  %s2289_s12 = sld [smem:[#allocation2 + $0x13]] }
  0x6e   : > { %309 = vrot.lane.b32.xlu0 %v288_v29, %s1809_s15  ;;  %s2291_s16 = sld [smem:[#allocation2 + $0xc]]  ;;  %s2293_s9 = sld [smem:[#allocation2 + $0x21]] }
  0x6f   : > { %s2295_s2 = sld [smem:[#allocation2 + $0x1a]]  ;;  %s2297_s6 = sld [smem:[#allocation2 + $0x14]] }
  0x70   : > { %322 = vrot.lane.b32.xlu1 %v304_v31, %s1809_s15  ;;  %s1813_s15 = smov 125   ;;  %s2299_s19 = sld [smem:[#allocation2 + $0x28]] }
  0x71   : > { %s2301_s13 = sld [smem:[#allocation2 + $0xd]]  ;;  %s2303_s23 = sld [smem:[#allocation2 + $0x22]] }
  0x73   : > { %3906 = sst [smem:[#allocation37_spill]] %s2286_s18  ;;  %s2305_s18 = sld [smem:[#allocation2 + $0x3a]] }
  0x74   : > { %3907 = sst [smem:[#allocation38_spill]] %s2291_s16  ;;  %s2307_s16 = sld [smem:[#allocation2 + $0x1b]] }
  0x76   : > { %3908 = sst [smem:[#allocation39_spill]] %s2299_s19  ;;  %s2318_s19 = sld [smem:[#allocation2 + $0x41]] }
  0x77   : > { %3909 = sst [smem:[#allocation40_spill]] %s2303_s23  ;;  %s2320_s23 = sld [smem:[#allocation2 + $0x48]] }
  0xdc   : > { %v308_v36 = vpop.permute.xlu0 %307 }
  0xdd   : > { %v2014_v38 = vsel %vm311_vm1, 0.0, %v308_v36 }
  0xde   : > { %v321_v39 = vpop.permute.xlu1 %320  ;;  %445 = vrot.lane.b32.xlu0 %v2014_v38, %s1810_s17  ;;  %v2040_v47 = vsel %vm373_vm2, %v2014_v38, 0.0 }
  0xdf   : > { %v2033_v45 = vsel %vm311_vm1, 0.0, %v321_v39  ;;  %v817_v55 = vmul.f32 %v2046_v48, %v2040_v47  ;;  %v706_v61 = vmul.f32 %v2061_v53, %v2040_v47  ;;  %v1039_v9 = vmul.f32 %v2083_v59, %v2040_v47 }
  0xe0   : > { %v2020_v42 = vpop.permute.xlu0 %309  ;;  %v2049_v49 = vsel %vm373_vm2, %v2033_v45, 0.0  ;;  %v928_v17 = vmul.f32 %v2091_v63, %v2040_v47  ;;  %v1261_v27 = vmul.f32 %v2134_v16, %v2040_v47  ;;  %v1150_v30 = vmul.f32 %v2122_v11, %v2040_v47 }
  0xe1   : > { %v2024_v43 = vsel %vm311_vm1, %v308_v36, %v2020_v42  ;;  %v821_v58 = vmul.f32 %v2057_v52, %v2049_v49  ;;  %v710_v62 = vmul.f32 %v2063_v54, %v2049_v49  ;;  %v1043_v10 = vmul.f32 %v2085_v60, %v2049_v49 }
  0xe2   : > { %v2026_v44 = vpop.permute.xlu1 %322  ;;  %402 = vrot.lane.b32.xlu0 %v2014_v38, %s1811_s27  ;;  %447 = vrot.lane.b32.xlu1 %v2024_v43, %s1810_s17  ;;  %v2052_v50 = vsel %vm374_vm3, %v2024_v43, 0.0  ;;  %v932_v18 = vmul.f32 %v2093_v0, %v2049_v49  ;;  %v1265_v28 = vmul.f32 %v2143_v20, %v2049_v49  ;;  %v2167_v29 = vsel %vm311_vm1, %v2020_v42, 0.0 }
  0xe3   : > { %v2037_v46 = vsel %vm311_vm1, %v321_v39, %v2026_v44  ;;  %v707_v56 = vmul.f32 %v2061_v53, %v2052_v50  ;;  %v2097_v2 = vadd.f32 %v821_v58, %v817_v55  ;;  %v2099_v4 = vadd.f32 %v710_v62, %v706_v61 }
  0xe4   : > { %v2055_v51 = vsel %vm374_vm3, %v2037_v46, 0.0  ;;  %v929_v5 = vmul.f32 %v2091_v63, %v2052_v50  ;;  %v818_v7 = vmul.f32 %v2046_v48, %v2052_v50  ;;  %v2131_v15 = vadd.f32 %v1043_v10, %v1039_v9 }
  0xe5   : > { %v711_v57 = vmul.f32 %v2063_v54, %v2055_v51  ;;  %3893 = vst [vmem:[#allocation24_spill] sm:$0xff] %v2097_v2  ;;  %3894 = vst [vmem:[#allocation25_spill] sm:$0xff] %v2099_v4  ;;  %v933_v6 = vmul.f32 %v2093_v0, %v2055_v51  ;;  %v822_v8 = vmul.f32 %v2057_v52, %v2055_v51  ;;  %v638_v36 = vstv %s2117_s24  ;;  %s2266_s24 = sld [smem:[#allocation2 + $0x12]] }
  0xe6   : > { %524 = vrot.lane.b32.xlu0 %v2014_v38, %s1812_s4  ;;  %460 = vrot.lane.b32.xlu1 %v2033_v45, %s1810_s17  ;;  %3897 = vst [vmem:[#allocation28_spill] sm:$0xff] %v2131_v15  ;;  %v1155_v19 = vmul.f32 %v2127_v13, %v2055_v51  ;;  %v1151_v21 = vmul.f32 %v2122_v11, %v2052_v50  ;;  %v2340_v9 = vstv %s2249_s3  ;;  %s2363_s3 = sld [smem:[#allocation2 + $0x40]]  ;;  %vm571_vm2 = vcmask 1006592  }
  0xe7   : > { %v2095_v1 = vadd.f32 %v711_v57, %v707_v56  ;;  %v2124_v12 = vadd.f32 %v933_v6, %v929_v5  ;;  %v2129_v14 = vadd.f32 %v822_v8, %v818_v7  ;;  %v1040_v22 = vmul.f32 %v2083_v59, %v2052_v50 }
  0xe8   : > { %v1044_v23 = vmul.f32 %v2085_v60, %v2055_v51  ;;  %v2155_v24 = vadd.f32 %v932_v18, %v928_v17  ;;  %v2157_v25 = vadd.f32 %v1155_v19, %v1151_v21  ;;  %v1154_v31 = vmul.f32 %v2127_v13, %v2049_v49 }
  0xe9   : > { %3892 = vst [vmem:[#allocation23_spill] sm:$0xff] %v2095_v1  ;;  %3895 = vst [vmem:[#allocation26_spill] sm:$0xff] %v2124_v12  ;;  %v2177_v34 = vadd.f32 %v1265_v28, %v1261_v27  ;;  %v1262_v40 = vmul.f32 %v2134_v16, %v2052_v50  ;;  %v1266_v41 = vmul.f32 %v2143_v20, %v2055_v51  ;;  %v2326_v5 = vstv %s2243_s28  ;;  %s2348_s28 = sld [smem:[#allocation2 + $0x5d]] }
  0xea   : > { %483 = vrot.lane.b32.xlu0 %v2014_v38, %s1813_s15  ;;  %404 = vrot.lane.b32.xlu1 %v2024_v43, %s1811_s27  ;;  %3896 = vst [vmem:[#allocation27_spill] sm:$0xff] %v2129_v14  ;;  %3898 = vst [vmem:[#allocation29_spill] sm:$0xff] %v2155_v24  ;;  %v2159_v26 = vadd.f32 %v1044_v23, %v1040_v22  ;;  %v2181_v39 = vadd.f32 %v1154_v31, %v1150_v30  ;;  %v2329_v6 = vstv %s2245_s29  ;;  %s2350_s29 = sld [smem:[#allocation2 + $0x29]] }
  0xeb   : > { %3899 = vst [vmem:[#allocation30_spill] sm:$0xff] %v2157_v25  ;;  %3901 = vst [vmem:[#allocation32_spill] sm:$0xff] %v2177_v34  ;;  %v640_v42 = vmul.f32 %v638_v36, %v2055_v51  ;;  %v2188_v55 = vadd.f32 %v1266_v41, %v1262_v40  ;;  %v639_v57 = vmul.f32 %v638_v36, %v2049_v49  ;;  %v2323_v51 = vadd.s32 4294967294, %v2009_v35 }
  0xec   : > { %3900 = vst [vmem:[#allocation31_spill] sm:$0xff] %v2159_v26  ;;  %3902 = vst [vmem:[#allocation33_spill] sm:$0xff] %v2181_v39  ;;  %v2332_v7 = vstv %s2247_s30  ;;  %v2346_v17 = vstv %s2254_s7  ;;  %v2353_v18 = vadd.s32 1, %v2009_v35  ;;  %v2356_v19 = vstv %s2256_s8  ;;  %s2361_s30 = sld [smem:[#allocation2 + $0x39]]  ;;  %s2374_s7 = sld [smem:[#allocation2 + $0x4e]] }
  0xed   : > { %3903 = vst [vmem:[#allocation34_spill] sm:$0xff] %v2188_v55  ;;  %3911 = vst [vmem:[#allocation42_spill] sm:$0xff] %v2323_v51  ;;  %v2359_v21 = vstv %s2258_s14  ;;  %v2367_v23 = vstv %s2260_s20  ;;  %s2378_s8 = sld [smem:[#allocation2 + $0x55]]  ;;  %s2380_s14 = sld [smem:[#allocation2 + $0x5c]]  ;;  %vm391_vm8 = vcmp.ge.s32.totalorder %v2323_v51, 0  ;;  %v2556_v24 = vstv %s2320_s23 }
  0xee   : > { %565 = vrot.lane.b32.xlu0 %v2014_v38, %s1814_s22  ;;  %419 = vrot.lane.b32.xlu1 %v2033_v45, %s1811_s27  ;;  %3913 = vst [vmem:[#allocation44_spill] sm:$0xff] %v2353_v18  ;;  %s2389_s20 = sld [smem:[#allocation2 + $0x3c]]  ;;  %3938 = vst [vmem:[#allocation64_spill] sm:$0xff] %v2556_v24  ;;  %v2565_v12 = vstv %s2307_s16  ;;  %v2578_v1 = vstv %s2363_s3  ;;  %s2583_s23 = sld [smem:[#allocation2 + $0x1]]  ;;  %vm3826_vm10 = vcmp.lt.s32.totalorder %v2353_v18, 16 }
  0xef   : > { %v2572_v4 = vstv %s2348_s28  ;;  %3946 = vst [vmem:[#allocation69_spill] sm:$0xff] %v2578_v1  ;;  %s2585_s16 = sld [smem:[#allocation2 + $0x2]]  ;;  %s2599_s28 = sld [smem:[#allocation2 + $0x5e]] }
  0xf0   : > { %3912 = sst [smem:[#allocation43_spill]] %s2350_s29  ;;  %s2405_s29 = sld [smem:[#allocation2 + $0x4a]]  ;;  %3944 = vst [vmem:[#allocation67_spill] sm:$0xff] %v2572_v4 }
  0xf1   : > { %s2601_s3 = sld [smem:[#allocation2 + $0x60]] }
  0xf2   : > { %606 = vrot.lane.b32.xlu0 %v2014_v38, %s1815_s26  ;;  %526 = vrot.lane.b32.xlu1 %v2024_v43, %s1812_s4  ;;  %v635_v38 = vstv %s2119_s25  ;;  %s2268_s25 = sld [smem:[#allocation2 + $0x19]]  ;;  %v2575_v2 = vstv %s2361_s30 }
  0xf3   : > { %v637_v56 = vmul.f32 %v635_v38, %v2052_v50  ;;  %v636_v58 = vmul.f32 %v635_v38, %v2040_v47  ;;  %v329_v47 = vsel %vm311_vm1, %v2026_v44, 0.0  ;;  %3915 = sst [smem:[#allocation46_spill]] %s2380_s14  ;;  %s2407_s14 = sld [smem:[#allocation2 + $0x51]]  ;;  %3945 = vst [vmem:[#allocation68_spill] sm:$0xff] %v2575_v2 }
  0xf4   : > { %3916 = sst [smem:[#allocation47_spill]] %s2389_s20  ;;  %s2419_s20 = sld [smem:[#allocation2 + $0x5f]] }
  0xf5   : > { %v2197_v61 = vadd.f32 %v640_v42, %v637_v56  ;;  %v2199_v62 = vadd.f32 %v639_v57, %v636_v58  ;;  %v2429_v57 = vstv %s2274_s21  ;;  %s2447_s21 = sld [smem:[#allocation2 + $0x50]] }
  0xf6   : > { %449 = vrot.lane.b32.xlu0 %v2167_v29, %s1810_s17  ;;  %539 = vrot.lane.b32.xlu1 %v2033_v45, %s1812_s4 }
  0xf7   : > { %3904 = vst [vmem:[#allocation35_spill] sm:$0xff] %v2197_v61  ;;  %3905 = vst [vmem:[#allocation36_spill] sm:$0xff] %v2199_v62  ;;  %v2506_v61 = vadd.s32 3, %v2009_v35 }
  0xf9   : > { %3932 = vst [vmem:[#allocation60_spill] sm:$0xff] %v2506_v61 }
  0xfa   : > { %406 = vrot.lane.b32.xlu0 %v2167_v29, %s1811_s27  ;;  %485 = vrot.lane.b32.xlu1 %v2024_v43, %s1813_s15 }
  0xfb   : > { %3924 = sst [smem:[#allocation55_spill]] %s2447_s21  ;;  %s2475_s21 = sld [smem:[#allocation2 + $0x52]] }
  0xfe   : > { %528 = vrot.lane.b32.xlu0 %v2167_v29, %s1812_s4  ;;  %498 = vrot.lane.b32.xlu1 %v2033_v45, %s1813_s15 }
 0x102   : > { %487 = vrot.lane.b32.xlu0 %v2167_v29, %s1813_s15  ;;  %567 = vrot.lane.b32.xlu1 %v2024_v43, %s1814_s22 }
 0x106   : > { %569 = vrot.lane.b32.xlu0 %v2167_v29, %s1814_s22  ;;  %580 = vrot.lane.b32.xlu1 %v2033_v45, %s1814_s22 }
 0x10a   : > { %610 = vrot.lane.b32.xlu0 %v2167_v29, %s1815_s26  ;;  %608 = vrot.lane.b32.xlu1 %v2024_v43, %s1815_s26  ;;  %v333_v43 = vadd.s32 256, %v2005_v33 }
 0x10c   : > { %v2270_v44 = vand.u32 15, %v333_v43  ;;  %v2439_v43 = vadd.s32 4294967294, %v2011_v37 }
 0x10e   : > { %462 = vrot.lane.b32.xlu0 %v2037_v46, %s1810_s17  ;;  %621 = vrot.lane.b32.xlu1 %v2033_v45, %s1815_s26  ;;  %v372_v33 = vadd.s32 4294967293, %v2270_v44  ;;  %v2387_v38 = vadd.s32 4294967295, %v2270_v44  ;;  %v2426_v56 = vadd.s32 4294967294, %v2270_v44  ;;  %v2509_v55 = vadd.s32 3, %v2270_v44 }
 0x10f   : > { %vm3829_vm15 = vcmp.ge.s32.totalorder %v2439_v43, 0 }
 0x110   : > { %vm375_vm4 = vcmp.ge.s32.totalorder %v372_v33, 0  ;;  %v2442_v33 = vadd.s32 1, %v2270_v44  ;;  %vm438_vm11 = vcmp.ge.s32.totalorder %v2387_v38, 0  ;;  %vm393_vm14 = vcmp.ge.s32.totalorder %v2426_v56, 0 }
 0x111   : > { %v387_v45 = vsel %vm375_vm4, %v329_v47, 0.0  ;;  %v384_v8 = vsel %vm375_vm4, %v2167_v29, 0.0 }
 0x112   : > { %421 = vrot.lane.b32.xlu0 %v2037_v46, %s1811_s27  ;;  %464 = vrot.lane.b32.xlu1 %v329_v47, %s1810_s17  ;;  %s2239_s17 = sld [smem:[#allocation2 + $0x9]]  ;;  %v823_v22 = vmul.f32 %v2057_v52, %v387_v45  ;;  %v712_v28 = vmul.f32 %v2063_v54, %v387_v45  ;;  %v1045_v29 = vmul.f32 %v2085_v60, %v387_v45  ;;  %vm3830_vm0 = vcmp.lt.s32.totalorder %v2442_v33, 16 }
 0x113   : > { %v819_v52 = vmul.f32 %v2046_v48, %v384_v8  ;;  %v708_v30 = vmul.f32 %v2061_v53, %v384_v8  ;;  %v1041_v31 = vmul.f32 %v2083_v59, %v384_v8  ;;  %v934_v36 = vmul.f32 %v2093_v0, %v387_v45 }
 0x114   : > { %v930_v54 = vmul.f32 %v2091_v63, %v384_v8  ;;  %v1152_v60 = vmul.f32 %v2122_v11, %v384_v8  ;;  %v1156_v48 = vmul.f32 %v2127_v13, %v387_v45  ;;  %v2397_v53 = vadd.s32 4294967295, %v2011_v37 }
 0x115   : > { %v2403_v0 = vstv %s2266_s24  ;;  %v2409_v40 = vadd.f32 %v823_v22, %v819_v52  ;;  %v2412_v63 = vstv %s2268_s25  ;;  %v2421_v13 = vadd.f32 %v712_v28, %v708_v30  ;;  %s2433_s24 = sld [smem:[#allocation2 + $0x3b]]  ;;  %s2449_s25 = sld [smem:[#allocation2 + $0x49]] }
 0x116   : > { %541 = vrot.lane.b32.xlu0 %v2037_v46, %s1812_s4  ;;  %423 = vrot.lane.b32.xlu1 %v329_v47, %s1811_s27  ;;  %s2241_s27 = sld [smem:[#allocation2 + $0x10]]  ;;  %v2423_v41 = vadd.f32 %v1045_v29, %v1041_v31  ;;  %v2435_v58 = vadd.f32 %v934_v36, %v930_v54  ;;  %v2445_v22 = vstv %s2276_s0  ;;  %v2451_v28 = vadd.f32 %v1156_v48, %v1152_v60  ;;  %s2464_s0 = sld [smem:[#allocation2 + $0x57]] }
 0x117   : > { %3918 = vst [vmem:[#allocation49_spill] sm:$0xff] %v2409_v40  ;;  %3919 = vst [vmem:[#allocation50_spill] sm:$0xff] %v2421_v13  ;;  %v2454_v29 = vadd.s32 1, %v2011_v37  ;;  %v1263_v52 = vmul.f32 %v2134_v16, %v384_v8  ;;  %v2468_v30 = vadd.s32 2, %v2009_v35  ;;  %v2471_v31 = vadd.s32 2, %v2270_v44 }
 0x118   : > { %v2313_v49 = vstv %s2239_s17  ;;  %s2334_s17 = sld [smem:[#allocation2 + $0x4f]]  ;;  %3920 = vst [vmem:[#allocation51_spill] sm:$0xff] %v2423_v41  ;;  %3922 = vst [vmem:[#allocation53_spill] sm:$0xff] %v2435_v58  ;;  %v2478_v36 = vstv %s2282_s11  ;;  %v2481_v54 = vstv %s2284_s10  ;;  %v2486_v16 = vadd.s32 2, %v2011_v37  ;;  %s2496_s11 = sld [smem:[#allocation2 + $0x4b]] }
 0x119   : > { %3923 = vst [vmem:[#allocation54_spill] sm:$0xff] %v2445_v22  ;;  %3926 = vst [vmem:[#allocation57_spill] sm:$0xff] %v2451_v28  ;;  %v2491_v8 = vstv %s2289_s12  ;;  %s3931_s10 = sld [smem:[#allocation40_spill]]  ;;  %s3933_s12 = sld [smem:[#allocation37_spill]]  ;;  %v2530_v44 = vstv %s2295_s2  ;;  %v2588_v58 = vstv %s2374_s7  ;;  %v2591_v41 = vstv %s2378_s8 }
 0x11a   : > { %500 = vrot.lane.b32.xlu0 %v2037_v46, %s1813_s15  ;;  %543 = vrot.lane.b32.xlu1 %v329_v47, %s1812_s4  ;;  %s2251_s4 = sld [smem:[#allocation2 + $0x8]]  ;;  %s2549_s2 = sld [smem:[#allocation2 + $0x2d]]  ;;  %3948 = vst [vmem:[#allocation71_spill] sm:$0xff] %v2588_v58  ;;  %3949 = vst [vmem:[#allocation72_spill] sm:$0xff] %v2591_v41  ;;  %v2611_v41 = vstv %s2405_s29  ;;  %vm437_vm12 = vcmp.ge.s32.totalorder %v2397_v53, 0  ;;  %vm3831_vm1 = vcmp.lt.s32.totalorder %v2454_v29, 16 }
 0x11b   : > { %3921 = sst [smem:[#allocation52_spill]] %s2433_s24  ;;  %s3927_s24 = sld [smem:[#allocation38_spill]]  ;;  %3957 = vst [vmem:[#allocation76_spill] sm:$0xff] %v2611_v41  ;;  %vm559_vm3 = vcmp.lt.s32.totalorder %v2468_v30, 16  ;;  %vm561_vm4 = vcmp.lt.s32.totalorder %v2471_v31, 16 }
 0x11c   : > { %v2316_v50 = vstv %s2241_s27  ;;  %s2336_s27 = sld [smem:[#allocation2 + $0x56]]  ;;  %3925 = sst [smem:[#allocation56_spill]] %s2449_s25 }
 0x11d   : > { %3928 = sst [smem:[#allocation38_spill]] %s2464_s0  ;;  %s2473_s25 = sld [smem:[#allocation2 + $0x3d]] }
 0x11e   : > { %582 = vrot.lane.b32.xlu0 %v2037_v46, %s1814_s22  ;;  %502 = vrot.lane.b32.xlu1 %v329_v47, %s1813_s15  ;;  %s2262_s15 = sld [smem:[#allocation2 + $0x2b]]  ;;  %3929 = sst [smem:[#allocation58_spill]] %s2496_s11  ;;  %v2559_v15 = vstv %s2334_s17 }
 0x11f   : > { %s2527_s0 = sld [smem:[#allocation2 + $0x4c]]  ;;  %s2532_s11 = sld [smem:[#allocation2 + $0x59]]  ;;  %v2542_v39 = vstv %s3931_s10  ;;  %v2547_v34 = vstv %s3933_s12  ;;  %3940 = vst [vmem:[#allocation65_spill] sm:$0xff] %v2559_v15 }
 0x120   : > { %v2343_v10 = vstv %s2251_s4  ;;  %s2372_s4 = sld [smem:[#allocation2 + $0x47]]  ;;  %s2569_s10 = sld [smem:[#allocation2 + $0x30]] }
 0x121   : > { %v2494_v32 = vstv %s3927_s24  ;;  %s2513_s24 = sld [smem:[#allocation2 + $0x53]]  ;;  %s3953_s30 = sld [smem:[#allocation56_spill]]  ;;  %v4106_v53 = vld [vmem:[#allocation72_spill] sm:$0xff] }
 0x122   : > { %623 = vrot.lane.b32.xlu0 %v2037_v46, %s1815_s26  ;;  %584 = vrot.lane.b32.xlu1 %v329_v47, %s1814_s22  ;;  %s2264_s22 = sld [smem:[#allocation2 + $0xb]]  ;;  %v2310_v46 = vadd.s32 4294967295, %v2009_v35  ;;  %v2525_v35 = vstv %s2301_s13  ;;  %s3937_s13 = sld [smem:[#allocation46_spill]]  ;;  %v2562_v14 = vstv %s2336_s27 }
 0x123   : > { %3941 = vst [vmem:[#allocation66_spill] sm:$0xff] %v2562_v14  ;;  %s3950_s17 = sld [smem:[#allocation52_spill]]  ;;  %s3952_s27 = sld [smem:[#allocation55_spill]] }
 0x124   : > { %3910 = vst [vmem:[#allocation41_spill] sm:$0xff] %v2310_v46  ;;  %v2370_v27 = vstv %s2262_s15  ;;  %s2391_s15 = sld [smem:[#allocation2 + $0x43]]  ;;  %vm436_vm7 = vcmp.ge.s32.totalorder %v2310_v46, 0  ;;  %s2616_s7 = sld [smem:[#allocation2 + $0x61]] }
 0x125   : > { %3914 = vst [vmem:[#allocation45_spill] sm:$0xff] %v2370_v27  ;;  %s3961_s8 = sld [smem:[#allocation58_spill]]  ;;  %s3967_s29 = sld [smem:[#allocation38_spill]] }
 0x126   : > { %625 = vrot.lane.b32.xlu1 %v329_v47, %s1815_s26  ;;  %s2272_s26 = sld [smem:[#allocation2 + $0x20]]  ;;  %v1267_v47 = vmul.f32 %v2143_v20, %v387_v45  ;;  %v2459_v20 = vstv %s2278_s1  ;;  %v2462_v45 = vstv %s2280_s5  ;;  %s2488_s1 = sld [smem:[#allocation2 + $0x45]]  ;;  %v2581_v28 = vstv %s2372_s4 }
 0x127   : > { %s2511_s5 = sld [smem:[#allocation2 + $0x3e]]  ;;  %3947 = vst [vmem:[#allocation70_spill] sm:$0xff] %v2581_v28  ;;  %s3954_s4 = sld [smem:[#allocation43_spill]]  ;;  %v2640_v24 = vstv %s3953_s30 }
 0x128   : > { %v2400_v59 = vstv %s2264_s22  ;;  %s2431_s22 = sld [smem:[#allocation2 + $0x42]]  ;;  %v2498_v3 = vadd.f32 %v1267_v47, %v1263_v52  ;;  %v2516_v47 = vstv %s2293_s9  ;;  %v2519_v52 = vadd.s32 3, %v2011_v37  ;;  %3965 = vst [vmem:[#allocation83_spill] sm:$0xff] %v2640_v24 }
 0x129   : > { %v2539_v37 = vstv %s2318_s19  ;;  %s2544_s9 = sld [smem:[#allocation2 + $0x5a]]  ;;  %s3942_s19 = sld [smem:[#allocation47_spill]]  ;;  %v2594_v13 = vstv %s3937_s13  ;;  %v2632_v41 = vstv %s3950_s17  ;;  %v2637_v4 = vstv %s3952_s27 }
 0x12a   : > { %3917 = sst [smem:[#allocation48_spill]] %s2391_s15  ;;  %s2417_s15 = sld [smem:[#allocation2 + $0x58]]  ;;  %3930 = vst [vmem:[#allocation59_spill] sm:$0xff] %v2498_v3  ;;  %v2536_v3 = vstv %s2305_s18  ;;  %3935 = vst [vmem:[#allocation62_spill] sm:$0xff] %v2539_v37  ;;  %v2698_v37 = vstv %s2569_s10  ;;  %v2724_v51 = vstv %s2616_s7 }
 0x12b   : > { %3934 = vst [vmem:[#allocation61_spill] sm:$0xff] %v2536_v3  ;;  %s3939_s18 = sld [smem:[#allocation39_spill]]  ;;  %s3943_s12 = sld [smem:[#allocation48_spill]]  ;;  %3951 = vst [vmem:[#allocation73_spill] sm:$0xff] %v2594_v13  ;;  %v2614_v13 = vstv %s2407_s14 }
 0x12c   : > { %v2415_v11 = vstv %s2272_s26  ;;  %s2456_s26 = sld [smem:[#allocation2 + $0x44]]  ;;  %3958 = vst [vmem:[#allocation77_spill] sm:$0xff] %v2614_v13  ;;  %3963 = vst [vmem:[#allocation81_spill] sm:$0xff] %v2632_v41  ;;  %v2652_v41 = vstv %s2488_s1  ;;  %s1820_s1 = smov 48  }
 0x12d   : > { %3964 = vst [vmem:[#allocation82_spill] sm:$0xff] %v2637_v4  ;;  %v2643_v15 = vstv %s3954_s4  ;;  %s2645_s14 = sld [smem:[#allocation2 + $0x4]]  ;;  %3969 = vst [vmem:[#allocation86_spill] sm:$0xff] %v2652_v41  ;;  %v2658_v4 = vstv %s2475_s21  ;;  %v2662_v24 = vstv %s2511_s5  ;;  %s1816_s21 = smov 96  }
 0x12e   : > { %3966 = vst [vmem:[#allocation84_spill] sm:$0xff] %v2643_v15  ;;  %3971 = vst [vmem:[#allocation88_spill] sm:$0xff] %v2658_v4  ;;  %s1821_s5 = smov 32   ;;  %s3640_s13 = sld [smem:[#allocation2 + $0x5]] }
 0x12f   : > { %v2605_v28 = vstv %s3942_s19  ;;  %3972 = vst [vmem:[#allocation89_spill] sm:$0xff] %v2662_v24  ;;  %v2683_v24 = vstv %s3967_s29  ;;  %3982 = vst [vmem:[#allocation99_spill] sm:$0xff] %v2698_v37  ;;  %s4289_s19 = sld [smem:[#allocation15_spill]]  ;;  %s4290_s10 = sld [smem:[#allocation20_spill]] }
 0x130   : > { %3955 = vst [vmem:[#allocation74_spill] sm:$0xff] %v2605_v28  ;;  %v2623_v14 = vstv %s2417_s15  ;;  %v2626_v28 = vstv %s2419_s20  ;;  %s2673_s20 = sld [smem:[#allocation2 + $0x3]]  ;;  %3977 = vst [vmem:[#allocation94_spill] sm:$0xff] %v2683_v24  ;;  %v2705_v24 = vstv %s2599_s28  ;;  %s1822_s29 = smov [#allocation7]  }
 0x131   : > { %v2597_v40 = vstv %s3939_s18  ;;  %v2608_v58 = vstv %s3943_s12  ;;  %3959 = vst [vmem:[#allocation78_spill] sm:$0xff] %v2623_v14  ;;  %3960 = vst [vmem:[#allocation79_spill] sm:$0xff] %v2626_v28  ;;  %v2665_v28 = vstv %s2513_s24  ;;  %v2668_v14 = vstv %s3961_s8  ;;  %s2710_s15 = sld [smem:[#allocation2 + $0x33]]  ;;  %s3624_s24 = sld [smem:[#allocation2 + $0x35]] }
 0x132   : > { %3956 = vst [vmem:[#allocation75_spill] sm:$0xff] %v2608_v58  ;;  %v2629_v58 = vstv %s2431_s22  ;;  %3973 = vst [vmem:[#allocation90_spill] sm:$0xff] %v2665_v28  ;;  %v2686_v28 = vstv %s2532_s11  ;;  %s3370_s22 = sld [smem:[#allocation2 + $0x32]]  ;;  %s3610_s11 = sld [smem:[#allocation2 + $0x34]] }
 0x133   : > { %3962 = vst [vmem:[#allocation80_spill] sm:$0xff] %v2629_v58  ;;  %v2649_v58 = vstv %s2456_s26  ;;  %3974 = vst [vmem:[#allocation91_spill] sm:$0xff] %v2668_v14  ;;  %v2689_v14 = vstv %s2544_s9  ;;  %s1818_s26 = smov 64   ;;  %s3628_s9 = sld [smem:[#allocation2 + $0x36]] }
 0x134   : > { %3968 = vst [vmem:[#allocation85_spill] sm:$0xff] %v2649_v58  ;;  %v2671_v58 = vstv %s2527_s0  ;;  %3978 = vst [vmem:[#allocation95_spill] sm:$0xff] %v2686_v28  ;;  %v2708_v28 = vstv %s2601_s3  ;;  %s1819_s0 = smov 80   ;;  %s3648_s18 = sld [smem:[#allocation2 + $0x6]] }
 0x135   : > { %3975 = vst [vmem:[#allocation92_spill] sm:$0xff] %v2671_v58  ;;  %3979 = vst [vmem:[#allocation96_spill] sm:$0xff] %v2689_v14  ;;  %v2692_v58 = vstv %s2549_s2  ;;  %s3630_s2 = sld [smem:[#allocation2 + $0x37]]  ;;  %s4292_s12 = sld [smem:[#allocation19_spill]] }
 0x136   : > { %3980 = vst [vmem:[#allocation97_spill] sm:$0xff] %v2692_v58  ;;  %3983 = vst [vmem:[#allocation100_spill] sm:$0xff] %v2705_v24  ;;  %s4295_s3 = sld [smem:[#allocation197_spill]]  ;;  %s1399_s7 = scalar_lea.sflag [#allocation4], %s4290_s10 }
 0x137   : > { %3984 = vst [vmem:[#allocation101_spill] sm:$0xff] %v2708_v28  ;;  %3988 = vst [vmem:[#allocation105_spill] sm:$0xff] %v2724_v51 }
 0x13b   : > { %p4296_p9 = scmp.ne.s32.totalorder %s4292_s12, 0 }
 0x150   : > { %v446_v42 = vpop.permute.xlu0 %445 }
 0x154   : > { %v2483_v60 = vpop.permute.xlu1 %447  ;;  %v403_v48 = vpop.permute.xlu0 %402 }
 0x155   : > { %v2503_v62 = vsel %vm451_vm5, %v446_v42, %v2483_v60  ;;  %v2522_v42 = vstv %s2297_s6  ;;  %s2567_s6 = sld [smem:[#allocation2 + $0x2f]] }
 0x156   : > { %v457_v41 = vsel %vm436_vm7, %v2503_v62, 0.0 }
 0x157   : > { %v2718_v46 = vmul.f32 %v2313_v49, %v457_v41  ;;  %v2731_v37 = vmul.f32 %v2326_v5, %v457_v41  ;;  %v2734_v14 = vmul.f32 %v2340_v9, %v457_v41 }
 0x158   : > { %v2551_v26 = vpop.permute.xlu1 %460  ;;  %v2553_v25 = vpop.permute.xlu0 %524 }
 0x159   : > { %3936 = vst [vmem:[#allocation63_spill] sm:$0xff] %v2551_v26  ;;  %3986 = vst [vmem:[#allocation103_spill] sm:$0xff] %v2718_v46  ;;  %v3992_v46 = vstv %s2585_s16 }
 0x15a   : > { %3989 = vst [vmem:[#allocation106_spill] sm:$0xff] %v2731_v37  ;;  %3990 = vst [vmem:[#allocation107_spill] sm:$0xff] %v2734_v14 }
 0x15b   : > { %v2695_v3 = vstv %s2567_s6  ;;  %s4288_s6 = sld [smem:[#allocation21_spill]] }
 0x15c   : > { %v2618_v1 = vpop.permute.xlu1 %404  ;;  %v2620_v2 = vpop.permute.xlu0 %483  ;;  %3981 = vst [vmem:[#allocation98_spill] sm:$0xff] %v2695_v3  ;;  %v2741_v3 = vmul.f32 %v3992_v46, %v457_v41 }
 0x15d   : > { %v409_v13 = vsel %vm408_vm6, %v403_v48, %v2618_v1  ;;  %v2655_v48 = vstv %s2473_s25  ;;  %s1817_s25 = smov 112  }
 0x15e   : > { %3970 = vst [vmem:[#allocation87_spill] sm:$0xff] %v2655_v48  ;;  %v414_v62 = vsel %vm391_vm8, %v409_v13, 0.0  ;;  %v2721_v13 = vmul.f32 %v2329_v6, %v457_v41  ;;  %3993 = vst [vmem:[#allocation109_spill] sm:$0xff] %v2741_v3  ;;  %v4001_v3 = vstv %s2583_s23 }
 0x15f   : > { %v2750_v37 = vmul.f32 %v2343_v10, %v414_v62  ;;  %v2760_v46 = vmul.f32 %v2356_v19, %v414_v62  ;;  %v2770_v26 = vmul.f32 %v2367_v23, %v414_v62 }
 0x160   : > { %v2678_v4 = vpop.permute.xlu1 %419  ;;  %v2680_v48 = vpop.permute.xlu0 %565  ;;  %3987 = vst [vmem:[#allocation104_spill] sm:$0xff] %v2721_v13  ;;  %v2747_v13 = vmul.f32 %v2346_v17, %v414_v62 }
 0x161   : > { %3976 = vst [vmem:[#allocation93_spill] sm:$0xff] %v2678_v4  ;;  %v2715_v4 = vmul.f32 %v2316_v50, %v457_v41  ;;  %3995 = vst [vmem:[#allocation111_spill] sm:$0xff] %v2750_v37  ;;  %v2775_v37 = vmul.f32 %v4001_v3, %v414_v62 }
 0x162   : > { %3994 = vst [vmem:[#allocation110_spill] sm:$0xff] %v2747_v13  ;;  %3997 = vst [vmem:[#allocation113_spill] sm:$0xff] %v2760_v46 }
 0x163   : > { %3985 = vst [vmem:[#allocation102_spill] sm:$0xff] %v2715_v4  ;;  %v2737_v4 = vmul.f32 %v2332_v7, %v457_v41  ;;  %4000 = vst [vmem:[#allocation116_spill] sm:$0xff] %v2770_v26 }
 0x164   : > { %v2726_v24 = vpop.permute.xlu1 %526  ;;  %v2728_v28 = vpop.permute.xlu0 %606  ;;  %4002 = vst [vmem:[#allocation117_spill] sm:$0xff] %v2775_v37 }
 0x165   : > { %3991 = vst [vmem:[#allocation108_spill] sm:$0xff] %v2737_v4  ;;  %v531_v51 = vsel %vm3832_vm9, %v2553_v25, %v2726_v24  ;;  %v2757_v4 = vmul.f32 %v2359_v21, %v414_v62  ;;  %v2763_v25 = vmul.f32 %v2370_v27, %v414_v62 }
 0x166   : > { %v536_v14 = vsel %vm3826_vm10, %v531_v51, 0.0  ;;  %vm560_vm10 = vcmp.lt.s32.totalorder %v2486_v16, 16 }
 0x167   : > { %3996 = vst [vmem:[#allocation112_spill] sm:$0xff] %v2757_v4  ;;  %3998 = vst [vmem:[#allocation114_spill] sm:$0xff] %v2763_v25  ;;  %v2767_v41 = vmul.f32 %v2403_v0, %v536_v14  ;;  %v2780_v13 = vmul.f32 %v2400_v59, %v536_v14  ;;  %v2783_v25 = vmul.f32 %v2415_v11, %v536_v14 }
 0x168   : > { %v2777_v4 = vpop.permute.xlu1 %539  ;;  %v450_v46 = vpop.permute.xlu0 %449  ;;  %v2786_v18 = vmul.f32 %v2412_v63, %v536_v14  ;;  %v2796_v62 = vmul.f32 %v2429_v57, %v536_v14 }
 0x169   : > { %3999 = vst [vmem:[#allocation115_spill] sm:$0xff] %v2767_v41  ;;  %4003 = vst [vmem:[#allocation118_spill] sm:$0xff] %v2777_v4  ;;  %v2789_v41 = vmul.f32 %v2445_v22, %v536_v14  ;;  %v453_v51 = vsel %vm451_vm5, %v2483_v60, %v450_v46  ;;  %v459_v3 = vsel %vm438_vm11, %v450_v46, 0.0 }
 0x16a   : > { %4004 = vst [vmem:[#allocation119_spill] sm:$0xff] %v2780_v13  ;;  %4005 = vst [vmem:[#allocation120_spill] sm:$0xff] %v2783_v25  ;;  %v2801_v26 = vsel %vm437_vm12, %v453_v51, 0.0  ;;  %v2804_v25 = vmul.f32 %v2313_v49, %v459_v3  ;;  %v2814_v46 = vmul.f32 %v2326_v5, %v459_v3  ;;  %v2820_v37 = vmul.f32 %v2332_v7, %v459_v3 }
 0x16b   : > { %4006 = vst [vmem:[#allocation121_spill] sm:$0xff] %v2786_v18  ;;  %4007 = vst [vmem:[#allocation122_spill] sm:$0xff] %v2789_v41  ;;  %v2807_v18 = vmul.f32 %v2316_v50, %v459_v3  ;;  %v4010_v41 = vstv %s2645_s14  ;;  %v2823_v51 = vmul.f32 %v2340_v9, %v459_v3 }
 0x16c   : > { %4008 = vst [vmem:[#allocation123_spill] sm:$0xff] %v2796_v62  ;;  %4009 = vst [vmem:[#allocation124_spill] sm:$0xff] %v2801_v26  ;;  %v2811_v60 = vmul.f32 %v4010_v41, %v536_v14  ;;  %v2817_v62 = vmul.f32 %v2329_v6, %v459_v3  ;;  %v486_v13 = vpop.permute.xlu1 %485  ;;  %v407_v4 = vpop.permute.xlu0 %406  ;;  %v2828_v14 = vmul.f32 %v2313_v49, %v2801_v26 }
 0x16d   : > { %4012 = vst [vmem:[#allocation126_spill] sm:$0xff] %v2823_v51  ;;  %v2832_v41 = vmul.f32 %v2326_v5, %v2801_v26  ;;  %v2840_v3 = vmul.f32 %v2332_v7, %v2801_v26  ;;  %v2844_v51 = vsel %vm489_vm13, %v2620_v2, %v486_v13  ;;  %v410_v49 = vsel %vm408_vm6, %v2618_v1, %v407_v4 }
 0x16e   : > { %4011 = vst [vmem:[#allocation125_spill] sm:$0xff] %v2811_v60  ;;  %4013 = vst [vmem:[#allocation127_spill] sm:$0xff] %v2828_v14  ;;  %v2836_v60 = vmul.f32 %v2316_v50, %v2801_v26  ;;  %v416_v14 = vsel %vm393_vm14, %v407_v4, 0.0  ;;  %v2852_v5 = vmul.f32 %v2329_v6, %v2801_v26  ;;  %v2856_v50 = vsel %vm3829_vm15, %v410_v49, 0.0 }
 0x16f   : > { %4014 = vst [vmem:[#allocation128_spill] sm:$0xff] %v2832_v41  ;;  %4016 = vst [vmem:[#allocation130_spill] sm:$0xff] %v2840_v3  ;;  %v2859_v7 = vmul.f32 %v2343_v10, %v416_v14  ;;  %v2862_v2 = vmul.f32 %v2346_v17, %v416_v14  ;;  %v2867_v1 = vmul.f32 %v2340_v9, %v2801_v26  ;;  %vm612_vm15 = vcmask 998400  }
 0x170   : > { %4015 = vst [vmem:[#allocation129_spill] sm:$0xff] %v2836_v60  ;;  %4017 = vst [vmem:[#allocation131_spill] sm:$0xff] %v2844_v51  ;;  %v2870_v4 = vmul.f32 %v2356_v19, %v416_v14  ;;  %v2873_v6 = vmul.f32 %v2359_v21, %v416_v14  ;;  %v2876_v49 = vmul.f32 %v2367_v23, %v416_v14  ;;  %v2882_v3 = vpop.permute.xlu1 %498  ;;  %v529_v60 = vpop.permute.xlu0 %528 }
 0x171   : > { %4018 = vst [vmem:[#allocation132_spill] sm:$0xff] %v2852_v5  ;;  %4019 = vst [vmem:[#allocation133_spill] sm:$0xff] %v2856_v50  ;;  %v2879_v5 = vmul.f32 %v2370_v27, %v416_v14  ;;  %v2886_v9 = vmul.f32 %v2343_v10, %v2856_v50  ;;  %v2890_v26 = vmul.f32 %v2459_v20, %v2844_v51 }
 0x172   : > { %4020 = vst [vmem:[#allocation134_spill] sm:$0xff] %v2867_v1  ;;  %v2894_v1 = vmul.f32 %v2462_v45, %v2844_v51  ;;  %v2898_v14 = vmul.f32 %v2356_v19, %v2856_v50  ;;  %v532_v27 = vsel %vm3832_vm9, %v2726_v24, %v529_v60  ;;  %v2906_v10 = vmul.f32 %v2346_v17, %v2856_v50 }
 0x173   : > { %4021 = vst [vmem:[#allocation135_spill] sm:$0xff] %v2879_v5  ;;  %4022 = vst [vmem:[#allocation136_spill] sm:$0xff] %v2886_v9  ;;  %v538_v5 = vsel %vm3830_vm0, %v529_v60, 0.0  ;;  %v2910_v41 = vmul.f32 %v2478_v36, %v2844_v51  ;;  %vm602_vm0 = vcmp.lt.s32.totalorder %v2509_v55, 16  ;;  %v2925_v17 = vmul.f32 %v2481_v54, %v2844_v51  ;;  %v4136_v55 = vld [vmem:[#allocation90_spill] sm:$0xff] }
 0x174   : > { %4023 = vst [vmem:[#allocation137_spill] sm:$0xff] %v2890_v26  ;;  %4024 = vst [vmem:[#allocation138_spill] sm:$0xff] %v2894_v1  ;;  %v2914_v1 = vsel %vm3831_vm1, %v532_v27, 0.0  ;;  %v2917_v19 = vmul.f32 %v2400_v59, %v538_v5  ;;  %v2920_v24 = vmul.f32 %v2403_v0, %v538_v5  ;;  %v2928_v60 = vmul.f32 %v2412_v63, %v538_v5  ;;  %v2941_v26 = vpop.permute.xlu0 %487 }
 0x175   : > { %4025 = vst [vmem:[#allocation139_spill] sm:$0xff] %v2898_v14  ;;  %4026 = vst [vmem:[#allocation140_spill] sm:$0xff] %v2906_v10  ;;  %v2934_v27 = vmul.f32 %v2429_v57, %v538_v5  ;;  %v2937_v10 = vmul.f32 %v2445_v22, %v538_v5  ;;  %vm600_vm1 = vcmp.lt.s32.totalorder %v2506_v61, 16  ;;  %vm601_vm9 = vcmp.lt.s32.totalorder %v2519_v52, 16  ;;  %v568_v14 = vpop.permute.xlu1 %567 }
 0x176   : > { %4027 = vst [vmem:[#allocation141_spill] sm:$0xff] %v2910_v41  ;;  %4028 = vst [vmem:[#allocation142_spill] sm:$0xff] %v2914_v1  ;;  %v2931_v41 = vmul.f32 %v2415_v11, %v538_v5  ;;  %v2949_v9 = vmul.f32 %v2412_v63, %v2914_v1  ;;  %v2957_v5 = vmul.f32 %v2367_v23, %v2856_v50 }
 0x177   : > { %4029 = vst [vmem:[#allocation143_spill] sm:$0xff] %v2925_v17  ;;  %4030 = vst [vmem:[#allocation144_spill] sm:$0xff] %v2934_v27  ;;  %v2945_v17 = vmul.f32 %v2400_v59, %v2914_v1  ;;  %v2953_v27 = vmul.f32 %v2403_v0, %v2914_v1  ;;  %v572_v22 = vsel %vm571_vm2, %v2680_v48, %v568_v14 }
 0x178   : > { %4031 = vst [vmem:[#allocation145_spill] sm:$0xff] %v2937_v10  ;;  %4032 = vst [vmem:[#allocation146_spill] sm:$0xff] %v2941_v26  ;;  %v2963_v10 = vsel %vm489_vm13, %v486_v13, %v2941_v26  ;;  %v2967_v59 = vmul.f32 %v2459_v20, %v2941_v26  ;;  %v2971_v63 = vmul.f32 %v2429_v57, %v2914_v1  ;;  %v2975_v0 = vsel %vm559_vm3, %v572_v22, 0.0 }
 0x179   : > { %4033 = vst [vmem:[#allocation147_spill] sm:$0xff] %v2945_v17  ;;  %4034 = vst [vmem:[#allocation148_spill] sm:$0xff] %v2949_v9  ;;  %v2979_v23 = vmul.f32 %v2462_v45, %v2941_v26  ;;  %v2983_v48 = vmul.f32 %v2478_v36, %v2941_v26  ;;  %v2987_v13 = vmul.f32 %v2481_v54, %v2941_v26  ;;  %v570_v9 = vpop.permute.xlu0 %569 }
 0x17a   : > { %4035 = vst [vmem:[#allocation149_spill] sm:$0xff] %v2953_v27  ;;  %4036 = vst [vmem:[#allocation150_spill] sm:$0xff] %v2957_v5  ;;  %v2991_v57 = vmul.f32 %v2547_v34, %v2941_v26  ;;  %v2995_v22 = vmul.f32 %v2462_v45, %v2963_v10  ;;  %v3003_v5 = vmul.f32 %v2494_v32, %v2975_v0  ;;  %v3005_v27 = vpop.permute.xlu1 %580 }
 0x17b   : > { %4037 = vst [vmem:[#allocation151_spill] sm:$0xff] %v2963_v10  ;;  %4038 = vst [vmem:[#allocation152_spill] sm:$0xff] %v2971_v63  ;;  %v2999_v63 = vmul.f32 %v2491_v8, %v2975_v0  ;;  %v3009_v17 = vmul.f32 %v2481_v54, %v2963_v10  ;;  %v3013_v26 = vmul.f32 %v2459_v20, %v2963_v10 }
 0x17c   : > { %4039 = vst [vmem:[#allocation153_spill] sm:$0xff] %v2975_v0  ;;  %4040 = vst [vmem:[#allocation154_spill] sm:$0xff] %v2995_v22  ;;  %v3017_v45 = vmul.f32 %v2516_v47, %v2975_v0  ;;  %v3026_v22 = vsel %vm561_vm4, %v570_v9, 0.0  ;;  %v3030_v54 = vmul.f32 %v2547_v34, %v2963_v10  ;;  %v3034_v20 = vmul.f32 %v2359_v21, %v2856_v50 }
 0x17d   : > { %4041 = vst [vmem:[#allocation155_spill] sm:$0xff] %v2999_v63  ;;  %4042 = vst [vmem:[#allocation156_spill] sm:$0xff] %v3003_v5  ;;  %v3021_v63 = vmul.f32 %v2530_v44, %v2975_v0  ;;  %v573_v5 = vsel %vm571_vm2, %v568_v14, %v570_v9  ;;  %v3046_v9 = vmul.f32 %v2494_v32, %v3026_v22 }
 0x17e   : > { %4043 = vst [vmem:[#allocation157_spill] sm:$0xff] %v3009_v17  ;;  %4044 = vst [vmem:[#allocation158_spill] sm:$0xff] %v3013_v26  ;;  %v3050_v14 = vmul.f32 %v2478_v36, %v2963_v10  ;;  %v3054_v21 = vmul.f32 %v2516_v47, %v3026_v22  ;;  %v3062_v50 = vmul.f32 %v2597_v40, %v3026_v22  ;;  %v611_v26 = vpop.permute.xlu0 %610 }
 0x17f   : > { %4045 = vst [vmem:[#allocation159_spill] sm:$0xff] %v3017_v45  ;;  %4046 = vst [vmem:[#allocation160_spill] sm:$0xff] %v3021_v63  ;;  %v3038_v45 = vsel %vm560_vm10, %v573_v5, 0.0  ;;  %v3042_v63 = vmul.f32 %v2491_v8, %v3026_v22  ;;  %v3058_v5 = vmul.f32 %v2530_v44, %v3026_v22 }
 0x180   : > { %4047 = vst [vmem:[#allocation161_spill] sm:$0xff] %v3026_v22  ;;  %4048 = vst [vmem:[#allocation162_spill] sm:$0xff] %v3030_v54  ;;  %v609_v54 = vpop.permute.xlu1 %608  ;;  %v3070_v36 = vmul.f32 %v2530_v44, %v3038_v45  ;;  %v3074_v10 = vmul.f32 %v2491_v8, %v3038_v45  ;;  %v3082_v22 = vmul.f32 %v2415_v11, %v2914_v1  ;;  %v3089_v44 = vsel %vm602_vm0, %v611_v26, 0.0 }
 0x181   : > { %4049 = vst [vmem:[#allocation163_spill] sm:$0xff] %v3034_v20  ;;  %4050 = vst [vmem:[#allocation164_spill] sm:$0xff] %v3038_v45  ;;  %v3066_v20 = vmul.f32 %v2494_v32, %v3038_v45  ;;  %v613_v32 = vsel %vm612_vm15, %v2728_v28, %v609_v54  ;;  %v614_v17 = vsel %vm612_vm15, %v609_v54, %v611_v26 }
 0x182   : > { %4051 = vst [vmem:[#allocation165_spill] sm:$0xff] %v3050_v14  ;;  %4052 = vst [vmem:[#allocation166_spill] sm:$0xff] %v3062_v50  ;;  %v3078_v14 = vmul.f32 %v2597_v40, %v3038_v45  ;;  %v3093_v8 = vmul.f32 %v2516_v47, %v3038_v45  ;;  %v3101_v11 = vsel %vm601_vm9, %v614_v17, 0.0  ;;  %v3105_v28 = vmul.f32 %v2522_v42, %v3089_v44  ;;  %v463_v1 = vpop.permute.xlu0 %462 }
 0x183   : > { %4053 = vst [vmem:[#allocation167_spill] sm:$0xff] %v3066_v20  ;;  %4054 = vst [vmem:[#allocation168_spill] sm:$0xff] %v3070_v36  ;;  %v3109_v26 = vmul.f32 %v2692_v58, %v2844_v51  ;;  %v3113_v47 = vmul.f32 %v2525_v35, %v3089_v44  ;;  %v3117_v54 = vmul.f32 %v2542_v39, %v3089_v44 }
 0x184   : > { %4055 = vst [vmem:[#allocation169_spill] sm:$0xff] %v3074_v10  ;;  %4056 = vst [vmem:[#allocation170_spill] sm:$0xff] %v3078_v14  ;;  %v3097_v14 = vsel %vm600_vm1, %v613_v32, 0.0  ;;  %v3121_v17 = vmul.f32 %v2565_v12, %v3089_v44  ;;  %v3125_v32 = vmul.f32 %v2643_v15, %v3089_v44  ;;  %v3127_v45 = vpop.permute.xlu1 %621  ;;  %v3131_v58 = vmul.f32 %v2525_v35, %v3101_v11 }
 0x185   : > { %4057 = vst [vmem:[#allocation171_spill] sm:$0xff] %v3082_v22  ;;  %4058 = vst [vmem:[#allocation172_spill] sm:$0xff] %v3089_v44  ;;  %v3143_v22 = vmul.f32 %v2565_v12, %v3101_v11  ;;  %v4068_v44 = vld [vmem:[#allocation63_spill] sm:$0xff]  ;;  %v3149_v36 = vmul.f32 %v2522_v42, %v3101_v11  ;;  %v3212_v50 = vmul.f32 %v2597_v40, %v2975_v0  ;;  %v4096_v40 = vld [vmem:[#allocation102_spill] sm:$0xff] }
 0x186   : > { %4059 = vst [vmem:[#allocation173_spill] sm:$0xff] %v3093_v8  ;;  %4060 = vst [vmem:[#allocation174_spill] sm:$0xff] %v3097_v14  ;;  %v3139_v8 = vmul.f32 %v2525_v35, %v3097_v14  ;;  %v466_v10 = vsel %vm451_vm5, %v4068_v44, %v463_v1  ;;  %v4076_v44 = vld [vmem:[#allocation98_spill] sm:$0xff] }
 0x187   : > { %4061 = vst [vmem:[#allocation175_spill] sm:$0xff] %v3101_v11  ;;  %4062 = vst [vmem:[#allocation176_spill] sm:$0xff] %v3109_v26  ;;  %v3135_v26 = vmul.f32 %v2522_v42, %v3097_v14  ;;  %v3169_v42 = vmul.f32 %v2542_v39, %v3101_v11 }
 0x188   : > { %4063 = vst [vmem:[#allocation177_spill] sm:$0xff] %v3125_v32  ;;  %4064 = vst [vmem:[#allocation178_spill] sm:$0xff] %v3131_v58  ;;  %v3153_v58 = vmul.f32 %v2542_v39, %v3097_v14  ;;  %v465_v39 = vpop.permute.xlu1 %464 }
 0x189   : > { %4065 = vst [vmem:[#allocation179_spill] sm:$0xff] %v3135_v26  ;;  %4066 = vst [vmem:[#allocation180_spill] sm:$0xff] %v3139_v8  ;;  %v3157_v26 = vmul.f32 %v2565_v12, %v3097_v14  ;;  %v3161_v8 = vsel %vm436_vm7, %v466_v10, 0.0  ;;  %v4081_v10 = vld [vmem:[#allocation65_spill] sm:$0xff]  ;;  %vm4101_vm7 = vcmp.ge.s32.totalorder %v2439_v43, 0 }
 0x18a   : > { %4067 = vst [vmem:[#allocation181_spill] sm:$0xff] %v3143_v22  ;;  %4069 = vst [vmem:[#allocation63_spill] sm:$0xff] %v3149_v36  ;;  %v3165_v22 = vmul.f32 %v2643_v15, %v3101_v11  ;;  %v3173_v36 = vmul.f32 %v4076_v44, %v2975_v0  ;;  %v3183_v20 = vmul.f32 %v4081_v10, %v3161_v8  ;;  %v4083_v15 = vld [vmem:[#allocation99_spill] sm:$0xff]  ;;  %v422_v11 = vpop.permute.xlu0 %421  ;;  %v4085_v44 = vld [vmem:[#allocation64_spill] sm:$0xff] }
 0x18b   : > { %4070 = vst [vmem:[#allocation182_spill] sm:$0xff] %v3153_v58  ;;  %4071 = vst [vmem:[#allocation183_spill] sm:$0xff] %v3157_v26  ;;  %v4078_v58 = vld [vmem:[#allocation62_spill] sm:$0xff]  ;;  %v4079_v26 = vld [vmem:[#allocation61_spill] sm:$0xff] }
 0x18c   : > { %4073 = vst [vmem:[#allocation41_spill] sm:$0xff] %v3161_v8  ;;  %4074 = vst [vmem:[#allocation184_spill] sm:$0xff] %v3165_v22  ;;  %v843_v12 = vmul.f32 %v4078_v58, %v3161_v8  ;;  %v3179_v35 = vmul.f32 %v4079_v26, %v3161_v8  ;;  %v3187_v22 = vmul.f32 %v4083_v15, %v3097_v14  ;;  %v473_v14 = vsel %vm438_vm11, %v465_v39, 0.0 }
 0x18d   : > { %4075 = vst [vmem:[#allocation185_spill] sm:$0xff] %v3169_v42  ;;  %4077 = vst [vmem:[#allocation186_spill] sm:$0xff] %v3173_v36  ;;  %v3191_v36 = vmul.f32 %v4085_v44, %v3161_v8  ;;  %v4087_v42 = vld [vmem:[#allocation67_spill] sm:$0xff]  ;;  %v467_v15 = vsel %vm451_vm5, %v463_v1, %v465_v39  ;;  %v956_v1 = vmul.f32 %v4085_v44, %v473_v14  ;;  %vm4100_vm5 = vcmask 1014784  }
 0x18e   : > { %4080 = vst [vmem:[#allocation61_spill] sm:$0xff] %v3179_v35  ;;  %4082 = vst [vmem:[#allocation187_spill] sm:$0xff] %v3183_v20  ;;  %v3195_v32 = vmul.f32 %v4087_v42, %v3161_v8  ;;  %v4089_v35 = vld [vmem:[#allocation66_spill] sm:$0xff]  ;;  %v3203_v20 = vmul.f32 %v2547_v34, %v2844_v51  ;;  %v845_v34 = vmul.f32 %v4078_v58, %v473_v14  ;;  %v424_v51 = vpop.permute.xlu1 %423  ;;  %vm4114_vm11 = vcmp.lt.s32.totalorder %v2442_v33, 16  ;;  %v4120_v33 = vld [vmem:[#allocation77_spill] sm:$0xff] }
 0x18f   : > { %4084 = vst [vmem:[#allocation188_spill] sm:$0xff] %v3187_v22  ;;  %4086 = vst [vmem:[#allocation189_spill] sm:$0xff] %v3191_v36  ;;  %v3199_v61 = vmul.f32 %v4089_v35, %v3161_v8  ;;  %v4092_v22 = vld [vmem:[#allocation93_spill] sm:$0xff]  ;;  %v3216_v8 = vsel %vm437_vm12, %v467_v15, 0.0  ;;  %v1067_v38 = vmul.f32 %v4081_v10, %v473_v14  ;;  %v3223_v39 = vmul.f32 %v4089_v35, %v473_v14 }
 0x190   : > { %4088 = vst [vmem:[#allocation190_spill] sm:$0xff] %v3195_v32  ;;  %4091 = vst [vmem:[#allocation192_spill] sm:$0xff] %v3203_v20  ;;  %v425_v36 = vsel %vm408_vm6, %v4092_v22, %v422_v11  ;;  %v3226_v22 = vmul.f32 %v4087_v42, %v473_v14  ;;  %v3229_v0 = vadd.f32 %v843_v12, %v4096_v40  ;;  %v4099_v42 = vld [vmem:[#allocation118_spill] sm:$0xff]  ;;  %vm4116_vm12 = vcmp.lt.s32.totalorder %v2454_v29, 16 }
 0x191   : > { %4090 = vst [vmem:[#allocation191_spill] sm:$0xff] %v3199_v61  ;;  %4093 = vst [vmem:[#allocation93_spill] sm:$0xff] %v3212_v50  ;;  %v734_v61 = vmul.f32 %v4079_v26, %v473_v14  ;;  %v3233_v15 = vsel %vm391_vm8, %v425_v36, 0.0  ;;  %v542_v50 = vpop.permute.xlu0 %541  ;;  %v848_v20 = vadd.f32 %v845_v34, %v2807_v18  ;;  %v959_v10 = vadd.f32 %v956_v1, %v2814_v46  ;;  %v4102_v18 = vld [vmem:[#allocation68_spill] sm:$0xff]  ;;  %v4104_v34 = vld [vmem:[#allocation70_spill] sm:$0xff] }
 0x192   : > { %4094 = vst [vmem:[#allocation193_spill] sm:$0xff] %v3216_v8  ;;  %4095 = vst [vmem:[#allocation194_spill] sm:$0xff] %v3226_v22  ;;  %v426_v35 = vsel %vm408_vm6, %v422_v11, %v424_v51  ;;  %v432_v14 = vsel %vm393_vm14, %v424_v51, 0.0  ;;  %v545_v12 = vsel %vm4100_vm5, %v4099_v42, %v542_v50  ;;  %v3245_v36 = vmul.f32 %v4079_v26, %v3216_v8  ;;  %v4105_v51 = vld [vmem:[#allocation71_spill] sm:$0xff]  ;;  %v4107_v22 = vld [vmem:[#allocation73_spill] sm:$0xff] }
 0x193   : > { %4097 = vst [vmem:[#allocation102_spill] sm:$0xff] %v3229_v0  ;;  %v737_v32 = vadd.f32 %v734_v61, %v2804_v25  ;;  %v3249_v40 = vsel %vm4101_vm7, %v426_v35, 0.0  ;;  %v723_v61 = vmul.f32 %v4102_v18, %v432_v14  ;;  %v4103_v25 = vld [vmem:[#allocation69_spill] sm:$0xff]  ;;  %v1070_v11 = vadd.f32 %v1067_v38, %v2817_v62  ;;  %v4109_v26 = vld [vmem:[#allocation44_spill] sm:$0xff]  ;;  %v544_v35 = vpop.permute.xlu1 %543  ;;  %vm4113_vm8 = vmmov %vm4100_vm5 }
 0x194   : > { %v834_v46 = vmul.f32 %v4103_v25, %v432_v14  ;;  %v945_v56 = vmul.f32 %v4104_v34, %v432_v14  ;;  %v1056_v1 = vmul.f32 %v4105_v51, %v432_v14  ;;  %v1167_v42 = vmul.f32 %v4106_v53, %v432_v14  ;;  %v4112_v0 = vld [vmem:[#allocation49_spill] sm:$0xff] }
 0x195   : > { %v3258_v58 = vmul.f32 %v4107_v22, %v432_v14  ;;  %vm4110_vm6 = vcmp.lt.s32.totalorder %v4109_v26, 16  ;;  %v501_v44 = vpop.permute.xlu0 %500  ;;  %v851_v25 = vadd.f32 %v848_v20, %v4112_v0  ;;  %v726_v62 = vadd.f32 %v723_v61, %v2859_v7  ;;  %v4115_v26 = vld [vmem:[#allocation50_spill] sm:$0xff]  ;;  %v4118_v0 = vld [vmem:[#allocation75_spill] sm:$0xff] }
 0x196   : > { %v3262_v43 = vsel %vm4110_vm6, %v545_v12, 0.0  ;;  %v837_v8 = vadd.f32 %v834_v46, %v2862_v2  ;;  %v546_v38 = vsel %vm4113_vm8, %v542_v50, %v544_v35  ;;  %v552_v53 = vsel %vm4114_vm11, %v544_v35, 0.0  ;;  %v4117_v2 = vld [vmem:[#allocation74_spill] sm:$0xff]  ;;  %v4119_v50 = vld [vmem:[#allocation76_spill] sm:$0xff] }
 0x197   : > { %4108 = vst [vmem:[#allocation42_spill] sm:$0xff] %v3258_v58  ;;  %4111 = vst [vmem:[#allocation118_spill] sm:$0xff] %v3262_v43  ;;  %v3272_v14 = vsel %vm489_vm13, %v2882_v3, %v501_v44  ;;  %v740_v12 = vadd.f32 %v737_v32, %v4115_v26  ;;  %v3277_v58 = vsel %vm4116_vm12, %v546_v38, 0.0  ;;  %v762_v46 = vmul.f32 %v4117_v2, %v552_v53  ;;  %v4121_v22 = vld [vmem:[#allocation78_spill] sm:$0xff]  ;;  %v4122_v3 = vld [vmem:[#allocation79_spill] sm:$0xff]  ;;  %v3288_v32 = vpop.permute.xlu1 %502 }
 0x198   : > { %v873_v20 = vmul.f32 %v4118_v0, %v552_v53  ;;  %v1059_v7 = vadd.f32 %v1056_v1, %v2873_v6  ;;  %v984_v61 = vmul.f32 %v4119_v50, %v552_v53  ;;  %v1095_v35 = vmul.f32 %v4120_v33, %v552_v53  ;;  %v4124_v43 = vld [vmem:[#allocation51_spill] sm:$0xff]  ;;  %v4125_v33 = vld [vmem:[#allocation80_spill] sm:$0xff] }
 0x199   : > { %v1206_v51 = vmul.f32 %v4121_v22, %v552_v53  ;;  %v3286_v34 = vmul.f32 %v4122_v3, %v552_v53  ;;  %v583_v29 = vpop.permute.xlu0 %582  ;;  %v765_v26 = vadd.f32 %v762_v46, %v2917_v19  ;;  %v1073_v0 = vadd.f32 %v1070_v11, %v4124_v43  ;;  %v4126_v53 = vld [vmem:[#allocation81_spill] sm:$0xff]  ;;  %v4127_v3 = vld [vmem:[#allocation53_spill] sm:$0xff]  ;;  %v4128_v11 = vld [vmem:[#allocation82_spill] sm:$0xff] }
 0x19a   : > { %v876_v38 = vadd.f32 %v873_v20, %v2920_v24  ;;  %v948_v6 = vadd.f32 %v945_v56, %v2870_v4  ;;  %v586_v1 = vsel %vm571_vm2, %v3005_v27, %v583_v29  ;;  %v859_v22 = vmul.f32 %v4125_v33, %v3288_v32  ;;  %v4129_v33 = vld [vmem:[#allocation83_spill] sm:$0xff] }
 0x19b   : > { %4123 = vst [vmem:[#allocation68_spill] sm:$0xff] %v3286_v34  ;;  %v748_v34 = vmul.f32 %v4126_v53, %v3288_v32  ;;  %v962_v50 = vadd.f32 %v959_v10, %v4127_v3  ;;  %v3303_v24 = vsel %vm489_vm13, %v501_v44, %v3288_v32  ;;  %v3307_v19 = vsel %vm559_vm3, %v586_v1, 0.0  ;;  %v585_v10 = vpop.permute.xlu1 %584 }
 0x19c   : > { %v879_v4 = vadd.f32 %v876_v38, %v851_v25  ;;  %v1081_v27 = vmul.f32 %v4128_v11, %v3288_v32  ;;  %v862_v56 = vadd.f32 %v859_v22, %v2967_v59  ;;  %v768_v46 = vadd.f32 %v765_v26, %v740_v12 }
 0x19d   : > { %v751_v43 = vadd.f32 %v748_v34, %v2979_v23  ;;  %v1098_v20 = vadd.f32 %v1095_v35, %v2931_v41  ;;  %v624_v3 = vpop.permute.xlu0 %623  ;;  %v970_v30 = vmul.f32 %v4129_v33, %v3288_v32  ;;  %v987_v1 = vadd.f32 %v984_v61, %v2928_v60  ;;  %v4130_v60 = vld [vmem:[#allocation85_spill] sm:$0xff]  ;;  %v4132_v35 = vld [vmem:[#allocation88_spill] sm:$0xff] }
 0x19e   : > { %v1084_v44 = vadd.f32 %v1081_v27, %v2983_v48  ;;  %v1170_v25 = vadd.f32 %v1167_v42, %v2876_v49  ;;  %v587_v38 = vsel %vm571_vm2, %v583_v29, %v585_v10  ;;  %v3322_v59 = vsel %vm561_vm4, %v585_v10, 0.0  ;;  %v4131_v42 = vld [vmem:[#allocation87_spill] sm:$0xff] }
 0x19f   : > { %v627_v41 = vsel %vm612_vm15, %v3127_v45, %v624_v3  ;;  %v1181_v23 = vadd.f32 %v3223_v39, %v2820_v37  ;;  %v3330_v48 = vsel %vm560_vm10, %v587_v38, 0.0  ;;  %v865_v22 = vadd.f32 %v862_v56, %v837_v8  ;;  %v626_v29 = vpop.permute.xlu1 %625  ;;  %v4133_v8 = vld [vmem:[#allocation91_spill] sm:$0xff] }
 0x1a0   : > { %v887_v49 = vmul.f32 %v4130_v60, %v3322_v59  ;;  %v754_v34 = vadd.f32 %v751_v43, %v726_v62  ;;  %v776_v31 = vmul.f32 %v4131_v42, %v3322_v59  ;;  %v1087_v12 = vadd.f32 %v1084_v44, %v1059_v7  ;;  %v4135_v43 = vld [vmem:[#allocation89_spill] sm:$0xff] }
 0x1a1   : > { %v1101_v61 = vadd.f32 %v1098_v20, %v1073_v0  ;;  %v1109_v45 = vmul.f32 %v4132_v35, %v3322_v59  ;;  %v973_v16 = vadd.f32 %v970_v30, %v2987_v13  ;;  %v990_v39 = vadd.f32 %v987_v1, %v962_v50  ;;  %v4134_v13 = vld [vmem:[#allocation86_spill] sm:$0xff]  ;;  %v4137_v1 = vld [vmem:[#allocation92_spill] sm:$0xff] }
 0x1a2   : > { %v890_v37 = vadd.f32 %v887_v49, %v3042_v63  ;;  %v998_v26 = vmul.f32 %v4133_v8, %v3322_v59  ;;  %v628_v27 = vsel %vm612_vm15, %v624_v3, %v626_v29  ;;  %v3345_v62 = vsel %vm602_vm0, %v626_v29, 0.0  ;;  %v4138_v49 = vld [vmem:[#allocation57_spill] sm:$0xff] }
 0x1a3   : > { %v779_v0 = vadd.f32 %v776_v31, %v3046_v9  ;;  %v1112_v7 = vadd.f32 %v1109_v45, %v3054_v21  ;;  %v3351_v56 = vsel %vm601_vm9, %v628_v27, 0.0  ;;  %v901_v50 = vmul.f32 %v4134_v13, %v3345_v62  ;;  %v4140_v45 = vld [vmem:[#allocation144_spill] sm:$0xff] }
 0x1a4   : > { %v893_v63 = vadd.f32 %v890_v37, %v865_v22  ;;  %v790_v20 = vmul.f32 %v4135_v43, %v3345_v62  ;;  %v1123_v44 = vmul.f32 %v4136_v55, %v3345_v62  ;;  %v976_v30 = vadd.f32 %v973_v16, %v948_v6 }
 0x1a5   : > { %v782_v10 = vadd.f32 %v779_v0, %v754_v34  ;;  %v1115_v3 = vadd.f32 %v1112_v7, %v1087_v12  ;;  %v904_v9 = vadd.f32 %v901_v50, %v3105_v28  ;;  %v1001_v52 = vadd.f32 %v998_v26, %v3058_v5  ;;  %v4139_v34 = vld [vmem:[#allocation94_spill] sm:$0xff]  ;;  %v4142_v50 = vld [vmem:[#allocation96_spill] sm:$0xff] }
 0x1a6   : > { %v793_v21 = vadd.f32 %v790_v20, %v3113_v47  ;;  %v1012_v38 = vmul.f32 %v4137_v1, %v3345_v62  ;;  %v1126_v22 = vadd.f32 %v1123_v44, %v3117_v54  ;;  %v1184_v31 = vadd.f32 %v1181_v23, %v4138_v49  ;;  %v4141_v54 = vld [vmem:[#allocation95_spill] sm:$0xff]  ;;  %v4143_v20 = vld [vmem:[#allocation166_spill] sm:$0xff] }
 0x1a7   : > { %v1192_v12 = vmul.f32 %v4139_v34, %v3288_v32  ;;  %v1209_v29 = vadd.f32 %v1206_v51, %v4140_v45  ;;  %v907_v37 = vadd.f32 %v904_v9, %v879_v4  ;;  %v1004_v16 = vadd.f32 %v1001_v52, %v976_v30  ;;  %v4147_v9 = vld [vmem:[#allocation136_spill] sm:$0xff] }
 0x1a8   : > { %v796_v6 = vadd.f32 %v793_v21, %v768_v46  ;;  %v1015_v28 = vadd.f32 %v1012_v38, %v3121_v17  ;;  %v1129_v5 = vadd.f32 %v1126_v22, %v1101_v61  ;;  %v1220_v27 = vmul.f32 %v4141_v54, %v3322_v59  ;;  %v4148_v22 = vld [vmem:[#allocation23_spill] sm:$0xff]  ;;  %v4157_v61 = vld [vmem:[#allocation80_spill] sm:$0xff] }
 0x1a9   : > { %v1195_v47 = vadd.f32 %v1192_v12, %v2991_v57  ;;  %v1212_v26 = vadd.f32 %v1209_v29, %v1184_v31  ;;  %v910_v23 = vadd.f32 %v907_v37, %v893_v63  ;;  %v1234_v51 = vmul.f32 %v4142_v50, %v3345_v62  ;;  %v4145_v63 = vld [vmem:[#allocation177_spill] sm:$0xff]  ;;  %v4150_v29 = vld [vmem:[#allocation147_spill] sm:$0xff] }
 0x1aa   : > { %v799_v0 = vadd.f32 %v796_v6, %v782_v10  ;;  %v1018_v7 = vadd.f32 %v1015_v28, %v990_v39  ;;  %v1132_v4 = vadd.f32 %v1129_v5, %v1115_v3  ;;  %v1223_v44 = vadd.f32 %v1220_v27, %v4143_v20  ;;  %v4146_v3 = vld [vmem:[#allocation127_spill] sm:$0xff]  ;;  %v4151_v6 = vld [vmem:[#allocation69_spill] sm:$0xff]  ;;  %v4152_v28 = vld [vmem:[#allocation24_spill] sm:$0xff] }
 0x1ab   : > { %v1198_v46 = vadd.f32 %v1195_v47, %v1170_v25  ;;  %v722_v17 = vmul.f32 %v4102_v18, %v3249_v40  ;;  %v3382_v57 = vsel %vm600_vm1, %v627_v41, 0.0  ;;  %918 = vrot.lane.b32.xlu1 %v910_v23, %s1816_s21  ;;  %v1237_v10 = vadd.f32 %v1234_v51, %v4145_v63  ;;  %v4153_v5 = vld [vmem:[#allocation102_spill] sm:$0xff]  ;;  %v4154_v27 = vld [vmem:[#allocation167_spill] sm:$0xff] }
 0x1ac   : > { %807 = vrot.lane.b32.xlu0 %v799_v0, %s1817_s25  ;;  %v1021_v39 = vadd.f32 %v1018_v7, %v1004_v16  ;;  %v736_v25 = vadd.f32 %v3245_v36, %v4146_v3  ;;  %v747_v52 = vmul.f32 %v4126_v53, %v3303_v24  ;;  %v761_v41 = vmul.f32 %v4117_v2, %v3277_v58  ;;  %v4149_v36 = vld [vmem:[#allocation154_spill] sm:$0xff]  ;;  %v4159_v3 = vld [vmem:[#allocation75_spill] sm:$0xff] }
 0x1ad   : > { %v1226_v30 = vadd.f32 %v1223_v44, %v1198_v46  ;;  %v725_v21 = vadd.f32 %v722_v17, %v4147_v9  ;;  %v1240_v38 = vadd.f32 %v1237_v10, %v1212_v26  ;;  %v775_v31 = vmul.f32 %v4131_v42, %v3330_v48  ;;  %v4155_v0 = vld [vmem:[#allocation178_spill] sm:$0xff] }
 0x1ae   : > { %v739_v49 = vadd.f32 %v736_v25, %v4148_v22  ;;  %v789_v12 = vmul.f32 %v4135_v43, %v3351_v56  ;;  %v750_v45 = vadd.f32 %v747_v52, %v4149_v36  ;;  %v764_v37 = vadd.f32 %v761_v41, %v4150_v29  ;;  %v4156_v44 = vld [vmem:[#allocation110_spill] sm:$0xff]  ;;  %v4160_v52 = vld [vmem:[#allocation137_spill] sm:$0xff]  ;;  %v4164_v36 = vld [vmem:[#allocation155_spill] sm:$0xff] }
 0x1af   : > { %v832_v16 = vmul.f32 %v4151_v6, %v3233_v15  ;;  %v849_v47 = vadd.f32 %v4153_v5, %v4152_v28  ;;  %1140 = vrot.lane.b32.xlu1 %v1132_v4, %s1818_s26  ;;  %v1243_v26 = vadd.f32 %v1240_v38, %v1226_v30  ;;  %v778_v23 = vadd.f32 %v775_v31, %v4154_v27  ;;  %v4158_v10 = vld [vmem:[#allocation118_spill] sm:$0xff]  ;;  %v4161_v38 = vld [vmem:[#allocation103_spill] sm:$0xff]  ;;  %v4162_v22 = vld [vmem:[#allocation61_spill] sm:$0xff] }
 0x1b0   : > { %1029 = vrot.lane.b32.xlu0 %v1021_v39, %s1819_s0  ;;  %v792_v7 = vadd.f32 %v789_v12, %v4155_v0  ;;  %v646_v51 = vstv %s3370_s22  ;;  %v753_v46 = vadd.f32 %v750_v45, %v725_v21  ;;  %v767_v20 = vadd.f32 %v764_v37, %v739_v49  ;;  %v4163_v31 = vld [vmem:[#allocation115_spill] sm:$0xff]  ;;  %v4167_v27 = vld [vmem:[#allocation25_spill] sm:$0xff] }
 0x1b1   : > { %v835_v17 = vadd.f32 %v832_v16, %v4156_v44  ;;  %v857_v63 = vmul.f32 %v4157_v61, %v3272_v14  ;;  %v871_v25 = vmul.f32 %v4159_v3, %v4158_v10  ;;  %v885_v4 = vmul.f32 %v4130_v60, %v3307_v19  ;;  %v4165_v29 = vld [vmem:[#allocation179_spill] sm:$0xff] }
 0x1b2   : > { %v899_v39 = vmul.f32 %v4134_v13, %v3382_v57  ;;  %v721_v30 = vmul.f32 %v4102_v18, %v3233_v15  ;;  %v781_v9 = vadd.f32 %v778_v23, %v753_v46  ;;  %v795_v21 = vadd.f32 %v792_v7, %v767_v20  ;;  %v4166_v16 = vld [vmem:[#allocation111_spill] sm:$0xff] }
 0x1b3   : > { %v860_v41 = vadd.f32 %v857_v63, %v4160_v52  ;;  %v735_v49 = vadd.f32 %v4162_v22, %v4161_v38  ;;  %v874_v12 = vadd.f32 %v871_v25, %v4163_v31  ;;  %v888_v45 = vadd.f32 %v885_v4, %v4164_v36  ;;  %v4168_v63 = vld [vmem:[#allocation138_spill] sm:$0xff] }
 0x1b4   : > { %1251 = vrot.lane.b32.xlu0 %v1243_v26, %s1820_s1  ;;  %v902_v37 = vadd.f32 %v899_v39, %v4165_v29  ;;  %v724_v28 = vadd.f32 %v721_v30, %v4166_v16  ;;  %v798_v5 = vadd.f32 %v795_v21, %v781_v9  ;;  %v746_v0 = vmul.f32 %v4126_v53, %v3272_v14  ;;  %v4169_v25 = vld [vmem:[#allocation70_spill] sm:$0xff]  ;;  %v4170_v39 = vld [vmem:[#allocation193_spill] sm:$0xff]  ;;  %v4171_v53 = vld [vmem:[#allocation64_spill] sm:$0xff] }
 0x1b5   : > { %v863_v18 = vadd.f32 %v860_v41, %v835_v17  ;;  %v738_v23 = vadd.f32 %v735_v49, %v4167_v27  ;;  %v877_v7 = vadd.f32 %v874_v12, %v849_v47  ;;  %v760_v46 = vmul.f32 %v4117_v2, %v4158_v10  ;;  %v4172_v9 = vld [vmem:[#allocation119_spill] sm:$0xff]  ;;  %v4173_v21 = vld [vmem:[#allocation156_spill] sm:$0xff] }
 0x1b6   : > { %v774_v26 = vmul.f32 %v4131_v42, %v3307_v19  ;;  %v788_v20 = vmul.f32 %v4135_v43, %v3382_v57  ;;  %805 = vrot.lane.b32.xlu1 %v798_v5, %s1817_s25  ;;  %v749_v17 = vadd.f32 %v746_v0, %v4168_v63  ;;  %v944_v4 = vmul.f32 %v4169_v25, %v3249_v40  ;;  %v4174_v42 = vld [vmem:[#allocation180_spill] sm:$0xff]  ;;  %v4175_v43 = vld [vmem:[#allocation139_spill] sm:$0xff]  ;;  %v4179_v0 = vld [vmem:[#allocation157_spill] sm:$0xff] }
 0x1b7   : > { %v891_v44 = vadd.f32 %v888_v45, %v863_v18  ;;  %v955_v47 = vmul.f32 %v4171_v53, %v4170_v39  ;;  %v905_v30 = vadd.f32 %v902_v37, %v877_v7  ;;  %v763_v2 = vadd.f32 %v760_v46, %v4172_v9  ;;  %v4176_v49 = vld [vmem:[#allocation128_spill] sm:$0xff]  ;;  %v4178_v18 = vld [vmem:[#allocation26_spill] sm:$0xff] }
 0x1b8   : > { %v777_v52 = vadd.f32 %v774_v26, %v4173_v21  ;;  %v791_v41 = vadd.f32 %v788_v20, %v4174_v42  ;;  %v752_v38 = vadd.f32 %v749_v17, %v724_v28  ;;  %v947_v22 = vadd.f32 %v944_v4, %v4175_v43  ;;  %v4177_v29 = vld [vmem:[#allocation76_spill] sm:$0xff]  ;;  %v4182_v4 = vld [vmem:[#allocation181_spill] sm:$0xff] }
 0x1b9   : > { %v958_v31 = vadd.f32 %v955_v47, %v4176_v49  ;;  %v969_v12 = vmul.f32 %v4129_v33, %v3303_v24  ;;  %v908_v36 = vadd.f32 %v905_v30, %v891_v44  ;;  %v766_v45 = vadd.f32 %v763_v2, %v738_v23  ;;  %v4180_v26 = vld [vmem:[#allocation148_spill] sm:$0xff]  ;;  %v4183_v47 = vld [vmem:[#allocation62_spill] sm:$0xff]  ;;  %v4185_v43 = vld [vmem:[#allocation129_spill] sm:$0xff] }
 0x1ba   : > { %v983_v16 = vmul.f32 %v4177_v29, %v3277_v58  ;;  %v997_v37 = vmul.f32 %v4133_v8, %v3330_v48  ;;  %v780_v5 = vadd.f32 %v777_v52, %v752_v38  ;;  %v1011_v7 = vmul.f32 %v4137_v1, %v3351_v56  ;;  %v4181_v23 = vld [vmem:[#allocation168_spill] sm:$0xff] }
 0x1bb   : > { %v961_v27 = vadd.f32 %v958_v31, %v4178_v18  ;;  %v972_v28 = vadd.f32 %v969_v12, %v4179_v0  ;;  %914 = vrot.lane.b32.xlu1 %v908_v36, %s1816_s21  ;;  %v794_v46 = vadd.f32 %v791_v41, %v766_v45  ;;  %v833_v63 = vmul.f32 %v4151_v6, %v3249_v40  ;;  %v4184_v52 = vld [vmem:[#allocation140_spill] sm:$0xff]  ;;  %v4186_v6 = vld [vmem:[#allocation158_spill] sm:$0xff]  ;;  %v4187_v36 = vld [vmem:[#allocation149_spill] sm:$0xff] }
 0x1bc   : > { %v986_v20 = vadd.f32 %v983_v16, %v4180_v26  ;;  %v1000_v44 = vadd.f32 %v997_v37, %v4181_v23  ;;  %v1014_v53 = vadd.f32 %v1011_v7, %v4182_v4  ;;  %v844_v30 = vmul.f32 %v4183_v47, %v4170_v39  ;;  %v4188_v16 = vld [vmem:[#allocation71_spill] sm:$0xff]  ;;  %v4194_v23 = vld [vmem:[#allocation112_spill] sm:$0xff]  ;;  %v4196_v47 = vld [vmem:[#allocation77_spill] sm:$0xff] }
 0x1bd   : > { %v975_v17 = vadd.f32 %v972_v28, %v947_v22  ;;  %v858_v9 = vmul.f32 %v4157_v61, %v3303_v24  ;;  %v797_v2 = vadd.f32 %v794_v46, %v780_v5  ;;  %v836_v42 = vadd.f32 %v833_v63, %v4184_v52  ;;  %v4191_v28 = vld [vmem:[#allocation104_spill] sm:$0xff]  ;;  %v4192_v7 = vld [vmem:[#allocation187_spill] sm:$0xff] }
 0x1be   : > { %v989_v21 = vadd.f32 %v986_v20, %v961_v27  ;;  %v872_v41 = vmul.f32 %v4159_v3, %v3277_v58  ;;  %v847_v49 = vadd.f32 %v844_v30, %v4185_v43  ;;  %v886_v31 = vmul.f32 %v4130_v60, %v3330_v48  ;;  %v4189_v3 = vld [vmem:[#allocation27_spill] sm:$0xff]  ;;  %v4190_v27 = vld [vmem:[#allocation169_spill] sm:$0xff]  ;;  %v4195_v4 = vld [vmem:[#allocation28_spill] sm:$0xff] }
 0x1bf   : > { %v1003_v38 = vadd.f32 %v1000_v44, %v975_v17  ;;  %v861_v22 = vadd.f32 %v858_v9, %v4186_v6  ;;  %803 = vrot.lane.b32.xlu0 %v797_v2, %s1817_s25  ;;  %v900_v45 = vmul.f32 %v4134_v13, %v3351_v56  ;;  %v1054_v37 = vmul.f32 %v4188_v16, %v3233_v15  ;;  %v4193_v26 = vld [vmem:[#allocation63_spill] sm:$0xff]  ;;  %v4197_v9 = vld [vmem:[#allocation141_spill] sm:$0xff] }
 0x1c0   : > { %v1017_v12 = vadd.f32 %v1014_v53, %v989_v21  ;;  %v875_v61 = vadd.f32 %v872_v41, %v4187_v36  ;;  %v850_v5 = vadd.f32 %v847_v49, %v4189_v3  ;;  %v889_v0 = vadd.f32 %v886_v31, %v4190_v27  ;;  %v4199_v49 = vld [vmem:[#allocation106_spill] sm:$0xff]  ;;  %v4200_v6 = vld [vmem:[#allocation189_spill] sm:$0xff]  ;;  %v4201_v36 = vld [vmem:[#allocation159_spill] sm:$0xff] }
 0x1c1   : > { %v864_v18 = vadd.f32 %v861_v22, %v836_v42  ;;  %v1068_v46 = vadd.f32 %v4192_v7, %v4191_v28  ;;  %v903_v20 = vadd.f32 %v900_v45, %v4193_v26  ;;  %v1057_v44 = vadd.f32 %v1054_v37, %v4194_v23  ;;  %v4202_v45 = vld [vmem:[#allocation182_spill] sm:$0xff]  ;;  %v4203_v3 = vld [vmem:[#allocation113_spill] sm:$0xff]  ;;  %v4205_v28 = vld [vmem:[#allocation143_spill] sm:$0xff] }
 0x1c2   : > { %v1020_v60 = vadd.f32 %v1017_v12, %v1003_v38  ;;  %v1079_v63 = vmul.f32 %v4128_v11, %v3272_v14  ;;  %v878_v13 = vadd.f32 %v875_v61, %v850_v5  ;;  %v1093_v30 = vmul.f32 %v4196_v47, %v4158_v10  ;;  %v4198_v38 = vld [vmem:[#allocation120_spill] sm:$0xff] }
 0x1c3   : > { %v892_v17 = vadd.f32 %v889_v0, %v864_v18  ;;  %v1071_v53 = vadd.f32 %v1068_v46, %v4195_v4  ;;  %v1107_v21 = vmul.f32 %v4132_v35, %v3307_v19  ;;  %v1121_v52 = vmul.f32 %v4136_v55, %v3382_v57  ;;  %v4204_v0 = vld [vmem:[#allocation29_spill] sm:$0xff] }
 0x1c4   : > { %1027 = vrot.lane.b32.xlu1 %v1020_v60, %s1819_s0  ;;  %v1082_v2 = vadd.f32 %v1079_v63, %v4197_v9  ;;  %v943_v42 = vmul.f32 %v4169_v25, %v3233_v15  ;;  %v906_v41 = vadd.f32 %v903_v20, %v878_v13  ;;  %v1096_v43 = vadd.f32 %v1093_v30, %v4198_v38  ;;  %v4207_v13 = vld [vmem:[#allocation66_spill] sm:$0xff]  ;;  %v4208_v4 = vld [vmem:[#allocation121_spill] sm:$0xff]  ;;  %v4209_v30 = vld [vmem:[#allocation160_spill] sm:$0xff] }
 0x1c5   : > { %v957_v22 = vadd.f32 %v4200_v6, %v4199_v49  ;;  %v968_v31 = vmul.f32 %v4129_v33, %v3272_v14  ;;  %v1110_v61 = vadd.f32 %v1107_v21, %v4201_v36  ;;  %v1124_v37 = vadd.f32 %v1121_v52, %v4202_v45  ;;  %v4210_v9 = vld [vmem:[#allocation183_spill] sm:$0xff]  ;;  %v4211_v21 = vld [vmem:[#allocation150_spill] sm:$0xff]  ;;  %v4216_v45 = vld [vmem:[#allocation152_spill] sm:$0xff] }
 0x1c6   : > { %v1085_v12 = vadd.f32 %v1082_v2, %v1057_v44  ;;  %v946_v5 = vadd.f32 %v943_v42, %v4203_v3  ;;  %v909_v18 = vadd.f32 %v906_v41, %v892_v17  ;;  %v1099_v27 = vadd.f32 %v1096_v43, %v1071_v53  ;;  %v4206_v44 = vld [vmem:[#allocation72_spill] sm:$0xff]  ;;  %v4212_v42 = vld [vmem:[#allocation130_spill] sm:$0xff] }
 0x1c7   : > { %v960_v25 = vadd.f32 %v957_v22, %v4204_v0  ;;  %v971_v7 = vadd.f32 %v968_v31, %v4205_v28  ;;  %v982_v60 = vmul.f32 %v4177_v29, %v4158_v10  ;;  %v996_v33 = vmul.f32 %v4133_v8, %v3307_v19  ;;  %v4213_v38 = vld [vmem:[#allocation78_spill] sm:$0xff]  ;;  %v4218_v28 = vld [vmem:[#allocation65_spill] sm:$0xff] }
 0x1c8   : > { %v1113_v46 = vadd.f32 %v1110_v61, %v1085_v12  ;;  %v1010_v26 = vmul.f32 %v4137_v1, %v3382_v57  ;;  %916 = vrot.lane.b32.xlu0 %v909_v18, %s1816_s21  ;;  %v1127_v20 = vadd.f32 %v1124_v37, %v1099_v27  ;;  %v1166_v63 = vmul.f32 %v4206_v44, %v3249_v40  ;;  %v4214_v22 = vld [vmem:[#allocation162_spill] sm:$0xff] }
 0x1c9   : > { %v974_v23 = vadd.f32 %v971_v7, %v946_v5  ;;  %v1177_v17 = vmul.f32 %v4207_v13, %v4170_v39  ;;  %v985_v53 = vadd.f32 %v982_v60, %v4208_v4  ;;  %v999_v29 = vadd.f32 %v996_v33, %v4209_v30  ;;  %v4215_v36 = vld [vmem:[#allocation30_spill] sm:$0xff]  ;;  %v4219_v60 = vld [vmem:[#allocation184_spill] sm:$0xff]  ;;  %v4222_v30 = vld [vmem:[#allocation165_spill] sm:$0xff] }
 0x1ca   : > { %v1013_v2 = vadd.f32 %v1010_v26, %v4210_v9  ;;  %v1191_v8 = vmul.f32 %v4139_v34, %v3303_v24  ;;  %v1130_v1 = vadd.f32 %v1127_v20, %v1113_v46  ;;  %v1169_v52 = vadd.f32 %v1166_v63, %v4211_v21  ;;  %v4217_v0 = vld [vmem:[#allocation170_spill] sm:$0xff]  ;;  %v4220_v26 = vld [vmem:[#allocation163_spill] sm:$0xff] }
 0x1cb   : > { %v1180_v41 = vadd.f32 %v1177_v17, %v4212_v42  ;;  %v1205_v43 = vmul.f32 %v4213_v38, %v3277_v58  ;;  %v988_v49 = vadd.f32 %v985_v53, %v960_v25  ;;  %v1002_v6 = vadd.f32 %v999_v29, %v974_v23  ;;  %v4221_v17 = vld [vmem:[#allocation132_spill] sm:$0xff] }
 0x1cc   : > { %v1194_v31 = vadd.f32 %v1191_v8, %v4214_v22  ;;  %v1219_v12 = vmul.f32 %v4141_v54, %v3330_v48  ;;  %1136 = vrot.lane.b32.xlu1 %v1130_v1, %s1818_s26  ;;  %v1233_v3 = vmul.f32 %v4142_v50, %v3351_v56  ;;  %v1055_v5 = vmul.f32 %v4188_v16, %v3249_v40  ;;  %v4223_v8 = vld [vmem:[#allocation31_spill] sm:$0xff]  ;;  %v4228_v22 = vld [vmem:[#allocation173_spill] sm:$0xff] }
 0x1cd   : > { %v1183_v61 = vadd.f32 %v1180_v41, %v4215_v36  ;;  %v1208_v37 = vadd.f32 %v1205_v43, %v4216_v45  ;;  %v1016_v18 = vadd.f32 %v1013_v2, %v988_v49  ;;  %v1066_v7 = vmul.f32 %v4218_v28, %v4170_v39  ;;  %v4224_v1 = vld [vmem:[#allocation171_spill] sm:$0xff]  ;;  %v4231_v45 = vld [vmem:[#allocation32_spill] sm:$0xff] }
 0x1ce   : > { %v1197_v27 = vadd.f32 %v1194_v31, %v1169_v52  ;;  %v1222_v25 = vadd.f32 %v1219_v12, %v4217_v0  ;;  %v1236_v33 = vadd.f32 %v1233_v3, %v4219_v60  ;;  %v1058_v20 = vadd.f32 %v1055_v5, %v4220_v26  ;;  %v4225_v52 = vld [vmem:[#allocation73_spill] sm:$0xff]  ;;  %v4226_v41 = vld [vmem:[#allocation107_spill] sm:$0xff]  ;;  %v4232_v3 = vld [vmem:[#allocation100_spill] sm:$0xff] }
 0x1cf   : > { %v1211_v46 = vadd.f32 %v1208_v37, %v1183_v61  ;;  %v1080_v23 = vmul.f32 %v4128_v11, %v3303_v24  ;;  %v1019_v63 = vadd.f32 %v1016_v18, %v1002_v6  ;;  %v1069_v4 = vadd.f32 %v1066_v7, %v4221_v17  ;;  %v4235_v7 = vld [vmem:[#allocation105_spill] sm:$0xff]  ;;  %v4239_v17 = vld [vmem:[#allocation122_spill] sm:$0xff] }
 0x1d0   : > { %v1225_v13 = vadd.f32 %v1222_v25, %v1197_v27  ;;  %v1094_v16 = vmul.f32 %v4196_v47, %v3277_v58  ;;  %v1108_v9 = vmul.f32 %v4132_v35, %v3330_v48  ;;  %v1122_v2 = vmul.f32 %v4136_v55, %v3351_v56  ;;  %v4227_v47 = vld [vmem:[#allocation190_spill] sm:$0xff]  ;;  %v4229_v35 = vld [vmem:[#allocation185_spill] sm:$0xff]  ;;  %v4233_v27 = vld [vmem:[#allocation79_spill] sm:$0xff] }
 0x1d1   : > { %v1239_v53 = vadd.f32 %v1236_v33, %v1211_v46  ;;  %v1083_v29 = vadd.f32 %v1080_v23, %v4222_v30  ;;  %1025 = vrot.lane.b32.xlu0 %v1019_v63, %s1819_s0  ;;  %v1072_v11 = vadd.f32 %v1069_v4, %v4223_v8  ;;  %v1276_v42 = vmul.f32 %v4225_v52, %v3233_v15  ;;  %v4230_v55 = vld [vmem:[#allocation114_spill] sm:$0xff]  ;;  %v4234_v25 = vld [vmem:[#allocation101_spill] sm:$0xff]  ;;  %v4236_v33 = vld [vmem:[#allocation176_spill] sm:$0xff] }
 0x1d2   : > { %v1097_v21 = vadd.f32 %v1094_v16, %v4224_v1  ;;  %v1290_v43 = vadd.f32 %v4227_v47, %v4226_v41  ;;  %v1111_v31 = vadd.f32 %v1108_v9, %v4228_v22  ;;  %v1125_v12 = vadd.f32 %v1122_v2, %v4229_v35  ;;  %v4237_v23 = vld [vmem:[#allocation108_spill] sm:$0xff]  ;;  %v4238_v63 = vld [vmem:[#allocation191_spill] sm:$0xff]  ;;  %v4240_v16 = vld [vmem:[#allocation186_spill] sm:$0xff] }
 0x1d3   : > { %v1242_v49 = vadd.f32 %v1239_v53, %v1225_v13  ;;  %v1086_v6 = vadd.f32 %v1083_v29, %v1058_v20  ;;  %v1279_v61 = vadd.f32 %v1276_v42, %v4230_v55  ;;  %v1301_v5 = vmul.f32 %v4232_v3, %v3272_v14  ;;  %v4241_v30 = vld [vmem:[#allocation188_spill] sm:$0xff]  ;;  %v4245_v22 = vld [vmem:[#allocation174_spill] sm:$0xff] }
 0x1d4   : > { %v1100_v36 = vadd.f32 %v1097_v21, %v1072_v11  ;;  %v1293_v37 = vadd.f32 %v1290_v43, %v4231_v45  ;;  %v1315_v0 = vmul.f32 %v4233_v27, %v4158_v10  ;;  %v1329_v28 = vmul.f32 %v4234_v25, %v3307_v19  ;;  %v4242_v11 = vld [vmem:[#allocation116_spill] sm:$0xff]  ;;  %v4243_v21 = vld [vmem:[#allocation33_spill] sm:$0xff] }
 0x1d5   : > { %1249 = vrot.lane.b32.xlu1 %v1242_v49, %s1820_s1  ;;  %v1114_v18 = vadd.f32 %v1111_v31, %v1086_v6  ;;  %v1343_v46 = vmul.f32 %v4235_v7, %v3382_v57  ;;  %v1304_v26 = vadd.f32 %v1301_v5, %v4236_v33  ;;  %v1165_v20 = vmul.f32 %v4206_v44, %v3233_v15  ;;  %v4244_v44 = vld [vmem:[#allocation192_spill] sm:$0xff]  ;;  %v4254_v33 = vld [vmem:[#allocation97_spill] sm:$0xff] }
 0x1d6   : > { %v1128_v60 = vadd.f32 %v1125_v12, %v1100_v36  ;;  %v1179_v13 = vadd.f32 %v4238_v63, %v4237_v23  ;;  %v1318_v4 = vadd.f32 %v1315_v0, %v4239_v17  ;;  %v1332_v53 = vadd.f32 %v1329_v28, %v4240_v16  ;;  %v4247_v12 = vld [vmem:[#allocation135_spill] sm:$0xff]  ;;  %v4248_v36 = vld [vmem:[#allocation42_spill] sm:$0xff]  ;;  %v4256_v17 = vld [vmem:[#allocation68_spill] sm:$0xff] }
 0x1d7   : > { %v1346_v29 = vadd.f32 %v1343_v46, %v4241_v30  ;;  %v1190_v9 = vmul.f32 %v4139_v34, %v3272_v14  ;;  %v1307_v8 = vadd.f32 %v1304_v26, %v1279_v61  ;;  %v1168_v1 = vadd.f32 %v1165_v20, %v4242_v11  ;;  %v4246_v34 = vld [vmem:[#allocation84_spill] sm:$0xff]  ;;  %v4252_v28 = vld [vmem:[#allocation194_spill] sm:$0xff]  ;;  %v4257_v16 = vld [vmem:[#allocation59_spill] sm:$0xff] }
 0x1d8   : > { %v1131_v2 = vadd.f32 %v1128_v60, %v1114_v18  ;;  %v1182_v42 = vadd.f32 %v1179_v13, %v4243_v21  ;;  %v1321_v41 = vadd.f32 %v1318_v4, %v1293_v37  ;;  %v1204_v43 = vmul.f32 %v4213_v38, %v4158_v10  ;;  %v4249_v37 = vld [vmem:[#allocation123_spill] sm:$0xff]  ;;  %v4250_v38 = vld [vmem:[#allocation93_spill] sm:$0xff]  ;;  %v4253_v60 = vld [vmem:[#allocation146_spill] sm:$0xff] }
 0x1d9   : > { %v1193_v47 = vadd.f32 %v1190_v9, %v4244_v44  ;;  %v1218_v49 = vmul.f32 %v4141_v54, %v3307_v19  ;;  %v1335_v6 = vadd.f32 %v1332_v53, %v1307_v8  ;;  %v1228_v31 = vmul.f32 %v4246_v34, %v4245_v22  ;;  %v4251_v54 = vld [vmem:[#allocation126_spill] sm:$0xff]  ;;  %v4255_v13 = vld [vmem:[#allocation145_spill] sm:$0xff]  ;;  %v4260_v11 = vld [vmem:[#allocation172_spill] sm:$0xff] }
 0x1da   : > { %1138 = vrot.lane.b32.xlu0 %v1131_v2, %s1818_s26  ;;  %v1232_v35 = vmul.f32 %v4142_v50, %v3382_v57  ;;  %v1281_v55 = vadd.f32 %v4248_v36, %v4247_v12  ;;  %v1349_v61 = vadd.f32 %v1346_v29, %v1321_v41  ;;  %v1207_v5 = vadd.f32 %v1204_v43, %v4249_v37  ;;  %v4258_v29 = vld [vmem:[#allocation161_spill] sm:$0xff]  ;;  %v4259_v9 = vld [vmem:[#allocation98_spill] sm:$0xff]  ;;  %v4263_v44 = vld [vmem:[#allocation45_spill] sm:$0xff] }
 0x1db   : > { %v1196_v45 = vadd.f32 %v1193_v47, %v1168_v1  ;;  %v1221_v18 = vadd.f32 %v1218_v49, %v4250_v38  ;;  %v1292_v46 = vadd.f32 %v4252_v28, %v4251_v54  ;;  %v1299_v26 = vmul.f32 %v4254_v33, %v4253_v60  ;;  %v4261_v1 = vld [vmem:[#allocation99_spill] sm:$0xff]  ;;  %v4262_v41 = vld [vmem:[#allocation133_spill] sm:$0xff]  ;;  %v4266_v37 = vld [vmem:[#allocation142_spill] sm:$0xff] }
 0x1dc   : > { %v1235_v0 = vadd.f32 %v1232_v35, %v1228_v31  ;;  %v1303_v20 = vmul.f32 %v4232_v3, %v3288_v32  ;;  %v1352_v50 = vadd.f32 %v1349_v61, %v1335_v6  ;;  %v1210_v23 = vadd.f32 %v1207_v5, %v1182_v42  ;;  %v4264_v35 = vld [vmem:[#allocation67_spill] sm:$0xff]  ;;  %v4267_v5 = vld [vmem:[#allocation54_spill] sm:$0xff]  ;;  %v4269_v28 = vld [vmem:[#allocation164_spill] sm:$0xff] }
 0x1dd   : > { %v1224_v63 = vadd.f32 %v1221_v18, %v1196_v45  ;;  %v1320_v4 = vadd.f32 %v4256_v17, %v4255_v13  ;;  %v1295_v53 = vadd.f32 %v1292_v46, %v4257_v16  ;;  %v1327_v2 = vmul.f32 %v4259_v9, %v4258_v29  ;;  %v4265_v12 = vld [vmem:[#allocation151_spill] sm:$0xff]  ;;  %v4268_v18 = vld [vmem:[#allocation134_spill] sm:$0xff] }
 0x1de   : > { %v1306_v30 = vadd.f32 %v1303_v20, %v1299_v26  ;;  %v1331_v8 = vmul.f32 %v4234_v25, %v3322_v59  ;;  %1358 = vrot.lane.b32.xlu1 %v1352_v50, %s1821_s5  ;;  %v1238_v32 = vadd.f32 %v1235_v0, %v1210_v23  ;;  %v1341_v21 = vmul.f32 %v4261_v1, %v4260_v11 }
 0x1df   : > { %v1345_v42 = vmul.f32 %v4235_v7, %v3345_v62  ;;  %v1273_v47 = vmul.f32 %v4263_v44, %v4262_v41  ;;  %v1323_v49 = vadd.f32 %v1320_v4, %v1295_v53  ;;  %v1277_v59 = vmul.f32 %v4225_v52, %v3249_v40 }
 0x1e0   : > { %v1309_v43 = vadd.f32 %v1306_v30, %v1281_v55  ;;  %v1334_v6 = vadd.f32 %v1331_v8, %v1327_v2  ;;  %v1241_v34 = vadd.f32 %v1238_v32, %v1224_v63  ;;  %v1288_v62 = vmul.f32 %v4264_v35, %v4170_v39 }
 0x1e1   : > { %v1348_v31 = vadd.f32 %v1345_v42, %v1341_v21  ;;  %v1298_v36 = vmul.f32 %v4254_v33, %v4265_v12  ;;  %v1280_v45 = vadd.f32 %v1277_v59, %v1273_v47  ;;  %v1302_v55 = vmul.f32 %v4232_v3, %v3303_v24  ;;  %v4270_v33 = vld [vmem:[#allocation175_spill] sm:$0xff]  ;;  %v4274_v47 = vld [vmem:[#allocation124_spill] sm:$0xff] }
 0x1e2   : > { %v1337_v61 = vadd.f32 %v1334_v6, %v1309_v43  ;;  %v1312_v52 = vmul.f32 %v4267_v5, %v4266_v37  ;;  %1247 = vrot.lane.b32.xlu0 %v1241_v34, %s1820_s1  ;;  %v1291_v0 = vadd.f32 %v1288_v62, %v4268_v18  ;;  %v1316_v54 = vmul.f32 %v4233_v27, %v3277_v58  ;;  %v4271_v27 = vld [vmem:[#allocation34_spill] sm:$0xff] }
 0x1e3   : > { %v1351_v38 = vadd.f32 %v1348_v31, %v1323_v49  ;;  %v1326_v46 = vmul.f32 %v4259_v9, %v4269_v28  ;;  %v1305_v3 = vadd.f32 %v1302_v55, %v1298_v36  ;;  %v1330_v60 = vmul.f32 %v4234_v25, %v3330_v48 }
 0x1e4   : > { %v1340_v26 = vmul.f32 %v4261_v1, %v4270_v33  ;;  %v1344_v20 = vmul.f32 %v4235_v7, %v3351_v56  ;;  %v1294_v23 = vadd.f32 %v1291_v0, %v4271_v27  ;;  %v1319_v63 = vadd.f32 %v1316_v54, %v1312_v52  ;;  %v4280_v52 = vld [vmem:[#allocation35_spill] sm:$0xff] }
 0x1e5   : > { %v1354_v50 = vadd.f32 %v1351_v38, %v1337_v61  ;;  %v664_v13 = vstv %s3610_s11  ;;  %v1308_v17 = vadd.f32 %v1305_v3, %v1280_v45  ;;  %v1333_v4 = vadd.f32 %v1330_v60, %v1326_v46  ;;  %v4278_v45 = vld [vmem:[#allocation41_spill] sm:$0xff] }
 0x1e6   : > { %v1347_v16 = vadd.f32 %v1344_v20, %v1340_v26  ;;  %v648_v25 = vmul.f32 %v646_v51, %v3249_v40  ;;  %v1322_v7 = vadd.f32 %v1319_v63, %v1294_v23  ;;  %v4272_v53 = vstv %s2710_s15  ;;  %v4281_v3 = vld [vmem:[#allocation117_spill] sm:$0xff]  ;;  %v4283_v20 = vld [vmem:[#allocation131_spill] sm:$0xff]  ;;  %v4286_v63 = vld [vmem:[#allocation36_spill] sm:$0xff] }
 0x1e7   : > { %1362 = vrot.lane.b32.xlu1 %v1354_v50, %s1821_s5  ;;  %v656_v30 = vmul.f32 %v4272_v53, %v4170_v39  ;;  %v666_v29 = vmul.f32 %v664_v13, %v3303_v24  ;;  %v674_v9 = vstv %s3624_s24  ;;  %v1336_v2 = vadd.f32 %v1333_v4, %v1308_v17  ;;  %v4287_v17 = vld [vmem:[#allocation153_spill] sm:$0xff] }
 0x1e8   : > { %v676_v8 = vmul.f32 %v674_v9, %v3277_v58  ;;  %v684_v32 = vstv %s3628_s9  ;;  %v694_v11 = vstv %s3630_s2  ;;  %v1350_v1 = vadd.f32 %v1347_v16, %v1322_v7 }
 0x1e9   : > { %v686_v40 = vmul.f32 %v684_v32, %v3330_v48  ;;  %v696_v21 = vmul.f32 %v694_v11, %v3351_v56  ;;  %v4273_v42 = vstv %s2583_s23  ;;  %v4275_v39 = vstv %s2585_s16  ;;  %s1611_s23 = sshll.u32 %s4289_s19, 7  ;;  %s4293_s16 = sshll.u32 %s4290_s10, 3 }
 0x1ea   : > { %v645_v44 = vmul.f32 %v4273_v42, %v4262_v41  ;;  %v653_v24 = vmul.f32 %v4275_v39, %v4274_v47  ;;  %v4276_v43 = vstv %s2673_s20  ;;  %v4277_v58 = vstv %s2645_s14  ;;  %s171_s17 = scalar_lea.vmem [#allocation7], %s4293_s16  ;;  %s3718_s4 = scalar_lea.hbm %s4295_s3, %s1611_s23 }
 0x1eb   : > { %v663_v49 = vmul.f32 %v4276_v43, %v4265_v12  ;;  %v673_v6 = vmul.f32 %v4277_v58, %v4266_v37  ;;  %v681_v59 = vstv %s3640_s13  ;;  %v1353_v34 = vadd.f32 %v1350_v1, %v1336_v2  ;;  %s1413_s27 = sshll.u32 %s171_s17, 4  ;;  %s1739_s14 = sshll.u32 %s1822_s29, 4  ;;  %s3720_s27 = int_to_ptr.vmem [resolvable:$true] %s1413_s27  ;;  %s1740_s14 = int_to_ptr.vmem [resolvable:$false] %s1739_s14 }
 0x1ec   : > { %v650_v31 = vadd.f32 %v648_v25, %v645_v44  ;;  %v683_v48 = vmul.f32 %v681_v59, %v4269_v28  ;;  %v691_v56 = vstv %s3648_s18  ;;  %v658_v35 = vadd.f32 %v656_v30, %v653_v24  ;;  %s1735_s8 = scalar_lea.vmem %s3720_s27, 128  ;;  %s1741_s20 = scalar_lea.vmem %s1740_s14, 256 }
 0x1ed   : > { %v668_v62 = vadd.f32 %v666_v29, %v663_v49  ;;  %v678_v36 = vadd.f32 %v676_v8, %v673_v6  ;;  %v693_v41 = vmul.f32 %v691_v56, %v4270_v33  ;;  %1360 = vrot.lane.b32.xlu0 %v1353_v34, %s1821_s5  ;;  %v647_v12 = vmul.f32 %v646_v51, %v3233_v15  ;;  %v4282_v33 = vld [vmem:[#allocation109_spill] sm:$0xff]  ;;  %p1736_p8 = scmp.ne.s32.totalorder %s3720_s27, %s1735_s8  ;;  %p1742_p1 = scmp.lt.s32.totalorder %s3720_s27, %s1740_s14 }
 0x1ee   : > { %v688_v61 = vadd.f32 %v686_v40, %v683_v48  ;;  %v4279_v55 = vmov %v4272_v53  ;;  %v665_v5 = vmul.f32 %v664_v13, %v3272_v14  ;;  %v660_v38 = vadd.f32 %v658_v35, %v4280_v52  ;;  %v4285_v14 = vld [vmem:[#allocation125_spill] sm:$0xff]  ;;  %p1743_p2 = scmp.lt.s32.totalorder %s1741_s20, %s1735_s8 }
 0x1ef   : > { %v655_v37 = vmul.f32 %v4279_v55, %v4278_v45  ;;  %v670_v18 = vadd.f32 %v668_v62, %v650_v31  ;;  %v698_v0 = vadd.f32 %v696_v21, %v693_v41  ;;  %v675_v54 = vmul.f32 %v674_v9, %v4158_v10  ;;  %p1737_p11 = pnand %p1736_p8, %p4296_p9 }
 0x1f0   : > { %v685_v28 = vmul.f32 %v684_v32, %v3307_v19  ;;  %v695_v46 = vmul.f32 %v694_v11, %v3382_v57  ;;  %v649_v60 = vadd.f32 %v647_v12, %v4281_v3  ;;  %v680_v15 = vadd.f32 %v678_v36, %v660_v38  ;;  %p1744_p12 = por %p1743_p2, %p1742_p1 }
 0x1f1   : > { %v657_v26 = vadd.f32 %v655_v37, %v4282_v33  ;;  %v690_v51 = vadd.f32 %v688_v61, %v670_v18  ;;  %v4284_v50 = vmov %v4276_v43  ;;  %v677_v23 = vadd.f32 %v675_v54, %v4285_v14  ;;  %p1738_p5 = pneg %p1737_p11 }
 0x1f2   : > { %v662_v27 = vmul.f32 %v4284_v50, %v4283_v20  ;;  %v682_v4 = vmul.f32 %v681_v59, %v4287_v17  ;;  %v692_v10 = vmul.f32 %v691_v56, %v4245_v22  ;;  %v700_v19 = vadd.f32 %v698_v0, %v680_v15 }
 0x1f3   : > { %v659_v13 = vadd.f32 %v657_v26, %v4286_v63  ;;  %vm809_vm9 = vcmask 916480   ;;  %vm920_vm10 = vcmask 785408   ;;  %vm1031_vm13 = vcmask 654336   ;;  %p1745_p0 = pnand %p1744_p12, %p1738_p5 }
 0x1f4   : > { %v667_v16 = vadd.f32 %v665_v5, %v662_v27  ;;  %v687_v25 = vadd.f32 %v685_v28, %v682_v4  ;;  %v697_v7 = vadd.f32 %v695_v46, %v692_v10  ;;  %v702_v53 = vadd.f32 %v700_v19, %v690_v51 }
 0x1f5   : > { %v679_v57 = vadd.f32 %v677_v23, %v659_v13  ;;  %vm1142_vm14 = vcmask 523264   ;;  %vm1253_vm15 = vcmask 392192   ;;  %vm1364_vm0 = vcmask 261120  }
 0x1f6   : > { %v669_v30 = vadd.f32 %v667_v16, %v649_v60  ;;  %v4291_v23 = vlaneseq  ;;  %v1691_v16 = vld [vmem:[%s4288_s6] sm:$0xff] }
 0x1f7   : > { %v699_v29 = vadd.f32 %v697_v7, %v679_v57 }
 0x1f8   : > { %v689_v9 = vadd.f32 %v687_v25, %v669_v30  ;;  %v1384_v63 = vshrl.u32 %v4291_v23, 7  ;;  %v4294_v25 = vld [vmem:[#allocation22_spill] sm:$0xff] }
 0x1fa   : > { %v701_v2 = vadd.f32 %v699_v29, %v689_v9  ;;  %v1385_v13 = vsub.s32 0, %v1384_v63 }
 0x21d   : > { %v919_v8 = vpop.permute.xlu1 %918 }
 0x21e   : > { %v808_v32 = vpop.permute.xlu0 %807 }
 0x221   : > { %v1141_v11 = vpop.permute.xlu1 %1140 }
 0x222   : > { %v1030_v1 = vpop.permute.xlu0 %1029 }
 0x226   : > { %v1252_v21 = vpop.permute.xlu0 %1251 }
 0x228   : > { %v806_v40 = vpop.permute.xlu1 %805 }
 0x229   : > { %v811_v43 = vsel %vm809_vm9, %v806_v40, %v808_v32 }
 0x22a   : > { %v815_v6 = vadd.f32 %v811_v43, %v702_v53 }
 0x22d   : > { %v915_v42 = vpop.permute.xlu1 %914 }
 0x231   : > { %v804_v44 = vpop.permute.xlu0 %803 }
 0x232   : > { %v810_v34 = vsel %vm809_vm9, %v804_v44, %v806_v40 }
 0x233   : > { %v814_v56 = vadd.f32 %v810_v34, %v701_v2 }
 0x236   : > { %v1028_v47 = vpop.permute.xlu1 %1027 }
 0x237   : > { %v1033_v62 = vsel %vm1031_vm13, %v1028_v47, %v1030_v1 }
 0x23a   : > { %v917_v22 = vpop.permute.xlu0 %916 }
 0x23b   : > { %v922_v58 = vsel %vm920_vm10, %v917_v22, %v919_v8  ;;  %v921_v48 = vsel %vm920_vm10, %v915_v42, %v917_v22 }
 0x23c   : > { %v926_v31 = vadd.f32 %v922_v58, %v815_v6  ;;  %v925_v61 = vadd.f32 %v921_v48, %v814_v56 }
 0x23e   : > { %v1137_v39 = vpop.permute.xlu1 %1136  ;;  %v1037_v12 = vadd.f32 %v1033_v62, %v926_v31 }
 0x243   : > { %v1026_v24 = vpop.permute.xlu0 %1025 }
 0x244   : > { %v1032_v36 = vsel %vm1031_vm13, %v1026_v24, %v1028_v47 }
 0x245   : > { %v1036_v37 = vadd.f32 %v1032_v36, %v925_v61 }
 0x247   : > { %v1250_v49 = vpop.permute.xlu1 %1249 }
 0x248   : > { %v1255_v0 = vsel %vm1253_vm15, %v1250_v49, %v1252_v21 }
 0x24c   : > { %v1139_v59 = vpop.permute.xlu0 %1138 }
 0x24d   : > { %v1144_v41 = vsel %vm1142_vm14, %v1139_v59, %v1141_v11  ;;  %v1143_v55 = vsel %vm1142_vm14, %v1137_v39, %v1139_v59 }
 0x24e   : > { %v1148_v5 = vadd.f32 %v1144_v41, %v1037_v12  ;;  %v1147_v38 = vadd.f32 %v1143_v55, %v1036_v37 }
 0x250   : > { %v1359_v35 = vpop.permute.xlu1 %1358  ;;  %v1259_v46 = vadd.f32 %v1255_v0, %v1148_v5 }
 0x254   : > { %v1248_v45 = vpop.permute.xlu0 %1247 }
 0x255   : > { %v1254_v52 = vsel %vm1253_vm15, %v1248_v45, %v1250_v49 }
 0x256   : > { %v1258_v54 = vadd.f32 %v1254_v52, %v1147_v38 }
 0x259   : > { %v1363_v18 = vpop.permute.xlu1 %1362 }
 0x25f   : > { %v1361_v28 = vpop.permute.xlu0 %1360 }
 0x260   : > { %v1365_v3 = vsel %vm1364_vm0, %v1359_v35, %v1361_v28  ;;  %v1366_v60 = vsel %vm1364_vm0, %v1361_v28, %v1363_v18 }
 0x261   : > { %v1369_v33 = vadd.f32 %v1365_v3, %v1258_v54  ;;  %v1370_v26 = vadd.f32 %v1366_v60, %v1259_v46 }
 0x263   : > { %v1603_v15 = vmul.f32 -1.442695, %v1369_v33  ;;  %v1604_v51 = vmul.f32 -1.442695, %v1370_v26 }
 0x265   : > { %1683 = vpow2.f32 %v1603_v15 }
 0x266   : > { %1685 = vpow2.f32 %v1604_v51 }
 0x26f   : > { %v1684_v20 = vpop.eup %1683 }
 0x270   : > { %v1686_v50 = vpop.eup %1685  ;;  %v1377_v27 = vadd.f32 1.0, %v1684_v20 }
 0x271   : > { %v1378_v14 = vadd.f32 1.0, %v1686_v50 }
 0x272   : > { %1687 = vrcp.f32 %v1377_v27 }
 0x273   : > { %1689 = vrcp.f32 %v1378_v14 }
 0x27c   : > { %v1688_v17 = vpop.eup %1687 }
 0x27d   : > { %v1690_v4 = vpop.eup %1689  ;;  %v1386_v10 = vrot.slane %v1688_v17, %v1385_v13 }
 0x27e   : > { %v1390_v19 = vrot.slane %v1690_v4, %v1385_v13 }
 0x27f   : > { %v1391_v57 = vmul.f32 %v1691_v16, %v1386_v10 }
 0x280   : > { %v1392_v7 = vmul.f32 %v1390_v19, %v4294_v25 }
 0x282   : > { %v1395_v53 = vcombine.low %v1391_v57, %v1392_v7 }
 0x284   : > { %1397 = vst [vmem:[%s171_s17] sm:$0xff] %v1395_v53 }
 0x285   : > { %1748 = shalt.err (!%p1745_p0)
}
 0x286   : > { %s1749_s15 = scalar_lea.hbm %s3718_s4, 128  ;;  %s1753_s25 = scalar_lea.hbm %s4295_s3, 256 }
 0x287   : > { %p1750_p3 = scmp.ne.s32.totalorder %s3718_s4, %s1749_s15  ;;  %p1754_p6 = scmp.lt.u32.totalorder %s3718_s4, %s4295_s3 }
 0x288   : > { %p1755_p13 = scmp.lt.u32.totalorder %s1753_s25, %s1749_s15  ;;  %p1757_p8 = scmp.lt.u32.totalorder %s1749_s15, %s3718_s4 }
 0x289   : > { %p1751_p7 = pnand %p1750_p3, %p4296_p9 }
 0x28a   : > { %p1756_p4 = por %p1755_p13, %p1754_p6 }
 0x28b   : > { %p1752_p10 = pneg %p1751_p7 }
 0x28c   : > { %p1758_p11 = por %p1757_p8, %p1756_p4 }
 0x28e   : > { %p1759_p5 = pnand %p1758_p11, %p1752_p10 }
 0x290   : > { %1762 = shalt.err (!%p1759_p5)
}
 0x291   : > { %1618 = dma.vmem_to_hbm [thread:$0]  (%p4296_p9), %s3720_s27, 128, %s3718_s4, %s1399_s7  }
 0x292 PF: > { %s4297_s1 = sld [smem:[#allocation11_spill]]  ;;  %s4298_s11 = sld [smem:[#allocation16_spill]] }
 0x293   : > { %s4299_s5 = sld [smem:[#allocation14_spill]] }
 0x298   : > { %s1425_s24 = sand.u32 1, %s4297_s1   ;;  %p4300_p1 = scmp.ne.s32.totalorder %s4298_s11, 0 }
 0x299   : > { %p4301_p2 = scmp.ge.s32.totalorder %s4299_s5, 2  ;;  %s1426_s9 = scalar_lea.sflag [#allocation4], %s1425_s24 }
 0x29b   : > { %p1629_p12 = pnand %p4301_p2, %p4300_p1 }
 0x29d   : > { %1788 = dma.done.wait (!%p1629_p12), %s1426_s9, 128  }
 0x29e   : > { %1790 = vsyncadd (!%p1629_p12), %s1426_s9, 4294967168  ;;  %s4302_s12 = sld [smem:[#allocation17_spill]]  ;;  %s4303_s9 = sld [smem:[#allocation12_spill]] }
 0x29f   : > { %s4304_s10 = sld [smem:[#allocation13_spill]]  ;;  %s4305_s11 = sld [smem:[#allocation18_spill]] }
 0x2a4   : > { %p16_p0 = scmp.ge.s32.totalorder %s4302_s12, 4  }
 0x2a6   :  { %18 = sbr.rel (!%p16_p0) target bundleno = 10 (0xa), region = 78 }
 0x2ad   :  { %1431 = vsyncpa [#allocation3], 1 }
 0x2ae   :  { %1433 = vsyncpa [#allocation3 + $0x1], 1 }
 0x2af   :  { %1434 = vsyncpa [#allocation4], 1 }
 0x2b0   :  { %1436 = vsyncpa [#allocation4 + $0x1], 1 }
 0x2b1   :  { %1437 = vsyncpa [#allocation5], 1 }
 0x2b2   :  { %1439 = vsyncpa [#allocation5 + $0x1], 1 }

</bundles_post_ra>
